<compile_context>
chip_gen: v7x
topology: tpu7x:2x2x1
jax: 0.10.0
libtpu: 0.0.40
codegen_flags: <defaults>
</compile_context>

<pallas_src>
import functools

import jax
import jax.numpy as jnp
from jax.experimental import pallas as pl
from jax.experimental.pallas import tpu as pltpu

DTYPE = jnp.float32
LANE = 128

# Worst-case split-kernel working set at 512 tiles with the stacked lower/upper axis:
#   (L + U + A(2x)) x 2 bufs + out(2x) x 2 bufs + acc(2x)  ~= 14 MiB
# -> 32 MiB scoped VMEM is safe on v5e/v6e (128 MiB phys) and v7x (64 MiB phys, 32 MiB default).
VMEM_LIMIT = 32 * 1024 * 1024

# Steps whose padded dims are all <= FASTPATH_MAX skip Pallas entirely (plain XLA ops).
FASTPATH_MAX = 256
FORCE_XLA_FASTPATH = False   # test hook: route every step through the XLA reference path


def _round_up(x, m):
    return ((x + m - 1) // m) * m


def _pad_dim(d):
    """Every stored / propagated dim is padded to a multiple of 128 (min 128)."""
    return max(LANE, _round_up(d, LANE))


def _tile(padded):
    """Largest MXU-friendly tile dividing a padded dim."""
    for t in (512, 256, 128):
        if padded % t == 0:
            return t
    raise ValueError(padded)


def _pad2d(x, P, Q):
    x = x.astype(DTYPE)
    p, q = x.shape
    if (p, q) == (P, Q):
        return x
    return jnp.zeros((P, Q), DTYPE).at[:p, :q].set(x)


# ----------------------------------------------------------------------------
# Kernel 1a: exact back-substitution step (stored L == U):  out[b] = L @ A[b]
# ----------------------------------------------------------------------------
def _mm_exact_kernel(l_ref, a_ref, o_ref, acc_ref):
    @pl.when(pl.program_id(2) == 0)
    def _():
        acc_ref[...] = jnp.zeros_like(acc_ref)

    l = l_ref[...]
    acc_ref[0] += jnp.dot(l, a_ref[0], preferred_element_type=jnp.float32)
    acc_ref[1] += jnp.dot(l, a_ref[1], preferred_element_type=jnp.float32)

    @pl.when(pl.program_id(2) == pl.num_programs(2) - 1)
    def _():
        o_ref[...] = acc_ref[...]


def _backsub_exact(Lp, A):
    P, Q = Lp.shape
    two, Q2, R = A.shape
    assert two == 2 and Q2 == Q, (Lp.shape, A.shape)
    tm, tk, tn = _tile(P), _tile(Q), _tile(R)
    return pl.pallas_call(
        _mm_exact_kernel,
        grid=(P // tm, R // tn, Q // tk),
        in_specs=[
            pl.BlockSpec((tm, tk), lambda i, j, k: (i, k)),
            pl.BlockSpec((2, tk, tn), lambda i, j, k: (0, k, j)),
        ],
        out_specs=pl.BlockSpec((2, tm, tn), lambda i, j, k: (0, i, j)),
        out_shape=jax.ShapeDtypeStruct((2, P, R), DTYPE),
        scratch_shapes=[pltpu.VMEM((2, tm, tn), jnp.float32)],
        compiler_params=pltpu.CompilerParams(
            dimension_semantics=("parallel", "parallel", "arbitrary"),
            vmem_limit_bytes=VMEM_LIMIT),
    )(Lp, A)


def _backsub_exact_xla(Lp, A):
    return jnp.einsum('pq,bqr->bpr', Lp, A)


# ----------------------------------------------------------------------------
# Kernel 1b: sign-split back-substitution step (stored L != U), lower/upper stacked on a
# leading axis of size 2 so each L/U tile is loaded once for both halves:
#     lower (slot 0): out = L @ max(A,0) + U @ min(A,0)
#     upper (slot 1): out = L @ min(A,0) + U @ max(A,0)
# ----------------------------------------------------------------------------
def _mm_split_kernel(l_ref, u_ref, a_ref, o_ref, acc_ref):
    @pl.when(pl.program_id(2) == 0)
    def _():
        acc_ref[...] = jnp.zeros_like(acc_ref)

    a = a_ref[...]                    # (2, tk, tn)
    pos = jnp.maximum(a, 0.0)
    neg = a - pos                     # single subtract instead of a second min/select
    l = l_ref[...]
    u = u_ref[...]
    acc_ref[0] += (jnp.dot(l, pos[0], preferred_element_type=jnp.float32)
                   + jnp.dot(u, neg[0], preferred_element_type=jnp.float32))
    acc_ref[1] += (jnp.dot(l, neg[1], preferred_element_type=jnp.float32)
                   + jnp.dot(u, pos[1], preferred_element_type=jnp.float32))

    @pl.when(pl.program_id(2) == pl.num_programs(2) - 1)
    def _():
        o_ref[...] = acc_ref[...]


def _backsub_split(Lp, Up, A):
    P, Q = Lp.shape
    two, Q2, R = A.shape
    assert two == 2 and Q2 == Q and Up.shape == Lp.shape
    tm, tk, tn = _tile(P), _tile(Q), _tile(R)
    return pl.pallas_call(
        _mm_split_kernel,
        grid=(P // tm, R // tn, Q // tk),
        in_specs=[
            pl.BlockSpec((tm, tk), lambda i, j, k: (i, k)),
            pl.BlockSpec((tm, tk), lambda i, j, k: (i, k)),
            pl.BlockSpec((2, tk, tn), lambda i, j, k: (0, k, j)),
        ],
        out_specs=pl.BlockSpec((2, tm, tn), lambda i, j, k: (0, i, j)),
        out_shape=jax.ShapeDtypeStruct((2, P, R), DTYPE),
        scratch_shapes=[pltpu.VMEM((2, tm, tn), jnp.float32)],
        compiler_params=pltpu.CompilerParams(
            dimension_semantics=("parallel", "parallel", "arbitrary"),
            vmem_limit_bytes=VMEM_LIMIT),
    )(Lp, Up, A)


def _backsub_split_xla(Lp, Up, A):
    pos = jnp.maximum(A, 0.0)
    neg = A - pos
    lo = Lp @ pos[0] + Up @ neg[0]
    hi = Lp @ neg[1] + Up @ pos[1]
    return jnp.stack([lo, hi])


# ----------------------------------------------------------------------------
# Kernel 1c: diagonal (ReLU) back-substitution step -- VPU only, O(N*R), Q-tiled.
#   stored lower = diag(dl), stored upper = diag(du) + e_{last_row} * bu^T
#   out = dl*pL + du*pU (row-wise scale); the bias row (bu . pU) is accumulated across Q tiles
#   in a small VMEM scratch and added once into the static last row.
#   dl/du/bu are packed into lanes 0/1/2 of one (Q,128) buffer.
# ----------------------------------------------------------------------------
def _diag_step_kernel(pk_ref, a_ref, o_ref, bias_ref, *, last_local):
    qi = pl.program_id(1)

    @pl.when(qi == 0)
    def _():
        bias_ref[...] = jnp.zeros_like(bias_ref)

    a = a_ref[...]                        # (2, tq, tn)
    dl = pk_ref[:, 0:1]                   # (tq, 1)
    du = pk_ref[:, 1:2]
    bu = pk_ref[:, 2:3]
    pos = jnp.maximum(a, 0.0)
    neg = a - pos
    pu_lo, pu_hi = neg[0], pos[1]         # parts routed through the stored UPPER matrix
    out_lo = dl * pos[0] + du * pu_lo
    out_hi = dl * neg[1] + du * pu_hi
    o_ref[0] = out_lo
    o_ref[1] = out_hi
    bias_ref[0] += jnp.sum(bu * pu_lo, axis=0, keepdims=True)   # (1, tn)
    bias_ref[1] += jnp.sum(bu * pu_hi, axis=0, keepdims=True)

    @pl.when(qi == pl.num_programs(1) - 1)
    def _():
        o_ref[0, pl.ds(last_local, 1), :] = (
            out_lo[last_local:last_local + 1, :] + bias_ref[0])
        o_ref[1, pl.ds(last_local, 1), :] = (
            out_hi[last_local:last_local + 1, :] + bias_ref[1])


def _backsub_diag(pk, A, last_row):
    two, Q, R = A.shape
    assert two == 2 and pk.shape == (Q, LANE)
    tq, tn = _tile(Q), _tile(R)
    nq = Q // tq
    assert last_row // tq == nq - 1        # padding < 128 <= tq guarantees this
    last_local = last_row - (nq - 1) * tq
    kern = functools.partial(_diag_step_kernel, last_local=last_local)
    return pl.pallas_call(
        kern,
        grid=(R // tn, nq),
        in_specs=[
            pl.BlockSpec((tq, LANE), lambda j, qi: (qi, 0)),
            pl.BlockSpec((2, tq, tn), lambda j, qi: (0, qi, j)),
        ],
        out_specs=pl.BlockSpec((2, tq, tn), lambda j, qi: (0, qi, j)),
        out_shape=jax.ShapeDtypeStruct((2, Q, R), DTYPE),
        scratch_shapes=[pltpu.VMEM((2, 1, tn), jnp.float32)],
        compiler_params=pltpu.CompilerParams(
            dimension_semantics=("parallel", "arbitrary"),
            vmem_limit_bytes=VMEM_LIMIT),
    )(pk, A)


def _backsub_diag_xla(pk, A, last_row):
    dl = pk[:, 0:1][None]
    du = pk[:, 1:2][None]
    bu = pk[:, 2:3][None]
    pos = jnp.maximum(A, 0.0)
    neg = A - pos
    p_l = jnp.stack([pos[0], neg[1]])
    p_u = jnp.stack([neg[0], pos[1]])
    out = dl * p_l + du * p_u
    bias = jnp.sum(bu * p_u, axis=1, keepdims=True)
    return out.at[:, last_row:last_row + 1, :].add(bias)


# ----------------------------------------------------------------------------
# Kernel 2: elementwise DeepPoly ReLU relaxation (alpha / lambda / bias / concrete bounds).
#   dead     (u <= 0):       everything 0
#   stable   (l >= 0, u>0):  diag 1, concrete = (l, u)
#   crossing (l < 0 < u):    lower diag = alpha (1e-5 if u < -l else 1),
#                            upper diag = lambda = u/(u-l), upper bias = -lambda*l,
#                            concrete = (alpha*l, u)
# ----------------------------------------------------------------------------
def _relu_bounds_kernel(l_ref, u_ref, dl_ref, du_ref, bu_ref, cl_ref, cu_ref):
    l = l_ref[...]
    u = u_ref[...]
    dead = u <= 0.0
    stable = jnp.logical_and(jnp.logical_not(dead), l >= 0.0)
    crossing = jnp.logical_and(jnp.logical_not(dead), l < 0.0)

    denom = jnp.where(crossing, u - l, 1.0)
    lam = u / denom
    alpha = jnp.where(u < -l, 1e-5, 1.0)   # deterministic alpha init, already in [0,1]

    dl_ref[...] = jnp.where(stable, 1.0, jnp.where(crossing, alpha, 0.0))
    du_ref[...] = jnp.where(stable, 1.0, jnp.where(crossing, lam, 0.0))
    bu_ref[...] = jnp.where(crossing, -lam * l, 0.0)
    cl_ref[...] = jnp.where(stable, l, jnp.where(crossing, alpha * l, 0.0))
    cu_ref[...] = jnp.where(dead, 0.0, u)


def relu_bounds(cl, cu):
    d = cl.shape[0]
    rows = max(8, _round_up(-(-d // LANE), 8))   # pack d across sublanes
    total = rows * LANE
    lp = jnp.zeros((total,), DTYPE).at[:d].set(cl.astype(DTYPE)).reshape(rows, LANE)
    up = jnp.zeros((total,), DTYPE).at[:d].set(cu.astype(DTYPE)).reshape(rows, LANE)
    outs = pl.pallas_call(
        _relu_bounds_kernel,
        grid=(1,),
        in_specs=[pl.BlockSpec((rows, LANE), lambda i: (0, 0))] * 2,
        out_specs=[pl.BlockSpec((rows, LANE), lambda i: (0, 0))] * 5,
        out_shape=[jax.ShapeDtypeStruct((rows, LANE), DTYPE)] * 5,
        compiler_params=pltpu.CompilerParams(
            dimension_semantics=("arbitrary",)),
    )(lp, up)
    return tuple(o.reshape(-1)[:d] for o in outs)


# ----------------------------------------------------------------------------
# Back-substitution bookkeeping (plain-Python glue).  Entries are pre-padded once.
# ----------------------------------------------------------------------------
class _Entry:
    def __init__(self, kind, p, q, Lp=None, Up=None, pk=None):
        self.kind = kind   # "exact" (L==U) | "split" | "diag" (ReLU)
        self.p = p         # true rows  (prev-layer dim + 1)
        self.q = q         # true cols  (cur-layer  dim + 1)
        self.Lp = Lp
        self.Up = Up
        self.pk = pk       # diag entries: (Qp,128), lanes 0/1/2 = dl / du / bias-row


class BackSubModule:
    def __init__(self, input_lower, input_upper, max_alphas=1_000_000):
        n = input_lower.shape[0]
        one = jnp.ones((1,), DTYPE)
        # Input box stored as (1, n+1) rows: [l_1..l_n, 1] / [u_1..u_n, 1]
        L = jnp.concatenate([input_lower.astype(DTYPE), one]).reshape(1, n + 1)
        U = jnp.concatenate([input_upper.astype(DTYPE), one]).reshape(1, n + 1)
        self.entries = []
        self.skip_indices = []
        self._alpha_count = 0
        self._max_alphas = max_alphas
        self.add_output(L, U, is_exact=False)

    # -- entry management ------------------------------------------------------
    def add_output(self, L, U, is_exact=None):
        if is_exact is None:          # explicit flag preferred (review feedback)
            is_exact = L is U
        p, q = L.shape
        P, Q = _pad_dim(p), _pad_dim(q)
        if is_exact:
            self.entries.append(_Entry("exact", p, q, Lp=_pad2d(L, P, Q)))
        else:
            self.entries.append(
                _Entry("split", p, q, Lp=_pad2d(L, P, Q), Up=_pad2d(U, P, Q)))

    def add_diag_output(self, dl_ext, du_ext, bu_ext):
        n = dl_ext.shape[0]
        Q = _pad_dim(n)
        pk = jnp.zeros((Q, LANE), DTYPE)
        pk = pk.at[:n, 0].set(dl_ext.astype(DTYPE))
        pk = pk.at[:n, 1].set(du_ext.astype(DTYPE))
        pk = pk.at[:n, 2].set(bu_ext.astype(DTYPE))
        self.entries.append(_Entry("diag", n, n, pk=pk))

    def add_skip_index(self, start, end):
        self.skip_indices.append((start, end))

    def is_max_num_alpha(self):
        return self._alpha_count >= self._max_alphas

    def increment_alpha_count(self):
        self._alpha_count += 1

    # -- back substitution -----------------------------------------------------
    def back_substitute_pair(self, A_lo, A_hi, steps=None):
        """Compose (A_lo -> lower selection, A_hi -> upper selection) backwards through the
        stored entries in one stacked chain (leading axis: 0=lower, 1=upper)."""
        q, r = A_lo.shape
        assert A_hi.shape == (q, r)
        Qp, Rp = _pad_dim(q), _pad_dim(r)
        A = jnp.stack([_pad2d(A_lo, Qp, Rp), _pad2d(A_hi, Qp, Rp)])   # (2, Qp, Rp)

        # Add-then-backsub convention: composition starts at the second-to-last entry.
        n = len(self.entries)
        idxs = list(range(n - 2, -1, -1))
        if steps is not None:
            idxs = idxs[:steps]

        cur_p = q
        for i in idxs:
            e = self.entries[i]
            assert e.q == cur_p, (e.q, cur_p)
            Pp, Qe, Rc = _pad_dim(e.p), A.shape[1], A.shape[2]
            small = FORCE_XLA_FASTPATH or max(Pp, Qe, Rc) <= FASTPATH_MAX
            if e.kind == "diag":
                A = (_backsub_diag_xla(e.pk, A, e.q - 1) if small
                     else _backsub_diag(e.pk, A, e.q - 1))
            elif e.kind == "exact":
                A = (_backsub_exact_xla(e.Lp, A) if small
                     else _backsub_exact(e.Lp, A))
            else:
                A = (_backsub_split_xla(e.Lp, e.Up, A) if small
                     else _backsub_split(e.Lp, e.Up, A))
            cur_p = e.p

        return A[0, :cur_p, :r], A[1, :cur_p, :r]

    def back_substitute(self, A, steps=None, lower=True):
        lo, hi = self.back_substitute_pair(A, A, steps=steps)
        return lo if lower else hi


# ----------------------------------------------------------------------------
# Layer wrappers mirroring the PyTorch modules.
# ----------------------------------------------------------------------------
class FullyConnected:
    def __init__(self, W, b, backsub_module):
        self.W = W.astype(DTYPE)          # (out_features, in_features)
        self.b = b.astype(DTYPE)          # (out_features,)
        self.backsub = backsub_module

    def __call__(self, inputs):
        _ = inputs
        bounds = jnp.concatenate([self.W.T, self.b.reshape(1, -1)], axis=0)   # (in+1, out)
        pad = jnp.zeros((bounds.shape[0], 1), DTYPE).at[-1, 0].set(1.0)
        A = jnp.concatenate([bounds, pad], axis=1)                             # (in+1, out+1)
        self.backsub.add_output(A, A, is_exact=True)     # exact single-matmul entry
        bl, bu = self.backsub.back_substitute_pair(A, A)  # one stacked chain for both sides
        out_concrete = (bl[-1, :-1], bu[-1, :-1])
        return out_concrete, (A, A)


class ReLULayer:
    def __init__(self, backsub_module):
        self.backsub = backsub_module

    def __call__(self, inputs):
        (cl, cu), (Al_in, Au_in) = inputs
        N = Al_in.shape[1]
        dl, du, bu, ocl, ocu = relu_bounds(cl, cu)

        one = jnp.ones((1,), DTYPE)
        zero = jnp.zeros((1,), DTYPE)
        dl_ext = jnp.concatenate([dl, one])
        du_ext = jnp.concatenate([du, one])
        bu_ext = jnp.concatenate([bu, zero])

        # Compact diag + bias-row representation (composed by the VPU kernel, never the MXU).
        self.backsub.add_diag_output(dl_ext, du_ext, bu_ext)

        # Dense matrices only for the layer's return value (API parity with the reference).
        A_l = jnp.diag(dl_ext)
        A_u = jnp.diag(du_ext).at[N - 1].add(bu_ext)
        return (ocl, ocu), (A_l, A_u)


class SkipBlockDP:
    """path_spec: list of ("linear", W, b) or ("relu",) tuples."""

    def __init__(self, path_spec, backsub_module):
        self.backsub = backsub_module
        self.input_size = path_spec[0][1].shape[1]       # in_features of first Linear
        self.num_skip_blocks = len(path_spec)
        self.path = []
        for layer in path_spec:
            if layer[0] == "linear":
                self.path.append(FullyConnected(layer[1], layer[2], backsub_module))
            elif layer[0] == "relu":
                self.path.append(ReLULayer(backsub_module))
            else:
                raise ValueError(layer[0])

    def __call__(self, inputs):
        start = len(self.backsub.entries)
        end = start + self.num_skip_blocks - 1
        self.backsub.add_skip_index(start, end)

        out = inputs
        for layer in self.path:
            out = layer(out)
        _, abstract_bounds = out

        eye = jnp.eye(self.input_size + 1, dtype=DTYPE)
        Al_raw, Au_raw = self.backsub.back_substitute_pair(
            abstract_bounds[0], abstract_bounds[1], steps=self.num_skip_blocks - 1)
        Al = (Al_raw + eye).at[-1, -1].set(1.0)
        Au = (Au_raw + eye).at[-1, -1].set(1.0)

        tmp = [self.backsub.entries.pop() for _ in range(self.num_skip_blocks - 1)]
        e_l, e_u = self.backsub.back_substitute_pair(Al, Au)
        for i in range(self.num_skip_blocks - 1):
            self.backsub.entries.append(tmp[-i - 1])

        concrete_bounds = (e_l[-1, :-1], e_u[-1, :-1])
        return concrete_bounds, (Al, Au)


# ----------------------------------------------------------------------------
# Demo
# ----------------------------------------------------------------------------
def _run_skip_block(in_dim, hidden, key, eps):
    k1, k2, k3, k4, k5 = jax.random.split(key, 5)
    W1 = (jax.random.normal(k1, (hidden, in_dim)) / jnp.sqrt(in_dim)).astype(DTYPE)
    b1 = (jax.random.normal(k2, (hidden,)) * 0.1).astype(DTYPE)
    W2 = (jax.random.normal(k3, (in_dim, hidden)) / jnp.sqrt(hidden)).astype(DTYPE)
    b2 = (jax.random.normal(k4, (in_dim,)) * 0.1).astype(DTYPE)
    x = jax.random.normal(k5, (in_dim,)).astype(DTYPE)
    input_lower, input_upper = x - eps, x + eps

    backsub = BackSubModule(input_lower, input_upper)
    block = SkipBlockDP([("linear", W1, b1), ("relu",), ("linear", W2, b2)], backsub)
    concrete_in = (input_lower, input_upper)
    abstract_in = (jnp.eye(in_dim + 1, dtype=DTYPE), jnp.eye(in_dim + 1, dtype=DTYPE))
    (c_lo, c_hi), (A_lo, A_hi) = block((concrete_in, abstract_in))
    jax.block_until_ready((c_lo, c_hi, A_lo, A_hi))
    return (c_lo, c_hi), (A_lo, A_hi)


if __name__ == "__main__":
    key = jax.random.PRNGKey(0)
    k_tiny, k_big, k_chk = jax.random.split(key, 3)

    # 1) direct check of the sign-split MXU kernel against the XLA reference path.
    ka, kb, kc = jax.random.split(k_chk, 3)
    P, Q, R = 384, 512, 384
    Lp = (jax.random.normal(ka, (P, Q)) * 0.05).astype(DTYPE)
    Up = (Lp + jnp.abs(jax.random.normal(kb, (P, Q))) * 0.05).astype(DTYPE)
    A_test = (jax.random.normal(kc, (2, Q, R)) * 0.1).astype(DTYPE)
    got = _backsub_split(Lp, Up, A_test)
    want = _backsub_split_xla(Lp, Up, A_test)
    jax.block_until_ready((got, want))
    assert bool(jnp.allclose(got, want, rtol=1e-3, atol=1e-3)), "split kernel mismatch"

    # 2) tiny skip block (in_dim=8, hidden=16): exercises the small-problem XLA fast path.
    (c_lo, c_hi), (A_lo, A_hi) = _run_skip_block(8, 16, k_tiny, eps=0.1)
    assert c_lo.shape == (8,) and c_hi.shape == (8,)
    assert A_lo.shape == (9, 9) and A_hi.shape == (9, 9)
    assert bool(jnp.all(c_lo <= c_hi + 1e-5))

    # 3) moderate skip block: padded dims 384/512 -> exercises the Pallas exact / split /
    #    diag / relu kernels (512 tiles on the hidden axis).
    in_dim, hidden = 383, 511
    (c_lo, c_hi), (A_lo, A_hi) = _run_skip_block(in_dim, hidden, k_big, eps=0.05)
    assert c_lo.shape == (in_dim,) and A_lo.shape == (in_dim + 1, in_dim + 1)
    assert bool(jnp.all(c_lo <= c_hi + 1e-4))

    # Self-consistency: re-run the same block with every step forced through the XLA path.
    FORCE_XLA_FASTPATH = True
    (r_lo, r_hi), (rA_lo, rA_hi) = _run_skip_block(in_dim, hidden, k_big, eps=0.05)
    FORCE_XLA_FASTPATH = False
    assert bool(jnp.allclose(c_lo, r_lo, rtol=2e-3, atol=2e-3))
    assert bool(jnp.allclose(c_hi, r_hi, rtol=2e-3, atol=2e-3))
    assert bool(jnp.allclose(A_lo, rA_lo, rtol=2e-3, atol=2e-3))
    assert bool(jnp.allclose(A_hi, rA_hi, rtol=2e-3, atol=2e-3))

    print("KERNEL_OK")
</pallas_src>

<mosaic_0001>
module attributes {stable_mosaic.version = 11 : i64} {
  func.func @_mm_split_kernel(%arg0: i32, %arg1: i32, %arg2: i32, %arg3: memref<128x512xf32, #tpu.memory_space<vmem>>, %arg4: memref<128x512xf32, #tpu.memory_space<vmem>>, %arg5: memref<2x512x128xf32, #tpu.memory_space<vmem>>, %arg6: memref<2x128x128xf32, #tpu.memory_space<vmem>>, %arg7: memref<2x128x128xf32, #tpu.memory_space<vmem>>) attributes {dimension_semantics = [#tpu.dimension_semantics<parallel>, #tpu.dimension_semantics<parallel>, #tpu.dimension_semantics<arbitrary>], iteration_bounds = array<i64: 3, 3, 1>, scalar_prefetch = 0 : i64, scratch_operands = 1 : i64, tpu.core_type = #tpu.core_type<tc>, window_params = [{transform_indices = @transform_0, window_bounds = array<i64: 128, 512>}, {transform_indices = @transform_1, window_bounds = array<i64: 128, 512>}, {transform_indices = @transform_2, window_bounds = array<i64: 2, 512, 128>}, {transform_indices = @transform_3, window_bounds = array<i64: 2, 128, 128>}]} {
    %c0_i32 = arith.constant 0 : i32
    %0 = arith.cmpi eq, %arg2, %c0_i32 : i32
    %1 = arith.extui %0 : i1 to i32
    %c0_i32_0 = arith.constant 0 : i32
    %2 = arith.cmpi ne, %1, %c0_i32_0 : i32
    scf.if %2 {
      %cst_24 = arith.constant 0.000000e+00 : f32
      %38 = vector.broadcast %cst_24 : f32 to vector<2x128x128xf32>
      %c0_25 = arith.constant 0 : index
      %c0_26 = arith.constant 0 : index
      %c0_27 = arith.constant 0 : index
      %39 = vector.load %arg7[%c0_25, %c0_26, %c0_27] : memref<2x128x128xf32, #tpu.memory_space<vmem>>, vector<2x128x128xf32>
      tpu.vector_store %arg7[%c0_25, %c0_26, %c0_27], %38 {strides = array<i32>} : memref<2x128x128xf32, #tpu.memory_space<vmem>>, vector<2x128x128xf32>,
    } else {
    }
    %c0 = arith.constant 0 : index
    %c0_1 = arith.constant 0 : index
    %c0_2 = arith.constant 0 : index
    %3 = vector.load %arg5[%c0, %c0_1, %c0_2] : memref<2x512x128xf32, #tpu.memory_space<vmem>>, vector<2x512x128xf32>
    %cst = arith.constant 0.000000e+00 : f32
    %4 = vector.broadcast %cst : f32 to vector<2x512x128xf32>
    %5 = arith.maximumf %3, %4 : vector<2x512x128xf32>
    %6 = arith.subf %3, %5 : vector<2x512x128xf32>
    %c0_3 = arith.constant 0 : index
    %c0_4 = arith.constant 0 : index
    %7 = vector.load %arg3[%c0_3, %c0_4] : memref<128x512xf32, #tpu.memory_space<vmem>>, vector<128x512xf32>
    %c0_5 = arith.constant 0 : index
    %c0_6 = arith.constant 0 : index
    %8 = vector.load %arg4[%c0_5, %c0_6] : memref<128x512xf32, #tpu.memory_space<vmem>>, vector<128x512xf32>
    %c0_7 = arith.constant 0 : index
    %c0_8 = arith.constant 0 : index
    %c0_9 = arith.constant 0 : index
    %9 = vector.load %arg7[%c0_7, %c0_8, %c0_9] : memref<2x128x128xf32, #tpu.memory_space<vmem>>, vector<1x128x128xf32>
    %10 = vector.shape_cast %9 : vector<1x128x128xf32> to vector<128x128xf32>
    %11 = vector.extract_strided_slice %5 {offsets = [0, 0, 0], sizes = [1, 512, 128], strides = [1, 1, 1]} : vector<2x512x128xf32> to vector<1x512x128xf32>
    %12 = vector.shape_cast %11 : vector<1x512x128xf32> to vector<512x128xf32>
    %cst_10 = arith.constant dense<0.000000e+00> : vector<128x128xf32>
    %13 = tpu.matmul %7, %12, %cst_10 {dimension_numbers = #tpu.dot_dimension_numbers<[1], [0], [0], [1], [0, 0, 1, 1], [], []>} : vector<128x512xf32>, vector<512x128xf32>, vector<128x128xf32> -> vector<128x128xf32>
    %14 = vector.extract_strided_slice %6 {offsets = [0, 0, 0], sizes = [1, 512, 128], strides = [1, 1, 1]} : vector<2x512x128xf32> to vector<1x512x128xf32>
    %15 = vector.shape_cast %14 : vector<1x512x128xf32> to vector<512x128xf32>
    %cst_11 = arith.constant dense<0.000000e+00> : vector<128x128xf32>
    %16 = tpu.matmul %8, %15, %cst_11 {dimension_numbers = #tpu.dot_dimension_numbers<[1], [0], [0], [1], [0, 0, 1, 1], [], []>} : vector<128x512xf32>, vector<512x128xf32>, vector<128x128xf32> -> vector<128x128xf32>
    %17 = arith.addf %13, %16 : vector<128x128xf32>
    %18 = arith.addf %10, %17 : vector<128x128xf32>
    %c0_12 = arith.constant 0 : index
    %c0_13 = arith.constant 0 : index
    %c0_14 = arith.constant 0 : index
    %19 = vector.load %arg7[%c0_12, %c0_13, %c0_14] : memref<2x128x128xf32, #tpu.memory_space<vmem>>, vector<1x128x128xf32>
    %20 = vector.shape_cast %19 : vector<1x128x128xf32> to vector<128x128xf32>
    %21 = vector.shape_cast %18 : vector<128x128xf32> to vector<1x128x128xf32>
    tpu.vector_store %arg7[%c0_12, %c0_13, %c0_14], %21 {strides = array<i32>} : memref<2x128x128xf32, #tpu.memory_space<vmem>>, vector<1x128x128xf32>,
    %c1 = arith.constant 1 : index
    %c0_15 = arith.constant 0 : index
    %c0_16 = arith.constant 0 : index
    %22 = vector.load %arg7[%c1, %c0_15, %c0_16] : memref<2x128x128xf32, #tpu.memory_space<vmem>>, vector<1x128x128xf32>
    %23 = vector.shape_cast %22 : vector<1x128x128xf32> to vector<128x128xf32>
    %24 = vector.extract_strided_slice %6 {offsets = [1, 0, 0], sizes = [1, 512, 128], strides = [1, 1, 1]} : vector<2x512x128xf32> to vector<1x512x128xf32>
    %25 = vector.shape_cast %24 : vector<1x512x128xf32> to vector<512x128xf32>
    %cst_17 = arith.constant dense<0.000000e+00> : vector<128x128xf32>
    %26 = tpu.matmul %7, %25, %cst_17 {dimension_numbers = #tpu.dot_dimension_numbers<[1], [0], [0], [1], [0, 0, 1, 1], [], []>} : vector<128x512xf32>, vector<512x128xf32>, vector<128x128xf32> -> vector<128x128xf32>
    %27 = vector.extract_strided_slice %5 {offsets = [1, 0, 0], sizes = [1, 512, 128], strides = [1, 1, 1]} : vector<2x512x128xf32> to vector<1x512x128xf32>
    %28 = vector.shape_cast %27 : vector<1x512x128xf32> to vector<512x128xf32>
    %cst_18 = arith.constant dense<0.000000e+00> : vector<128x128xf32>
    %29 = tpu.matmul %8, %28, %cst_18 {dimension_numbers = #tpu.dot_dimension_numbers<[1], [0], [0], [1], [0, 0, 1, 1], [], []>} : vector<128x512xf32>, vector<512x128xf32>, vector<128x128xf32> -> vector<128x128xf32>
    %30 = arith.addf %26, %29 : vector<128x128xf32>
    %31 = arith.addf %23, %30 : vector<128x128xf32>
    %c1_19 = arith.constant 1 : index
    %c0_20 = arith.constant 0 : index
    %c0_21 = arith.constant 0 : index
    %32 = vector.load %arg7[%c1_19, %c0_20, %c0_21] : memref<2x128x128xf32, #tpu.memory_space<vmem>>, vector<1x128x128xf32>
    %33 = vector.shape_cast %32 : vector<1x128x128xf32> to vector<128x128xf32>
    %34 = vector.shape_cast %31 : vector<128x128xf32> to vector<1x128x128xf32>
    tpu.vector_store %arg7[%c1_19, %c0_20, %c0_21], %34 {strides = array<i32>} : memref<2x128x128xf32, #tpu.memory_space<vmem>>, vector<1x128x128xf32>,
    %c0_i32_22 = arith.constant 0 : i32
    %35 = arith.cmpi eq, %arg2, %c0_i32_22 : i32
    %36 = arith.extui %35 : i1 to i32
    %c0_i32_23 = arith.constant 0 : i32
    %37 = arith.cmpi ne, %36, %c0_i32_23 : i32
    scf.if %37 {
      %c0_24 = arith.constant 0 : index
      %c0_25 = arith.constant 0 : index
      %c0_26 = arith.constant 0 : index
      %38 = vector.load %arg7[%c0_24, %c0_25, %c0_26] : memref<2x128x128xf32, #tpu.memory_space<vmem>>, vector<2x128x128xf32>
      %c0_27 = arith.constant 0 : index
      %c0_28 = arith.constant 0 : index
      %c0_29 = arith.constant 0 : index
      %39 = vector.load %arg6[%c0_27, %c0_28, %c0_29] : memref<2x128x128xf32, #tpu.memory_space<vmem>>, vector<2x128x128xf32>
      tpu.vector_store %arg6[%c0_27, %c0_28, %c0_29], %38 {strides = array<i32>} : memref<2x128x128xf32, #tpu.memory_space<vmem>>, vector<2x128x128xf32>,
    } else {
    }
    return
  }
  func.func @transform_0(%arg0: i32, %arg1: i32, %arg2: i32) -> (i32, i32) {
    %c0_i32 = arith.constant 0 : i32
    return %arg0, %arg2 : i32, i32
  }
  func.func @transform_1(%arg0: i32, %arg1: i32, %arg2: i32) -> (i32, i32) {
    %c0_i32 = arith.constant 0 : i32
    return %arg0, %arg2 : i32, i32
  }
  func.func @transform_2(%arg0: i32, %arg1: i32, %arg2: i32) -> (i32, i32, i32) {
    %c0_i32 = arith.constant 0 : i32
    %c0_i32_0 = arith.constant 0 : i32
    return %c0_i32, %arg2, %arg1 : i32, i32, i32
  }
  func.func @transform_3(%arg0: i32, %arg1: i32, %arg2: i32) -> (i32, i32, i32) {
    %c0_i32 = arith.constant 0 : i32
    %c0_i32_0 = arith.constant 0 : i32
    return %c0_i32, %arg0, %arg1 : i32, i32, i32
  }
}

</mosaic_0001>

<bundles_post_ra>
// kernel: tpu_custom_call.1
= control target key start
LH: loop header
LB: loop body
LE: loop exit
PB: predicated region body
PF: predicated region fallthrough
CT: control target
= control target key end

     0   :  { %s6247_s0 = inlined_call_operand.hbm [shape: f32[384,512], index: 0, kind: input, shape index: {}]   ;;  %s6248_s1 = inlined_call_operand.hbm [shape: f32[384,512], index: 1, kind: input, shape index: {}]   ;;  %s6249_s2 = inlined_call_operand.hbm [shape: f32[2,512,384], index: 2, kind: input, shape index: {}]   ;;  %s6250_s3 = inlined_call_operand.hbm [shape: f32[2,384,384], index: 3, kind: output, shape index: {}]  }
   0x1   :  { %6487 = sst [smem:[#allocation137_spill]] %s6248_s1 }
   0x2   :  { %6488 = sst [smem:[#allocation138_spill]] %s6250_s3 }
   0x3   :  { %8 = vsyncpa [#allocation4], 0 }
   0x4   :  { %10 = vsyncpa [#allocation4 + $0x1], 0 }
   0x5   :  { %11 = vsyncpa [#allocation7], 0 }
   0x6   :  { %13 = vsyncpa [#allocation7 + $0x1], 0 }
   0x7   :  { %14 = vsyncpa [#allocation5], 0 }
   0x8   :  { %16 = vsyncpa [#allocation5 + $0x1], 0  ;;  %s3725_s12 = smov 0   ;;  %s3727_s13 = smov 0  }
   0x9   :  { %s3729_s14 = smov 0   ;;  %s3731_s15 = smov 0  }
   0xa   :  { %s3733_s16 = smov 0   ;;  %s3735_s17 = smov 0  }
   0xb   :  { %s3737_s18 = smov 0   ;;  %s3739_s19 = smov 0  }
   0xc   :  { %s3741_s20 = smov 0   ;;  %s3743_s21 = smov 0  }
   0xd   :  { %s3745_s22 = smov 0   ;;  %s3747_s23 = smov 0  }
   0xe   :  { %s3749_s24 = smov 0   ;;  %s3751_s25 = smov 0  }
   0xf LB: > { %6489 = sst [smem:[#allocation16_spill]] %s3635_s12  ;;  %s3794_s26 = sadd.s32 4294967295, %s3687_s25   ;;  %s3687_s25 = sphi %s3751_s25, %s22_s25   ;;  %s3683_s24 = sphi %s3749_s24, %s7045_s24   ;;  %s3679_s23 = sphi %s3747_s23, %s7044_s23   ;;  %s3675_s22 = sphi %s3745_s22, %s7031_s22   ;;  %s3671_s21 = sphi %s3743_s21, %s7043_s21   ;;  %s3667_s20 = sphi %s3741_s20, %s7042_s20   ;;  %s3663_s19 = sphi %s3739_s19, %s7041_s19   ;;  %s3659_s18 = sphi %s3737_s18, %s7040_s18   ;;  %s3655_s17 = sphi %s3735_s17, %s7039_s17   ;;  %s3651_s16 = sphi %s3733_s16, %s7038_s16   ;;  %s3647_s15 = sphi %s3731_s15, %s7037_s15   ;;  %s3643_s14 = sphi %s3729_s14, %s7029_s14   ;;  %s3639_s13 = sphi %s3727_s13, %s7036_s13   ;;  %s3635_s12 = sphi %s3725_s12, %s7035_s12  }
  0x10   : > { %6490 = sst [smem:[#allocation17_spill]] %s3643_s14  ;;  %s2365_s27 = sadd.s32 4294967294, %s3687_s25  }
  0x11   : > { %6491 = sst [smem:[#allocation18_spill]] %s3683_s24  ;;  %s37_s28 = sadd.s32 1, %s3679_s23 }
  0x12   : > { %s41_s29 = sadd.s32 1, %s3683_s24  ;;  %p39_p0 = scmp.ge.s32.totalorder %s37_s28, 3 }
  0x13   : > { %s50_s30 = sadd.s32 1, %s3667_s20  ;;  %p57_p1 = scmp.ne.s32.totalorder %s3667_s20, %s3663_s19 }
  0x14   : > { %p6260_p2 = scmp.eq.s32.totalorder %s3687_s25, 0  ;;  %s7047_s28 = smov (%p39_p0, %s37_s28), 0 }
  0x15   : > { %6492 = sst [smem:[#allocation19_spill]] %s7047_s28  ;;  %s7049_s29 = smov (!%p39_p0, %s41_s29), %s3683_s24 }
  0x16   : > { %p3808_p3 = por %p6260_p2, %p57_p1  ;;  %p63_p4 = scmp.ne.s32.totalorder %s3663_s19, %s3659_s18 }
  0x17   : > { %p43_p5 = scmp.ge.s32.totalorder %s7049_s29, 3  ;;  %p6259_p6 = scmp.eq.s32.totalorder %s3794_s26, 0 }
  0x18   : > { %s3816_s5 = ssub.s32 %s3679_s23, %s7047_s28  ;;  %s134_s6 = sadd.s32 1, %s3643_s14 }
  0x19   : > { %s7051_s29 = smov (%p43_p5, %s7049_s29), 0  ;;  %p3823_p7 = por %p6259_p6, %p63_p4 }
  0x1a   : > { %6494 = sst [smem:[#allocation20_spill]] %s7051_s29  ;;  %s45_s8 = ssub.s32 %s3683_s24, %s7051_s29 }
  0x1b   : > { %s6495_s7 = scalar_select %p3823_p7, 1, 0 }
  0x1c   : > { %p144_p9 = scmp.ne.s32.totalorder %s3643_s14, %s3639_s13  ;;  %p48_p10 = scmp.eq.s32.totalorder %s45_s8, 0 }
  0x1d   : > { %s131_s9 = sor.u32 %s3816_s5, %s45_s8  ;;  %p145_p12 = scmp.eq.s32.totalorder %s3794_s26, 8 }
  0x1e   : > { %p132_p11 = scmp.eq.s32.totalorder %s131_s9, 0  ;;  %p150_p0 = scmp.ne.s32.totalorder %s3639_s13, %s3635_s12 }
  0x1f   : > { %s3835_s10 = scalar_select %p48_p10, %s3667_s20, %s50_s30  }
  0x20   : > { %s3838_s11 = scalar_select %p132_p11, %s3643_s14, %s134_s6  }
  0x21   : > { %6496 = sst [smem:[#allocation21_spill]] %s3835_s10  ;;  %p3840_p13 = por %p145_p12, %p144_p9 }
  0x22   : > { %6497 = sst [smem:[#allocation22_spill]] %s3838_s11  ;;  %p151_p1 = scmp.eq.s32.totalorder %s2365_s27, 8 }
  0x23   : > { %s6498_s18 = scalar_select %p3840_p13, 1, 0 }
  0x24   : > { %p6258_p4 = scmp.lt.s32.totalorder %s3687_s25, 9  ;;  %s6253_s29 = sand.u32 1, %s3667_s20  }
  0x25   : > { %p3848_p5 = por %p151_p1, %p150_p0  ;;  %s3854_s8 = sshll.u32 %s6253_s29, 9 }
  0x26   : > { %s6256_s30 = sshll.u32 %s3683_s24, 13  ;;  %p3861_p10 = pnand %p6258_p4, %p3808_p3 }
  0x27   : > { %s6499_s28 = scalar_select %p3848_p5, 1, 0 }
  0x28   : > { %s195_s27 = sand.u32 1, %s3687_s25   ;;  %s6502_s1 = sld [smem:[#allocation137_spill]] }
  0x29   : > { %6500 = sst [smem:[#allocation23_spill]] %s6499_s28  ;;  %s199_s29 = scalar_lea.vmem [#allocation6], %s3854_s8 }
  0x2a   : > { %s209_s4 = sshll.u32 %s199_s29, 4  ;;  %s3877_s14 = scalar_lea.sflag [#allocation7], %s195_s27  ;;  %s3874_s4 = int_to_ptr.vmem [resolvable:$true] %s209_s4 }
  0x2b   : > { %p3473_p11 = pneg %p3861_p10 }
  0x2e   : > { %s3871_s11 = scalar_lea.hbm %s6502_s1, %s6256_s30  ;;  %s3476_s30 = scalar_lea.hbm %s6502_s1, 24576 }
  0x2f   : > { %s3471_s28 = scalar_lea.hbm %s3871_s11, 8192  ;;  %p3477_p1 = scmp.lt.u32.totalorder %s3871_s11, %s6502_s1 }
  0x30   : > { %p3472_p9 = scmp.ne.s32.totalorder %s3871_s11, %s3471_s28  ;;  %p3478_p4 = scmp.lt.u32.totalorder %s3476_s30, %s3471_s28 }
  0x31   : > { %p3480_p2 = scmp.lt.u32.totalorder %s3471_s28, %s3871_s11 }
  0x32   : > { %p3474_p12 = pnand %p3473_p11, %p3472_p9  ;;  %p3479_p6 = por %p3478_p4, %p3477_p1 }
  0x34   : > { %p3475_p0 = pneg %p3474_p12  ;;  %p3481_p8 = por %p3480_p2, %p3479_p6 }
  0x36   : > { %p3482_p3 = pnand %p3481_p8, %p3475_p0 }
  0x38   : > { %3485 = shalt.err (!%p3482_p3)
}
  0x39   : > { %s3486_s29 = scalar_lea.vmem %s3874_s4, 8192  ;;  %s3689_s27 = smov [#allocation6]  }
  0x3a   : > { %p3487_p9 = scmp.ne.s32.totalorder %s3874_s4, %s3486_s29  ;;  %s3491_s10 = sshll.u32 %s3689_s27, 4  ;;  %s3492_s10 = int_to_ptr.vmem [resolvable:$false] %s3491_s10 }
  0x3b   : > { %s3493_s3 = scalar_lea.vmem %s3492_s10, 16384  ;;  %p3494_p13 = scmp.lt.s32.totalorder %s3874_s4, %s3492_s10 }
  0x3c   : > { %p3489_p12 = pnand %p3487_p9, %p3473_p11  ;;  %p3495_p4 = scmp.lt.s32.totalorder %s3493_s3, %s3486_s29 }
  0x3e   : > { %p3490_p5 = pneg %p3489_p12  ;;  %p3496_p1 = por %p3495_p4, %p3494_p13 }
  0x40   : > { %p3497_p2 = pnand %p3496_p1, %p3490_p5 }
  0x42   : > { %3500 = shalt.err (!%p3497_p2)
}
  0x43   : > { %s6262_s12 = smov 512   ;;  %s6263_s28 = smov 32  }
  0x44   : > { %3310 = dma.hbm_to_vmem [thread:$0]  (!%p3861_p10), %s3871_s11, 8192, %s3874_s4, %s3877_s14, %s6262_s12, %s6262_s12, %s6263_s28  }
  0x45   : > { %p240_p6 = scmp.lt.s32.totalorder %s3687_s25, 10  ;;  %p6503_p8 = scmp.ge.s32.totalorder %s3687_s25, 1 }
  0x46   : > { %s6505_s9 = sshll.u32 %s3683_s24, 13  ;;  %s175_s3 = scalar_lea.vmem [#allocation3], %s3854_s8 }
  0x47   : > { %p3911_p13 = pnand %p6503_p8, %p240_p6  ;;  %s3920_s10 = scalar_lea.hbm %s6247_s0, %s6505_s9 }
  0x48   : > { %s185_s1 = sshll.u32 %s175_s3, 4  ;;  %s6506_s11 = sand.u32 1, %s3667_s20   ;;  %s3923_s1 = int_to_ptr.vmem [resolvable:$true] %s185_s1 }
  0x49   : > { %s3927_s4 = scalar_lea.sflag [#allocation4], %s6506_s11  ;;  %s3501_s12 = scalar_lea.hbm %s3920_s10, 8192 }
  0x4a   : > { %p3502_p5 = scmp.ne.s32.totalorder %s3920_s10, %s3501_s12  ;;  %s3506_s27 = scalar_lea.hbm %s6247_s0, 24576 }
  0x4b   : > { %p3507_p9 = scmp.lt.u32.totalorder %s3920_s10, %s6247_s0  ;;  %p3508_p12 = scmp.lt.u32.totalorder %s3506_s27, %s3501_s12 }
  0x4c   : > { %p3504_p3 = pnand %p3502_p5, %p3473_p11  ;;  %p3510_p1 = scmp.lt.u32.totalorder %s3501_s12, %s3920_s10 }
  0x4d   : > { %p3509_p4 = por %p3508_p12, %p3507_p9 }
  0x4e   : > { %p3505_p0 = pneg %p3504_p3 }
  0x4f   : > { %p3511_p2 = por %p3510_p1, %p3509_p4 }
  0x51   : > { %p3512_p6 = pnand %p3511_p2, %p3505_p0 }
  0x53   : > { %3515 = shalt.err (!%p3512_p6)
}
  0x54   : > { %s3516_s8 = scalar_lea.vmem %s3923_s1, 8192  ;;  %s3692_s3 = smov [#allocation3]  }
  0x55   : > { %p3517_p8 = scmp.ne.s32.totalorder %s3923_s1, %s3516_s8  ;;  %s3521_s11 = sshll.u32 %s3692_s3, 4  ;;  %s3522_s11 = int_to_ptr.vmem [resolvable:$false] %s3521_s11 }
  0x56   : > { %s3523_s24 = scalar_lea.vmem %s3522_s11, 16384  ;;  %p3524_p7 = scmp.lt.s32.totalorder %s3923_s1, %s3522_s11 }
  0x57   : > { %p3519_p5 = pnand %p3517_p8, %p3473_p11  ;;  %p3525_p9 = scmp.lt.s32.totalorder %s3523_s24, %s3516_s8 }
  0x59   : > { %p3520_p3 = pneg %p3519_p5  ;;  %p3526_p12 = por %p3525_p9, %p3524_p7 }
  0x5b   : > { %p3527_p4 = pnand %p3526_p12, %p3520_p3 }
  0x5d   : > { %3530 = shalt.err (!%p3527_p4)
}
  0x5e   : > { %s6507_s12 = smov 32   ;;  %s6508_s28 = smov 512  }
  0x5f   : > { %3307 = dma.hbm_to_vmem [thread:$0]  (!%p3861_p10), %s3920_s10, 8192, %s3923_s1, %s3927_s4, %s6508_s28, %s6508_s28, %s6507_s12  }
  0x60   : > { %s106_s6 = sadd.s32 1, %s3655_s17  ;;  %p6509_p7 = scmp.eq.s32.totalorder %s3816_s5, 0 }
  0x61   : > { %p113_p11 = scmp.ne.s32.totalorder %s3655_s17, %s3651_s16  ;;  %p119_p0 = scmp.ne.s32.totalorder %s3651_s16, %s3647_s15 }
  0x62   : > { %s3960_s29 = scalar_select %p6509_p7, %s3655_s17, %s106_s6  }
  0x63   : > { %s221_s9 = sand.u32 1, %s3655_s17   ;;  %s2377_s27 = sshll.u32 %s3679_s23, 7 }
  0x64   : > { %p6510_p1 = scmp.eq.s32.totalorder %s3687_s25, 0  ;;  %p6511_p6 = scmp.eq.s32.totalorder %s3794_s26, 0 }
  0x65   : > { %s2376_s3 = sshll.u32 %s221_s9, 10  ;;  %s3979_s1 = scalar_lea.hbm %s6249_s2, %s2377_s27 }
  0x66   : > { %p115_p2 = por %p113_p11, %p6510_p1  ;;  %p3972_p8 = por %p119_p0, %p6511_p6 }
  0x67   : > { %p6513_p10 = scmp.lt.s32.totalorder %s3687_s25, 9  ;;  %s223_s5 = scalar_lea.vmem [#allocation8], %s2376_s3 }
  0x68   : > { %s6512_s8 = scalar_select %p3972_p8, 1, 0 }
  0x69   : > { %p3983_p5 = pnand %p6513_p10, %p115_p2  ;;  %s232_s10 = sshll.u32 %s223_s5, 4  ;;  %s3987_s10 = int_to_ptr.vmem [resolvable:$true] %s232_s10 }
  0x6a   : > { %s3531_s4 = scalar_lea.hbm %s3979_s1, 16384  ;;  %s3536_s6 = scalar_lea.hbm %s6249_s2, 49152 }
  0x6b   : > { %p3532_p3 = scmp.ne.s32.totalorder %s3979_s1, %s3531_s4  ;;  %p3533_p9 = pneg %p3983_p5 }
  0x6c   : > { %p3537_p7 = scmp.lt.u32.totalorder %s3979_s1, %s6249_s2  ;;  %p3538_p11 = scmp.lt.u32.totalorder %s3536_s6, %s3531_s4 }
  0x6d   : > { %p3534_p12 = pnand %p3533_p9, %p3532_p3  ;;  %p3540_p1 = scmp.lt.u32.totalorder %s3531_s4, %s3979_s1 }
  0x6e   : > { %p3539_p0 = por %p3538_p11, %p3537_p7 }
  0x6f   : > { %p3535_p4 = pneg %p3534_p12 }
  0x70   : > { %p3541_p2 = por %p3540_p1, %p3539_p0 }
  0x72   : > { %p3542_p6 = pnand %p3541_p2, %p3535_p4 }
  0x74   : > { %3545 = shalt.err (!%p3542_p6)
}
  0x75   : > { %s3546_s3 = scalar_lea.vmem %s3987_s10, 16384  ;;  %s3693_s11 = smov [#allocation8]  }
  0x76   : > { %p3547_p10 = scmp.ne.s32.totalorder %s3987_s10, %s3546_s3  ;;  %s3551_s24 = sshll.u32 %s3693_s11, 4  ;;  %s3552_s24 = int_to_ptr.vmem [resolvable:$false] %s3551_s24 }
  0x77   : > { %s3553_s5 = scalar_lea.vmem %s3552_s24, 32768  ;;  %p3554_p8 = scmp.lt.s32.totalorder %s3987_s10, %s3552_s24 }
  0x78   : > { %p3549_p3 = pnand %p3547_p10, %p3533_p9  ;;  %p3555_p7 = scmp.lt.s32.totalorder %s3553_s5, %s3546_s3 }
  0x7a   : > { %p3550_p12 = pneg %p3549_p3  ;;  %p3556_p11 = por %p3555_p7, %p3554_p8 }
  0x7c   : > { %p3557_p0 = pnand %p3556_p11, %p3550_p12 }
  0x7e   : > { %3560 = shalt.err (!%p3557_p0)
}
  0x7f   : > { %s3694_s4 = smov 384   ;;  %s3695_s12 = smov 128  }
  0x80   : > { %s3696_s28 = smov 8   ;;  %244 = sbr.rel (%p3911_p13) target bundleno = 689 (0x2b1), region = 32 }
  0x81   : > { %3313 = dma.hbm_to_vmem [thread:$0]  (!%p3983_p5), %s3979_s1, 16384, %s3987_s10, %s3877_s14, %s3694_s4, %s3695_s12, %s3696_s28  }
  0x87   : > { %s246_s6 = sand.u32 1, %s3663_s19   ;;  %p6515_p8 = scmp.ne.s32.totalorder %s6495_s7, 0 }
  0x88   : > { %s2379_s9 = sshll.u32 %s246_s6, 9  ;;  %s247_s27 = scalar_lea.sflag [#allocation4], %s246_s6 }
  0x89   : > { %s4018_s3 = scalar_lea.vmem [#allocation3], %s2379_s9 }
  0x8a   : > { %3618 = dma.done.wait (%p6515_p8), %s247_s27, 8192  }
  0x8b   : > { %3620 = vsyncadd (%p6515_p8), %s247_s27, 4294959104  ;;  %s255_s11 = sand.u32 1, %s3794_s26   ;;  %s4025_s14 = scalar_lea.vmem [#allocation6], %s2379_s9 }
  0x8c   : > { %s256_s15 = scalar_lea.sflag [#allocation7], %s255_s11 }
  0x8d   : > { %3622 = dma.done.wait (%p6515_p8), %s256_s15, 8192  }
  0x8e   : > { %3624 = vsyncadd (%p6515_p8), %s256_s15, 4294959104  ;;  %s266_s30 = sand.u32 1, %s3651_s16   ;;  %p6516_p13 = scmp.ne.s32.totalorder %s6512_s8, 0 }
  0x8f   : > { %s2381_s1 = sshll.u32 %s266_s30, 10 }
  0x90   : > { %s4032_s10 = scalar_lea.vmem [#allocation8], %s2381_s1 }
  0x91   : > { %3626 = dma.done.wait (%p6516_p13), %s256_s15, 16384  }
  0x92   : > { %3628 = vsyncadd (%p6516_p13), %s256_s15, 4294950912  ;;  %v4039_v0 = vld [vmem:[%s4032_s10 + $0x80] sm:$0xff]  ;;  %v4042_v1 = vld [vmem:[%s4032_s10 + $0x88] sm:$0xff]  ;;  %s298_s26 = sand.u32 1, %s3639_s13  }
  0x93   : > { %v4045_v2 = vld [vmem:[%s4032_s10 + $0x180] sm:$0xff]  ;;  %v6306_v3 = vmax.f32 %v4039_v0, 0.0  ;;  %v6305_v4 = vmax.f32 %v4042_v1, 0.0  ;;  %v4050_v5 = vld [vmem:[%s4032_s10 + $0x188] sm:$0xff]  ;;  %v4069_v14 = vld [vmem:[%s4032_s10 + $0x90] sm:$0xff]  ;;  %s2382_s7 = sshll.u32 %s298_s26, 8 }
  0x94   : > { %v6304_v6 = vmax.f32 %v4045_v2, 0.0  ;;  %v4054_v7 = vld [vmem:[%s4032_s10] sm:$0xff]  ;;  %v4057_v8 = vld [vmem:[%s4032_s10 + $0x8] sm:$0xff]  ;;  %v6303_v9 = vmax.f32 %v4050_v5, 0.0  ;;  %v4082_v19 = vld [vmem:[%s4032_s10 + $0x98] sm:$0xff]  ;;  %v6290_v29 = vmax.f32 %v4069_v14, 0.0 }
  0x95   : > { %v6300_v10 = vmax.f32 %v4054_v7, 0.0  ;;  %v6295_v11 = vmax.f32 %v4057_v8, 0.0  ;;  %v4063_v12 = vld [vmem:[%s4032_s10 + $0x100] sm:$0xff]  ;;  %v4066_v13 = vld [vmem:[%s4032_s10 + $0x108] sm:$0xff]  ;;  %v615_v15 = vsub.f32 %v4039_v0, %v6306_v3  ;;  %v616_v16 = vsub.f32 %v4042_v1, %v6305_v4  ;;  %v4085_v20 = vld [vmem:[%s4032_s10 + $0x190] sm:$0xff]  ;;  %s6076_s8 = scalar_lea.vmem [#allocation9], %s2382_s7 }
  0x96   : > { %v647_v17 = vsub.f32 %v4045_v2, %v6304_v6  ;;  %v6292_v18 = vmax.f32 %v4063_v12, 0.0  ;;  %v648_v21 = vsub.f32 %v4050_v5, %v6303_v9  ;;  %v6291_v24 = vmax.f32 %v4066_v13, 0.0  ;;  %v4098_v25 = vld [vmem:[%s4032_s10 + $0x198] sm:$0xff]  ;;  %v4101_v26 = vld [vmem:[%s4032_s10 + $0x10] sm:$0xff]  ;;  %v4130_v42 = vld [vmem:[%s4032_s10 + $0xa0] sm:$0xff]  ;;  %s2180_s24 = scalar_lea.sflag [#allocation5], %s298_s26 }
  0x97   : > { %v599_v22 = vsub.f32 %v4054_v7, %v6300_v10  ;;  %v600_v23 = vsub.f32 %v4057_v8, %v6295_v11  ;;  %v3033_v27 = vpack.c.bf16 %v616_v16, %v615_v15  ;;  %v6289_v30 = vmax.f32 %v4082_v19, 0.0  ;;  %v4109_v31 = vld [vmem:[%s4032_s10 + $0x18] sm:$0xff]  ;;  %v4112_v32 = vld [vmem:[%s4032_s10 + $0x110] sm:$0xff]  ;;  %v4133_v43 = vld [vmem:[%s4032_s10 + $0xa8] sm:$0xff] }
  0x98   : > { %v631_v28 = vsub.f32 %v4063_v12, %v6292_v18  ;;  %v3065_v33 = vpack.c.bf16 %v648_v21, %v647_v17  ;;  %v632_v35 = vsub.f32 %v4066_v13, %v6291_v24  ;;  %v6286_v36 = vmax.f32 %v4085_v20, 0.0  ;;  %v4119_v37 = vld [vmem:[%s4032_s10 + $0x118] sm:$0xff]  ;;  %v4141_v48 = vld [vmem:[%s4032_s10 + $0x1a0] sm:$0xff]  ;;  %v4144_v49 = vld [vmem:[%s4032_s10 + $0x1a8] sm:$0xff] }
  0x99   : > { %v3035_v34 = vpack.c.bf16 %v600_v23, %v599_v22  ;;  %3034 = vmatprep.subr.bf16.mxu0 %v3033_v27  ;;  %v617_v38 = vsub.f32 %v4069_v14, %v6290_v29  ;;  %v618_v39 = vsub.f32 %v4082_v19, %v6289_v30  ;;  %v6285_v40 = vmax.f32 %v4098_v25, 0.0  ;;  %v4154_v54 = vld [vmem:[%s4032_s10 + $0x20] sm:$0xff]  ;;  %v4165_v59 = vld [vmem:[%s4032_s10 + $0x28] sm:$0xff]  ;;  %v4186_v27 = vld [vmem:[%s4032_s10 + $0xb0] sm:$0xff] }
  0x9a   : > { %v6284_v41 = vmax.f32 %v4101_v26, 0.0  ;;  %3066 = vmatprep.subr.bf16.mxu1 %v3065_v33  ;;  %v3067_v44 = vpack.c.bf16 %v632_v35, %v631_v28  ;;  %v649_v45 = vsub.f32 %v4085_v20, %v6286_v36  ;;  %v6282_v46 = vmax.f32 %v4109_v31, 0.0  ;;  %v4173_v15 = vld [vmem:[%s4032_s10 + $0x120] sm:$0xff]  ;;  %v4176_v16 = vld [vmem:[%s4032_s10 + $0x128] sm:$0xff]  ;;  %v4189_v28 = vld [vmem:[%s4032_s10 + $0xb8] sm:$0xff] }
  0x9b   : > { %3036 = vmatpush3.bf16.msra.mxu0 %v3035_v34  ;;  %v6280_v47 = vmax.f32 %v4112_v32, 0.0  ;;  %v3037_v50 = vpack.c.bf16 %v618_v39, %v617_v38  ;;  %v650_v51 = vsub.f32 %v4098_v25, %v6285_v40  ;;  %v6277_v53 = vmax.f32 %v4119_v37, 0.0  ;;  %v4199_v39 = vld [vmem:[%s4032_s10 + $0x1b0] sm:$0xff]  ;;  %v792_v40 = vld [vmem:[%s4025_s14 + $0x8] sm:$0xff]  ;;  %v794_v36 = vld [vmem:[%s4025_s14 + $0x18] sm:$0xff] }
  0x9c   : > { %v601_v52 = vsub.f32 %v4101_v26, %v6284_v41  ;;  %3068 = vmatpush3.bf16.msra.mxu1 %v3067_v44  ;;  %v602_v55 = vsub.f32 %v4109_v31, %v6282_v46  ;;  %v6274_v57 = vmax.f32 %v4130_v42, 0.0  ;;  %v6273_v58 = vmax.f32 %v4133_v43, 0.0  ;;  %v4202_v44 = vld [vmem:[%s4032_s10 + $0x1b8] sm:$0xff]  ;;  %v4277_v46 = vld [vmem:[%s4032_s10 + $0x140] sm:$0xff]  ;;  %v4288_v41 = vld [vmem:[%s4032_s10 + $0x148] sm:$0xff]  ;;  %935 = vmatprep.mubr.f32.mxu0 %v792_v40 }
  0x9d   : > { %v633_v56 = vsub.f32 %v4112_v32, %v6280_v47  ;;  %3038 = vmatprep.subr.bf16.mxu0 %v3037_v50  ;;  %v3069_v60 = vpack.c.bf16 %v650_v51, %v649_v45  ;;  %v634_v61 = vsub.f32 %v4119_v37, %v6277_v53  ;;  %v6272_v62 = vmax.f32 %v4141_v48, 0.0  ;;  %v4300_v29 = vld [vmem:[%s4032_s10 + $0xd0] sm:$0xff]  ;;  %v4303_v24 = vld [vmem:[%s4032_s10 + $0xd8] sm:$0xff]  ;;  %1080 = vmatprep.mubr.f32.mxu1 %v794_v36  ;;  %v4356_v6 = vld [vmem:[%s4032_s10 + $0xe0] sm:$0xff] }
  0x9e   : > { %v6271_v63 = vmax.f32 %v4144_v49, 0.0  ;;  %v3039_v17 = vpack.c.bf16 %v602_v55, %v601_v52  ;;  %v619_v21 = vsub.f32 %v4130_v42, %v6274_v57  ;;  %v620_v22 = vsub.f32 %v4133_v43, %v6273_v58  ;;  %v4210_v55 = vld [vmem:[%s4032_s10 + $0x30] sm:$0xff]  ;;  %v4245_v58 = vld [vmem:[%s4032_s10 + $0xc8] sm:$0xff]  ;;  %6517 = vst [vmem:[#allocation24_spill] sm:$0xff] %v4303_v24  ;;  %v4346_v10 = vld [vmem:[%s4032_s10 + $0x158] sm:$0xff] }
  0x9f   : > { %v6268_v23 = vmax.f32 %v4154_v54, 0.0  ;;  %3070 = vmatprep.subr.bf16.mxu1 %v3069_v60  ;;  %v3071_v33 = vpack.c.bf16 %v634_v61, %v633_v56  ;;  %v651_v34 = vsub.f32 %v4141_v48, %v6272_v62  ;;  %v6267_v38 = vmax.f32 %v4165_v59, 0.0  ;;  %v4242_v62 = vld [vmem:[%s4032_s10 + $0xc0] sm:$0xff]  ;;  %6523 = vst [vmem:[#allocation30_spill] sm:$0xff] %v4346_v10  ;;  %6524 = vst [vmem:[#allocation31_spill] sm:$0xff] %v4356_v6  ;;  %v4359_v4 = vld [vmem:[%s4032_s10 + $0xe8] sm:$0xff] }
  0xa0   : > { %v652_v35 = vsub.f32 %v4144_v49, %v6271_v63  ;;  %3040 = vmatpush3.bf16.msra.mxu0 %v3039_v17  ;;  %v3041_v45 = vpack.c.bf16 %v620_v22, %v619_v21  ;;  %v6269_v51 = vmax.f32 %v4173_v15, 0.0  ;;  %v6270_v52 = vmax.f32 %v4176_v16, 0.0  ;;  %v4218_v21 = vld [vmem:[%s4032_s10 + $0x38] sm:$0xff]  ;;  %6525 = vst [vmem:[#allocation32_spill] sm:$0xff] %v4359_v4 }
  0xa1   : > { %v603_v50 = vsub.f32 %v4154_v54, %v6268_v23  ;;  %3072 = vmatpush3.bf16.msra.mxu1 %v3071_v33  ;;  %v604_v60 = vsub.f32 %v4165_v59, %v6267_v38  ;;  %v6276_v61 = vmax.f32 %v4186_v27, 0.0  ;;  %v6275_v17 = vmax.f32 %v4189_v28, 0.0  ;;  %v4229_v38 = vld [vmem:[%s4032_s10 + $0x130] sm:$0xff]  ;;  %v4232_v23 = vld [vmem:[%s4032_s10 + $0x138] sm:$0xff] }
  0xa2   : > { %v3073_v56 = vpack.c.bf16 %v652_v35, %v651_v34  ;;  %3042 = vmatprep.subr.bf16.mxu0 %v3041_v45  ;;  %v635_v22 = vsub.f32 %v4173_v15, %v6269_v51  ;;  %v636_v33 = vsub.f32 %v4176_v16, %v6270_v52  ;;  %v6278_v34 = vmax.f32 %v4199_v39, 0.0 }
  0xa3   : > { %v6279_v35 = vmax.f32 %v4202_v44, 0.0  ;;  %v3043_v45 = vpack.c.bf16 %v604_v60, %v603_v50  ;;  %v621_v51 = vsub.f32 %v4186_v27, %v6276_v61  ;;  %v622_v52 = vsub.f32 %v4189_v28, %v6275_v17  ;;  %v4255_v17 = vld [vmem:[%s4032_s10 + $0x1c0] sm:$0xff]  ;;  %v4258_v61 = vld [vmem:[%s4032_s10 + $0x1c8] sm:$0xff] }
  0xa4   : > { %3074 = vmatprep.subr.bf16.mxu1 %v3073_v56  ;;  %v6281_v63 = vmax.f32 %v4210_v55, 0.0  ;;  %v3075_v57 = vpack.c.bf16 %v636_v33, %v635_v22  ;;  %v653_v50 = vsub.f32 %v4199_v39, %v6278_v34  ;;  %v6283_v60 = vmax.f32 %v4218_v21, 0.0 }
  0xa5   : > { %v654_v56 = vsub.f32 %v4202_v44, %v6279_v35  ;;  %3044 = vmatpush3.bf16.msra.mxu0 %v3043_v45  ;;  %v3045_v53 = vpack.c.bf16 %v622_v52, %v621_v51  ;;  %v6287_v33 = vmax.f32 %v4229_v38, 0.0  ;;  %v6288_v34 = vmax.f32 %v4232_v23, 0.0  ;;  %v4266_v35 = vld [vmem:[%s4032_s10 + $0x40] sm:$0xff] }
  0xa6   : > { %v605_v22 = vsub.f32 %v4210_v55, %v6281_v63  ;;  %3076 = vmatpush3.bf16.msra.mxu1 %v3075_v57  ;;  %v606_v45 = vsub.f32 %v4218_v21, %v6283_v60  ;;  %v6294_v51 = vmax.f32 %v4242_v62, 0.0  ;;  %v6293_v52 = vmax.f32 %v4245_v58, 0.0  ;;  %v4274_v63 = vld [vmem:[%s4032_s10 + $0x48] sm:$0xff] }
  0xa7   : > { %v3077_v47 = vpack.c.bf16 %v654_v56, %v653_v50  ;;  %3046 = vmatprep.subr.bf16.mxu0 %v3045_v53  ;;  %v637_v57 = vsub.f32 %v4229_v38, %v6287_v33  ;;  %v638_v50 = vsub.f32 %v4232_v23, %v6288_v34  ;;  %v6297_v56 = vmax.f32 %v4255_v17, 0.0 }
  0xa8   : > { %v6296_v60 = vmax.f32 %v4258_v61, 0.0  ;;  %v3047_v53 = vpack.c.bf16 %v606_v45, %v605_v22  ;;  %v623_v33 = vsub.f32 %v4242_v62, %v6294_v51  ;;  %v624_v34 = vsub.f32 %v4245_v58, %v6293_v52  ;;  %v4313_v52 = vld [vmem:[%s4032_s10 + $0x1d0] sm:$0xff]  ;;  %v4316_v51 = vld [vmem:[%s4032_s10 + $0x1d8] sm:$0xff] }
  0xa9   : > { %3078 = vmatprep.subr.bf16.mxu1 %v3077_v47  ;;  %v6298_v30 = vmax.f32 %v4266_v35, 0.0  ;;  %v3079_v18 = vpack.c.bf16 %v638_v50, %v637_v57  ;;  %v655_v47 = vsub.f32 %v4255_v17, %v6297_v56  ;;  %v6299_v45 = vmax.f32 %v4274_v63, 0.0  ;;  %6518 = vst [vmem:[#allocation25_spill] sm:$0xff] %v4313_v52  ;;  %6519 = vst [vmem:[#allocation26_spill] sm:$0xff] %v4316_v51 }
  0xaa   : > { %v656_v22 = vsub.f32 %v4258_v61, %v6296_v60  ;;  %3048 = vmatpush3.bf16.msra.mxu0 %v3047_v53  ;;  %v3049_v11 = vpack.c.bf16 %v624_v34, %v623_v33  ;;  %v6301_v57 = vmax.f32 %v4277_v46, 0.0  ;;  %v6302_v50 = vmax.f32 %v4288_v41, 0.0  ;;  %v4324_v60 = vld [vmem:[%s4032_s10 + $0x50] sm:$0xff]  ;;  %v4332_v53 = vld [vmem:[%s4032_s10 + $0x58] sm:$0xff] }
  0xab   : > { %v607_v40 = vsub.f32 %v4266_v35, %v6298_v30  ;;  %6520 = vst [vmem:[#allocation27_spill] sm:$0xff] %v4324_v60  ;;  %3080 = vmatpush3.bf16.msra.mxu1 %v3079_v18  ;;  %v608_v36 = vsub.f32 %v4274_v63, %v6299_v45  ;;  %v6307_v34 = vmax.f32 %v4300_v29, 0.0  ;;  %v6308_v33 = vmax.f32 %v4303_v24, 0.0  ;;  %6521 = vst [vmem:[#allocation28_spill] sm:$0xff] %v4332_v53  ;;  %v4343_v45 = vld [vmem:[%s4032_s10 + $0x150] sm:$0xff] }
  0xac   : > { %v3081_v56 = vpack.c.bf16 %v656_v22, %v655_v47  ;;  %3050 = vmatprep.subr.bf16.mxu0 %v3049_v11  ;;  %v639_v30 = vsub.f32 %v4277_v46, %v6301_v57  ;;  %v640_v18 = vsub.f32 %v4288_v41, %v6302_v50  ;;  %v6310_v47 = vmax.f32 %v4313_v52, 0.0  ;;  %6522 = vst [vmem:[#allocation29_spill] sm:$0xff] %v4343_v45 }
  0xad   : > { %v6312_v22 = vmax.f32 %v4316_v51, 0.0  ;;  %v3051_v11 = vpack.c.bf16 %v608_v36, %v607_v40  ;;  %v625_v57 = vsub.f32 %v4300_v29, %v6307_v34  ;;  %v626_v50 = vsub.f32 %v4303_v24, %v6308_v33  ;;  %v4369_v34 = vld [vmem:[%s4032_s10 + $0x1e0] sm:$0xff]  ;;  %v4372_v33 = vld [vmem:[%s4032_s10 + $0x1e8] sm:$0xff] }
  0xae   : > { %3082 = vmatprep.subr.bf16.mxu1 %v3081_v56  ;;  %v3083_v3 = vpack.c.bf16 %v640_v18, %v639_v30  ;;  %v657_v56 = vsub.f32 %v4313_v52, %v6310_v47  ;;  %v6314_v36 = vmax.f32 %v4332_v53, 0.0  ;;  %6526 = vst [vmem:[#allocation33_spill] sm:$0xff] %v4369_v34  ;;  %6527 = vst [vmem:[#allocation34_spill] sm:$0xff] %v4372_v33  ;;  %v6528_v24 = vmax.f32 %v4324_v60, 0.0  ;;  %v4380_v52 = vld [vmem:[%s4032_s10 + $0x60] sm:$0xff] }
  0xaf   : > { %v658_v40 = vsub.f32 %v4316_v51, %v6312_v22  ;;  %3052 = vmatpush3.bf16.msra.mxu0 %v3051_v11  ;;  %v3053_v9 = vpack.c.bf16 %v626_v50, %v625_v57  ;;  %v6315_v18 = vmax.f32 %v4343_v45, 0.0  ;;  %v6317_v47 = vmax.f32 %v4346_v10, 0.0  ;;  %6529 = vst [vmem:[#allocation35_spill] sm:$0xff] %v4380_v52  ;;  %v4402_v50 = vld [vmem:[%s4032_s10 + $0x168] sm:$0xff] }
  0xb0   : > { %v609_v30 = vsub.f32 %v4324_v60, %v6528_v24  ;;  %3084 = vmatpush3.bf16.msra.mxu1 %v3083_v3  ;;  %v610_v51 = vsub.f32 %v4332_v53, %v6314_v36  ;;  %v6321_v57 = vmax.f32 %v4356_v6, 0.0  ;;  %v4388_v24 = vld [vmem:[%s4032_s10 + $0x68] sm:$0xff]  ;;  %v4399_v36 = vld [vmem:[%s4032_s10 + $0x160] sm:$0xff]  ;;  %6532 = vst [vmem:[#allocation38_spill] sm:$0xff] %v4402_v50  ;;  %v6534_v60 = vmax.f32 %v4369_v34, 0.0 }
  0xb1   : > { %v3085_v22 = vpack.c.bf16 %v658_v40, %v657_v56  ;;  %6530 = vst [vmem:[#allocation36_spill] sm:$0xff] %v4388_v24  ;;  %3054 = vmatprep.subr.bf16.mxu0 %v3053_v9  ;;  %v641_v11 = vsub.f32 %v4343_v45, %v6315_v18  ;;  %v642_v3 = vsub.f32 %v4346_v10, %v6317_v47  ;;  %6531 = vst [vmem:[#allocation37_spill] sm:$0xff] %v4399_v36  ;;  %v4412_v10 = vld [vmem:[%s4032_s10 + $0xf0] sm:$0xff]  ;;  %v4415_v40 = vld [vmem:[%s4032_s10 + $0xf8] sm:$0xff] }
  0xb2   : > { %v3055_v9 = vpack.c.bf16 %v610_v51, %v609_v30  ;;  %v627_v18 = vsub.f32 %v4356_v6, %v6321_v57  ;;  %v6533_v45 = vmax.f32 %v4359_v4, 0.0  ;;  %v659_v51 = vsub.f32 %v4369_v34, %v6534_v60  ;;  %v4425_v6 = vld [vmem:[%s4032_s10 + $0x1f0] sm:$0xff] }
  0xb3   : > { %3086 = vmatprep.subr.bf16.mxu1 %v3085_v22  ;;  %v3087_v53 = vpack.c.bf16 %v642_v3, %v641_v11  ;;  %v6535_v22 = vmax.f32 %v4372_v33, 0.0  ;;  %v6326_v57 = vmax.f32 %v4388_v24, 0.0  ;;  %v6328_v60 = vmax.f32 %v4399_v36, 0.0  ;;  %v4436_v34 = vld [vmem:[%s4032_s10 + $0x70] sm:$0xff] }
  0xb4   : > { %v628_v47 = vsub.f32 %v4359_v4, %v6533_v45  ;;  %v4428_v45 = vld [vmem:[%s4032_s10 + $0x1f8] sm:$0xff]  ;;  %3056 = vmatpush3.bf16.msra.mxu0 %v3055_v9  ;;  %v6536_v4 = vmax.f32 %v4380_v52, 0.0  ;;  %v6330_v3 = vmax.f32 %v4402_v50, 0.0 }
  0xb5   : > { %v660_v30 = vsub.f32 %v4372_v33, %v6535_v22  ;;  %3088 = vmatpush3.bf16.msra.mxu1 %v3087_v53  ;;  %v612_v33 = vsub.f32 %v4388_v24, %v6326_v57  ;;  %v4444_v9 = vld [vmem:[%s4032_s10 + $0x78] sm:$0xff]  ;;  %v4455_v57 = vld [vmem:[%s4032_s10 + $0x170] sm:$0xff] }
  0xb6   : > { %v3057_v56 = vpack.c.bf16 %v628_v47, %v627_v18  ;;  %v611_v11 = vsub.f32 %v4380_v52, %v6536_v4  ;;  %v643_v4 = vsub.f32 %v4399_v36, %v6328_v60  ;;  %v644_v53 = vsub.f32 %v4402_v50, %v6330_v3  ;;  %6537 = vst [vmem:[#allocation39_spill] sm:$0xff] %v4455_v57  ;;  %v4458_v47 = vld [vmem:[%s4032_s10 + $0x178] sm:$0xff] }
  0xb7   : > { %v3089_v22 = vpack.c.bf16 %v660_v30, %v659_v51  ;;  %v6335_v51 = vmax.f32 %v4425_v6, 0.0  ;;  %6538 = vst [vmem:[#allocation40_spill] sm:$0xff] %v4458_v47  ;;  %v6540_v60 = vmax.f32 %v4415_v40, 0.0  ;;  %v6334_v3 = vmax.f32 %v4436_v34, 0.0 }
  0xb8   : > { %3058 = vmatprep.subr.bf16.mxu0 %v3057_v56  ;;  %v3059_v18 = vpack.c.bf16 %v612_v33, %v611_v11  ;;  %v6539_v56 = vmax.f32 %v4412_v10, 0.0  ;;  %v3091_v50 = vpack.c.bf16 %v644_v53, %v643_v4  ;;  %v6541_v52 = vmax.f32 %v4428_v45, 0.0 }
  0xb9   : > { %3090 = vmatprep.subr.bf16.mxu1 %v3089_v22  ;;  %v630_v36 = vsub.f32 %v4415_v40, %v6540_v60  ;;  %v661_v30 = vsub.f32 %v4425_v6, %v6335_v51  ;;  %v6333_v33 = vmax.f32 %v4444_v9, 0.0  ;;  %v613_v60 = vsub.f32 %v4436_v34, %v6334_v3 }
  0xba   : > { %v629_v24 = vsub.f32 %v4412_v10, %v6539_v56  ;;  %v662_v22 = vsub.f32 %v4428_v45, %v6541_v52  ;;  %3060 = vmatpush3.bf16.msra.mxu0 %v3059_v18  ;;  %v6336_v56 = vmax.f32 %v4455_v57, 0.0  ;;  %v6338_v4 = vmax.f32 %v4458_v47, 0.0  ;;  %3092 = vmatpush3.bf16.msra.mxu1 %v3091_v50 }
  0xbb   : > { %v614_v52 = vsub.f32 %v4444_v9, %v6333_v33  ;;  %v6542_v18 = vmax.f32 %v4039_v0, 0.0  ;;  %v6543_v50 = vmax.f32 %v4042_v1, 0.0  ;;  %v6544_v33 = vmax.f32 %v4045_v2, 0.0  ;;  %v793_v0 = vld [vmem:[%s4025_s14 + $0x10] sm:$0xff]  ;;  %v796_v1 = vld [vmem:[%s4025_s14 + $0x28] sm:$0xff]  ;;  %v798_v2 = vld [vmem:[%s4025_s14 + $0x38] sm:$0xff] }
  0xbc   : > { %v3061_v11 = vpack.c.bf16 %v630_v36, %v629_v24  ;;  %v3093_v53 = vpack.c.bf16 %v662_v22, %v661_v30  ;;  %v645_v36 = vsub.f32 %v4455_v57, %v6336_v56  ;;  %v646_v24 = vsub.f32 %v4458_v47, %v6338_v4  ;;  %v791_v56 = vld [vmem:[%s4025_s14] sm:$0xff] }
  0xbd   : > { %v3097_v30 = vpack.c.bf16 %v6543_v50, %v6542_v18  ;;  %v3063_v22 = vpack.c.bf16 %v614_v52, %v613_v60  ;;  %v6546_v57 = vmax.f32 %v4054_v7, 0.0  ;;  %v6547_v4 = vmax.f32 %v4057_v8, 0.0  ;;  %v4533_v50 = vld [vmem:[%s4032_s10 + $0x280] sm:$0xff] }
  0xbe   : > { %3062 = vmatprep.subr.bf16.mxu0 %v3061_v11  ;;  %3094 = vmatprep.subr.bf16.mxu1 %v3093_v53  ;;  %v6545_v11 = vmax.f32 %v4050_v5, 0.0  ;;  %v3095_v51 = vpack.c.bf16 %v646_v24, %v645_v36  ;;  %v6548_v5 = vmax.f32 %v4063_v12, 0.0  ;;  %v6550_v53 = vmax.f32 %v4069_v14, 0.0  ;;  %v797_v12 = vld [vmem:[%s4025_s14 + $0x30] sm:$0xff] }
  0xbf   : > { %3064 = vmatpush3.bf16.msra.mxu0 %v3063_v22  ;;  %v3099_v47 = vpack.c.bf16 %v6547_v4, %v6546_v57  ;;  %v6551_v7 = vmax.f32 %v4082_v19, 0.0  ;;  %v6552_v57 = vmax.f32 %v4085_v20, 0.0  ;;  %v795_v4 = vld [vmem:[%s4025_s14 + $0x20] sm:$0xff]  ;;  %v6554_v14 = vmax.f32 %v4101_v26, 0.0  ;;  %v802_v20 = vld [vmem:[%s4025_s14 + $0x58] sm:$0xff]  ;;  %v4536_v26 = vld [vmem:[%s4032_s10 + $0x288] sm:$0xff] }
  0xc0   : > { %v3129_v3 = vpack.c.bf16 %v6545_v11, %v6544_v33  ;;  %3096 = vmatpush3.bf16.msra.mxu1 %v3095_v51  ;;  %3098 = vmatprep.subr.bf16.mxu0 %v3097_v30  ;;  %v6549_v33 = vmax.f32 %v4066_v13, 0.0  ;;  %v6553_v51 = vmax.f32 %v4098_v25, 0.0  ;;  %v800_v13 = vld [vmem:[%s4025_s14 + $0x48] sm:$0xff]  ;;  %v6555_v19 = vmax.f32 %v4109_v31, 0.0 }
  0xc1   : > { %v3101_v8 = vpack.c.bf16 %v6551_v7, %v6550_v53  ;;  %v6556_v25 = vmax.f32 %v4112_v32, 0.0  ;;  %v6558_v36 = vmax.f32 %v4130_v42, 0.0  ;;  %v6559_v24 = vmax.f32 %v4133_v43, 0.0  ;;  %v799_v42 = vld [vmem:[%s4025_s14 + $0x40] sm:$0xff]  ;;  %v801_v43 = vld [vmem:[%s4025_s14 + $0x50] sm:$0xff]  ;;  %v804_v30 = vld [vmem:[%s4025_s14 + $0x68] sm:$0xff] }
  0xc2   : > { %3130 = vmatprep.subr.bf16.mxu1 %v3129_v3  ;;  %v3131_v60 = vpack.c.bf16 %v6549_v33, %v6548_v5  ;;  %936 = vmatmul.mubr.f32.vlgmr.msra.gmra.mrb[0].mxu0 %v791_v56  ;;  %v3133_v3 = vpack.c.bf16 %v6553_v51, %v6552_v57  ;;  %v3103_v56 = vpack.c.bf16 %v6555_v19, %v6554_v14  ;;  %v6560_v31 = vmax.f32 %v4141_v48, 0.0  ;;  %v806_v5 = vld [vmem:[%s4025_s14 + $0x78] sm:$0xff]  ;;  %v4597_v19 = vld [vmem:[%s4032_s10 + $0x308] sm:$0xff] }
  0xc3   : > { %1081 = vmatmul.mubr.f32.vlgmr.msra.gmra.mrb[0].mxu1 %v793_v0  ;;  %3100 = vmatpush3.bf16.msra.mxu0 %v3099_v47  ;;  %v6557_v47 = vmax.f32 %v4119_v37, 0.0  ;;  %v3105_v18 = vpack.c.bf16 %v6559_v24, %v6558_v36  ;;  %v6561_v32 = vmax.f32 %v4144_v49, 0.0  ;;  %v6562_v22 = vmax.f32 %v4154_v54, 0.0 }
  0xc4   : > { %940 = vmatprep.mubr.f32.mxu0 %v796_v1  ;;  %1085 = vmatprep.mubr.f32.mxu1 %v798_v2  ;;  %v6563_v11 = vmax.f32 %v4165_v59, 0.0  ;;  %v551_v48 = vmax.f32 %v4533_v50, 0.0  ;;  %v552_v49 = vmax.f32 %v4536_v26, 0.0  ;;  %v4552_v1 = vld [vmem:[%s4032_s10 + $0x200] sm:$0xff]  ;;  %v4555_v2 = vld [vmem:[%s4032_s10 + $0x208] sm:$0xff]  ;;  %v6564_v33 = vmax.f32 %v4173_v15, 0.0 }
  0xc5   : > { %3132 = vmatpush3.bf16.msra.mxu1 %v3131_v60  ;;  %3102 = vmatprep.subr.bf16.mxu0 %v3101_v8  ;;  %v3135_v52 = vpack.c.bf16 %v6557_v47, %v6556_v25  ;;  %v3137_v37 = vpack.c.bf16 %v6561_v32, %v6560_v31  ;;  %v6565_v54 = vmax.f32 %v4176_v16, 0.0  ;;  %v6566_v59 = vmax.f32 %v4186_v27, 0.0  ;;  %v4567_v8 = vld [vmem:[%s4032_s10 + $0x380] sm:$0xff]  ;;  %v810_v31 = vld [vmem:[%s4025_s14 + $0x98] sm:$0xff] }
  0xc6   : > { %941 = vmatmul.mubr.f32.gmra.mrb[2].mxu0 %v795_v4  ;;  %3134 = vmatprep.subr.bf16.mxu1 %v3133_v3  ;;  %v3107_v0 = vpack.c.bf16 %v6563_v11, %v6562_v22  ;;  %v6567_v53 = vmax.f32 %v4189_v28, 0.0  ;;  %v6568_v57 = vmax.f32 %v4199_v39, 0.0  ;;  %v6569_v51 = vmax.f32 %v4202_v44, 0.0  ;;  %v4574_v3 = vld [vmem:[%s4032_s10 + $0x388] sm:$0xff]  ;;  %v4577_v16 = vld [vmem:[%s4032_s10 + $0x300] sm:$0xff]  ;;  %v4634_v22 = vld [vmem:[%s4032_s10 + $0x298] sm:$0xff] }
  0xc7   : > { %1086 = vmatmul.mubr.f32.gmra.mrb[2].mxu1 %v797_v12  ;;  %945 = vmatprep.mubr.f32.mxu0 %v800_v13  ;;  %v3139_v60 = vpack.c.bf16 %v6565_v54, %v6564_v33  ;;  %v4582_v27 = vsub.f32 %v4533_v50, %v551_v48  ;;  %v4587_v28 = vsub.f32 %v4536_v26, %v552_v49  ;;  %v803_v39 = vld [vmem:[%s4025_s14 + $0x60] sm:$0xff]  ;;  %v6572_v44 = vmax.f32 %v4210_v55, 0.0  ;;  %v4879_v26 = vld [vmem:[%s4032_s10 + $0x2b0] sm:$0xff] }
  0xc8   : > { %1090 = vmatprep.mubr.f32.mxu1 %v802_v20  ;;  %3104 = vmatpush3.bf16.msra.mxu0 %v3103_v56  ;;  %v3109_v7 = vpack.c.bf16 %v6567_v53, %v6566_v59  ;;  %v3141_v15 = vpack.c.bf16 %v6569_v51, %v6568_v57  ;;  %v6573_v4 = vmax.f32 %v4218_v21, 0.0  ;;  %v6349_v13 = vmax.f32 %v4552_v1, 0.0  ;;  %v805_v56 = vld [vmem:[%s4025_s14 + $0x70] sm:$0xff]  ;;  %v808_v20 = vld [vmem:[%s4025_s14 + $0x88] sm:$0xff] }
  0xc9   : > { %3136 = vmatpush3.bf16.msra.mxu1 %v3135_v52  ;;  %3106 = vmatprep.subr.bf16.mxu0 %v3105_v18  ;;  %6570 = vst [vmem:[#allocation41_spill] sm:$0xff] %v4582_v27  ;;  %6571 = vst [vmem:[#allocation42_spill] sm:$0xff] %v4587_v28  ;;  %v6347_v14 = vmax.f32 %v4555_v2, 0.0  ;;  %v6574_v25 = vmax.f32 %v4229_v38, 0.0  ;;  %v6575_v47 = vmax.f32 %v4232_v23, 0.0  ;;  %v6576_v55 = vmax.f32 %v4242_v62, 0.0 }
  0xca   : > { %946 = vmatmul.mubr.f32.gmra.mrb[4].mxu0 %v799_v42  ;;  %3138 = vmatprep.subr.bf16.mxu1 %v3137_v37  ;;  %v3111_v12 = vpack.c.bf16 %v6573_v4, %v6572_v44  ;;  %v6577_v21 = vmax.f32 %v4245_v58, 0.0  ;;  %v6355_v24 = vmax.f32 %v4567_v8, 0.0  ;;  %v6351_v23 = vmax.f32 %v4574_v3, 0.0  ;;  %v4616_v62 = vld [vmem:[%s4032_s10 + $0x290] sm:$0xff]  ;;  %v812_v59 = vld [vmem:[%s4025_s14 + $0xa8] sm:$0xff] }
  0xcb   : > { %1091 = vmatmul.mubr.f32.gmra.mrb[4].mxu1 %v801_v43  ;;  %950 = vmatprep.mubr.f32.mxu0 %v804_v30  ;;  %v3143_v52 = vpack.c.bf16 %v6575_v47, %v6574_v25  ;;  %v6346_v38 = vmax.f32 %v4577_v16, 0.0  ;;  %v4621_v58 = vsub.f32 %v4552_v1, %v6349_v13  ;;  %v4626_v32 = vsub.f32 %v4555_v2, %v6347_v14  ;;  %v4672_v4 = vld [vmem:[%s4032_s10 + $0x390] sm:$0xff]  ;;  %v5198_v27 = vld [vmem:[%s4032_s10 + $0x2e8] sm:$0xff] }
  0xcc   : > { %1095 = vmatprep.mubr.f32.mxu1 %v806_v5  ;;  %3108 = vmatpush3.bf16.msra.mxu0 %v3107_v0  ;;  %v3113_v36 = vpack.c.bf16 %v6577_v21, %v6576_v55  ;;  %v6580_v37 = vmax.f32 %v4255_v17, 0.0  ;;  %v6581_v42 = vmax.f32 %v4258_v61, 0.0  ;;  %v6345_v30 = vmax.f32 %v4597_v19, 0.0  ;;  %v807_v0 = vld [vmem:[%s4025_s14 + $0x80] sm:$0xff]  ;;  %v4643_v5 = vld [vmem:[%s4032_s10 + $0x210] sm:$0xff]  ;;  %v4646_v17 = vld [vmem:[%s4032_s10 + $0x218] sm:$0xff] }
  0xcd   : > { %3140 = vmatpush3.bf16.msra.mxu1 %v3139_v60  ;;  %3110 = vmatprep.subr.bf16.mxu0 %v3109_v7  ;;  %6578 = vst [vmem:[#allocation43_spill] sm:$0xff] %v4621_v58  ;;  %6579 = vst [vmem:[#allocation44_spill] sm:$0xff] %v4626_v32  ;;  %v4639_v11 = vsub.f32 %v4567_v8, %v6355_v24  ;;  %v4653_v33 = vsub.f32 %v4574_v3, %v6351_v23  ;;  %v809_v60 = vld [vmem:[%s4025_s14 + $0x90] sm:$0xff]  ;;  %v6585_v53 = vmax.f32 %v4266_v35, 0.0  ;;  %v814_v35 = vld [vmem:[%s4025_s14 + $0xb8] sm:$0xff] }
  0xce   : > { %951 = vmatmul.mubr.f32.gmra.mrb[6].mxu0 %v803_v39  ;;  %3142 = vmatprep.subr.bf16.mxu1 %v3141_v15  ;;  %v3145_v43 = vpack.c.bf16 %v6581_v42, %v6580_v37  ;;  %v4658_v54 = vsub.f32 %v4577_v16, %v6346_v38  ;;  %v6586_v7 = vmax.f32 %v4274_v63, 0.0  ;;  %v6587_v51 = vmax.f32 %v4277_v46, 0.0  ;;  %v6591_v63 = vld [vmem:[#allocation24_spill] sm:$0xff]  ;;  %v6595_v47 = vld [vmem:[#allocation26_spill] sm:$0xff]  ;;  %v4796_v23 = vld [vmem:[%s4032_s10 + $0x228] sm:$0xff] }
  0xcf   : > { %6582 = vst [vmem:[#allocation45_spill] sm:$0xff] %v4639_v11  ;;  %1096 = vmatmul.mubr.f32.gmra.mrb[6].mxu1 %v805_v56  ;;  %955 = vmatprep.mubr.f32.mxu0 %v808_v20  ;;  %6583 = vst [vmem:[#allocation46_spill] sm:$0xff] %v4653_v33  ;;  %v6588_v15 = vmax.f32 %v4288_v41, 0.0  ;;  %v6343_v44 = vmax.f32 %v4616_v62, 0.0  ;;  %v6590_v46 = vmax.f32 %v4300_v29, 0.0  ;;  %v6592_v41 = vmax.f32 %v6591_v63, 0.0 }
  0xd0   : > { %6584 = vst [vmem:[#allocation47_spill] sm:$0xff] %v4658_v54  ;;  %1100 = vmatprep.mubr.f32.mxu1 %v810_v31  ;;  %3112 = vmatpush3.bf16.msra.mxu0 %v3111_v12  ;;  %v3115_v57 = vpack.c.bf16 %v6586_v7, %v6585_v53  ;;  %v4677_v12 = vsub.f32 %v4597_v19, %v6345_v30  ;;  %v6593_v20 = vld [vmem:[#allocation25_spill] sm:$0xff]  ;;  %v6596_v55 = vmax.f32 %v6595_v47, 0.0  ;;  %v6342_v31 = vmax.f32 %v4634_v22, 0.0  ;;  %v4697_v42 = vld [vmem:[%s4032_s10 + $0x310] sm:$0xff]  ;;  %v5060_v54 = vld [vmem:[%s4032_s10 + $0x3d8] sm:$0xff] }
  0xd1   : > { %v3147_v39 = vpack.c.bf16 %v6588_v15, %v6587_v51  ;;  %3144 = vmatpush3.bf16.msra.mxu1 %v3143_v52  ;;  %3114 = vmatprep.subr.bf16.mxu0 %v3113_v36  ;;  %v3117_v56 = vpack.c.bf16 %v6592_v41, %v6590_v46  ;;  %v6594_v25 = vmax.f32 %v6593_v20, 0.0  ;;  %v6341_v52 = vmax.f32 %v4643_v5, 0.0  ;;  %v4694_v36 = vld [vmem:[%s4032_s10 + $0x398] sm:$0xff]  ;;  %v6600_v15 = vld [vmem:[#allocation28_spill] sm:$0xff]  ;;  %v6602_v41 = vld [vmem:[#allocation29_spill] sm:$0xff] }
  0xd2   : > { %6589 = vst [vmem:[#allocation48_spill] sm:$0xff] %v4677_v12  ;;  %956 = vmatmul.mubr.f32.gmra.mrb[8].mxu0 %v807_v0  ;;  %3146 = vmatprep.subr.bf16.mxu1 %v3145_v43  ;;  %v6340_v29 = vmax.f32 %v4646_v17, 0.0  ;;  %v4704_v7 = vsub.f32 %v4616_v62, %v6343_v44  ;;  %v811_v43 = vld [vmem:[%s4025_s14 + $0xa0] sm:$0xff]  ;;  %v6598_v0 = vld [vmem:[#allocation27_spill] sm:$0xff]  ;;  %v6601_v46 = vmax.f32 %v6600_v15, 0.0  ;;  %v6603_v20 = vmax.f32 %v6602_v41, 0.0 }
  0xd3   : > { %v3149_v21 = vpack.c.bf16 %v6596_v55, %v6594_v25  ;;  %1101 = vmatmul.mubr.f32.gmra.mrb[8].mxu1 %v809_v60  ;;  %960 = vmatprep.mubr.f32.mxu0 %v812_v59  ;;  %v6599_v51 = vmax.f32 %v6598_v0, 0.0  ;;  %v6604_v25 = vld [vmem:[#allocation30_spill] sm:$0xff]  ;;  %v6344_v53 = vmax.f32 %v4672_v4, 0.0  ;;  %v4719_v60 = vsub.f32 %v4634_v22, %v6342_v31  ;;  %v816_v0 = vld [vmem:[%s4025_s14 + $0xc8] sm:$0xff]  ;;  %v6607_v15 = vld [vmem:[#allocation31_spill] sm:$0xff] }
  0xd4   : > { %6597 = vst [vmem:[#allocation24_spill] sm:$0xff] %v4704_v7  ;;  %v6605_v47 = vmax.f32 %v6604_v25, 0.0  ;;  %1105 = vmatprep.mubr.f32.mxu1 %v814_v35  ;;  %v813_v59 = vld [vmem:[%s4025_s14 + $0xb0] sm:$0xff]  ;;  %3116 = vmatpush3.bf16.msra.mxu0 %v3115_v57  ;;  %v4728_v25 = vld [vmem:[%s4032_s10 + $0x318] sm:$0xff]  ;;  %v6348_v57 = vmax.f32 %v4694_v36, 0.0 }
  0xd5   : > { %v3119_v63 = vpack.c.bf16 %v6601_v46, %v6599_v51  ;;  %6606 = vst [vmem:[#allocation25_spill] sm:$0xff] %v4719_v60  ;;  %v6608_v51 = vmax.f32 %v6607_v15, 0.0  ;;  %v6609_v46 = vld [vmem:[#allocation32_spill] sm:$0xff]  ;;  %v818_v35 = vld [vmem:[%s4025_s14 + $0xd8] sm:$0xff]  ;;  %3148 = vmatpush3.bf16.msra.mxu1 %v3147_v39  ;;  %3118 = vmatprep.subr.bf16.mxu0 %v3117_v56  ;;  %v6350_v15 = vmax.f32 %v4697_v42, 0.0  ;;  %v4754_v37 = vsub.f32 %v4672_v4, %v6344_v53  ;;  %v6614_v39 = vld [vmem:[#allocation33_spill] sm:$0xff] }
  0xd6   : > { %v3151_v55 = vpack.c.bf16 %v6605_v47, %v6603_v20  ;;  %v6610_v41 = vmax.f32 %v6609_v46, 0.0  ;;  %v4733_v20 = vsub.f32 %v4643_v5, %v6341_v52  ;;  %v4738_v47 = vsub.f32 %v4646_v17, %v6340_v29  ;;  %v4747_v46 = vld [vmem:[%s4032_s10 + $0x2a8] sm:$0xff]  ;;  %961 = vmatmul.mubr.f32.gmra.mrb[10].mxu0 %v811_v43  ;;  %3150 = vmatprep.subr.bf16.mxu1 %v3149_v21  ;;  %v6616_v18 = vld [vmem:[#allocation34_spill] sm:$0xff] }
  0xd7   : > { %6613 = vst [vmem:[#allocation28_spill] sm:$0xff] %v4754_v37  ;;  %v6615_v56 = vmax.f32 %v6614_v39, 0.0  ;;  %v6617_v29 = vmax.f32 %v6616_v18, 0.0  ;;  %1106 = vmatmul.mubr.f32.gmra.mrb[10].mxu1 %v813_v59  ;;  %965 = vmatprep.mubr.f32.mxu0 %v816_v0  ;;  %v4766_v44 = vld [vmem:[%s4025_s14 + $0xd0] sm:$0xff]  ;;  %v6354_v43 = vmax.f32 %v4728_v25, 0.0  ;;  %v4772_v18 = vsub.f32 %v4694_v36, %v6348_v57  ;;  %v6623_v59 = vld [vmem:[#allocation35_spill] sm:$0xff] }
  0xd8   : > { %v3121_v61 = vpack.c.bf16 %v6610_v41, %v6608_v51  ;;  %6611 = vst [vmem:[#allocation26_spill] sm:$0xff] %v4733_v20  ;;  %6612 = vst [vmem:[#allocation27_spill] sm:$0xff] %v4738_v47  ;;  %v4744_v51 = vld [vmem:[%s4032_s10 + $0x2a0] sm:$0xff]  ;;  %v4777_v21 = vsub.f32 %v4697_v42, %v6350_v15  ;;  %1110 = vmatprep.mubr.f32.mxu1 %v818_v35  ;;  %3120 = vmatpush3.bf16.msra.mxu0 %v3119_v63  ;;  %v6624_v0 = vmax.f32 %v6623_v59, 0.0  ;;  %v6627_v53 = vld [vmem:[#allocation37_spill] sm:$0xff] }
  0xd9   : > { %v3153_v52 = vpack.c.bf16 %v6617_v29, %v6615_v56  ;;  %v4763_v41 = vld [vmem:[%s4025_s14 + $0xc0] sm:$0xff]  ;;  %6619 = vst [vmem:[#allocation30_spill] sm:$0xff] %v4766_v44  ;;  %6620 = vst [vmem:[#allocation31_spill] sm:$0xff] %v4772_v18  ;;  %v4780_v29 = vld [vmem:[%s4025_s14 + $0xe8] sm:$0xff]  ;;  %v6628_v30 = vmax.f32 %v6627_v53, 0.0  ;;  %v6353_v13 = vmax.f32 %v4744_v51, 0.0  ;;  %3152 = vmatpush3.bf16.msra.mxu1 %v3151_v55 }
  0xda   : > { %6618 = vst [vmem:[#allocation29_spill] sm:$0xff] %v4763_v41  ;;  %6621 = vst [vmem:[#allocation32_spill] sm:$0xff] %v4777_v21  ;;  %v6625_v39 = vld [vmem:[#allocation36_spill] sm:$0xff]  ;;  %v6629_v38 = vld [vmem:[#allocation38_spill] sm:$0xff]  ;;  %v6352_v15 = vmax.f32 %v4747_v46, 0.0  ;;  %3122 = vmatprep.subr.bf16.mxu0 %v3121_v61  ;;  %v6632_v53 = vmax.f32 %v4412_v10, 0.0  ;;  %966 = vmatmul.mubr.f32.gmra.mrb[12].mxu0 %v4763_v41 }
  0xdb   : > { %6622 = vst [vmem:[#allocation33_spill] sm:$0xff] %v4780_v29  ;;  %v6626_v56 = vmax.f32 %v6625_v39, 0.0  ;;  %v6630_v14 = vmax.f32 %v6629_v38, 0.0  ;;  %v4793_v35 = vld [vmem:[%s4032_s10 + $0x220] sm:$0xff]  ;;  %v4799_v63 = vld [vmem:[%s4025_s14 + $0xf8] sm:$0xff]  ;;  %v6633_v38 = vmax.f32 %v4415_v40, 0.0  ;;  %3154 = vmatprep.subr.bf16.mxu1 %v3153_v52  ;;  %1111 = vmatmul.mubr.f32.gmra.mrb[12].mxu1 %v4766_v44 }
  0xdc   : > { %6631 = vst [vmem:[#allocation34_spill] sm:$0xff] %v4799_v63  ;;  %v6635_v10 = vmax.f32 %v4425_v6, 0.0  ;;  %v6636_v40 = vmax.f32 %v4428_v45, 0.0  ;;  %v4821_v55 = vld [vmem:[%s4032_s10 + $0x3a8] sm:$0xff]  ;;  %v4824_v39 = vld [vmem:[%s4032_s10 + $0x320] sm:$0xff]  ;;  %970 = vmatprep.mubr.f32.mxu0 %v4780_v29  ;;  %v6640_v45 = vmax.f32 %v4436_v34, 0.0  ;;  %1115 = vmatprep.mubr.f32.mxu1 %v4799_v63 }
  0xdd   : > { %v3123_v31 = vpack.c.bf16 %v6626_v56, %v6624_v0  ;;  %v3155_v57 = vpack.c.bf16 %v6630_v14, %v6628_v30  ;;  %v3125_v59 = vpack.c.bf16 %v6633_v38, %v6632_v53  ;;  %v4806_v14 = vld [vmem:[%s4032_s10 + $0x3a0] sm:$0xff]  ;;  %v4813_v0 = vsub.f32 %v4728_v25, %v6354_v43  ;;  %v4848_v30 = vld [vmem:[%s4032_s10 + $0x328] sm:$0xff]  ;;  %v6644_v34 = vld [vmem:[#allocation39_spill] sm:$0xff] }
  0xde   : > { %v3157_v61 = vpack.c.bf16 %v6636_v40, %v6635_v10  ;;  %v4829_v56 = vsub.f32 %v4744_v51, %v6353_v13  ;;  %v4834_v53 = vsub.f32 %v4747_v46, %v6352_v15  ;;  %v4839_v6 = vld [vmem:[%s4025_s14 + $0xe0] sm:$0xff]  ;;  %v6641_v52 = vmax.f32 %v4444_v9, 0.0  ;;  %v4854_v13 = vld [vmem:[%s4025_s14 + $0xf0] sm:$0xff]  ;;  %v4857_v43 = vld [vmem:[%s4025_s14 + $0x108] sm:$0xff] }
  0xdf   : > { %6634 = vst [vmem:[#allocation35_spill] sm:$0xff] %v4813_v0  ;;  %6639 = vst [vmem:[#allocation38_spill] sm:$0xff] %v4839_v6  ;;  %3124 = vmatpush3.bf16.msra.mxu0 %v3123_v31  ;;  %v6645_v9 = vmax.f32 %v6644_v34, 0.0  ;;  %v3161_v40 = vpack.c.bf16 %v552_v49, %v551_v48  ;;  %v6357_v15 = vmax.f32 %v4806_v14, 0.0  ;;  %v4871_v63 = vld [vmem:[%s4025_s14 + $0x118] sm:$0xff]  ;;  %v4874_v31 = vld [vmem:[%s4025_s14 + $0x100] sm:$0xff]  ;;  %3156 = vmatpush3.bf16.msra.mxu1 %v3155_v57 }
  0xe0   : > { %6637 = vst [vmem:[#allocation36_spill] sm:$0xff] %v4829_v56  ;;  %6638 = vst [vmem:[#allocation37_spill] sm:$0xff] %v4834_v53  ;;  %v3127_v38 = vpack.c.bf16 %v6641_v52, %v6640_v45  ;;  %v6646_v45 = vld [vmem:[#allocation40_spill] sm:$0xff]  ;;  %3126 = vmatprep.subr.bf16.mxu0 %v3125_v59  ;;  %v6650_v48 = vmax.f32 %v4793_v35, 0.0  ;;  %971 = vmatmul.mubr.f32.gmra.mrb[14].mxu0 %v4839_v6  ;;  %v4893_v57 = vld [vmem:[%s4025_s14 + $0x110] sm:$0xff]  ;;  %v6655_v59 = vmax.f32 %v4567_v8, 0.0 }
  0xe1   : > { %6642 = vst [vmem:[#allocation49_spill] sm:$0xff] %v4854_v13  ;;  %6643 = vst [vmem:[#allocation50_spill] sm:$0xff] %v4857_v43  ;;  %v6647_v52 = vmax.f32 %v6646_v45, 0.0  ;;  %3158 = vmatprep.subr.bf16.mxu1 %v3157_v61  ;;  %v4904_v34 = vld [vmem:[%s4032_s10 + $0x230] sm:$0xff]  ;;  %v4912_v61 = vsub.f32 %v4806_v14, %v6357_v15  ;;  %1116 = vmatmul.mubr.f32.gmra.mrb[14].mxu1 %v4854_v13  ;;  %v4917_v8 = vld [vmem:[%s4025_s14 + $0x128] sm:$0xff]  ;;  %v6659_v50 = vmax.f32 %v4821_v55, 0.0 }
  0xe2   : > { %6648 = vst [vmem:[#allocation39_spill] sm:$0xff] %v4871_v63  ;;  %6649 = vst [vmem:[#allocation40_spill] sm:$0xff] %v4874_v31  ;;  %v4884_v49 = vsub.f32 %v4793_v35, %v6650_v48  ;;  %v4901_v48 = vld [vmem:[%s4032_s10 + $0x2b8] sm:$0xff]  ;;  %975 = vmatprep.mubr.f32.mxu0 %v4857_v43  ;;  %v6661_v6 = vmax.f32 %v4824_v39, 0.0  ;;  %1120 = vmatprep.mubr.f32.mxu1 %v4871_v63  ;;  %v4940_v29 = vld [vmem:[%s4032_s10 + $0x330] sm:$0xff]  ;;  %v6674_v53 = vmax.f32 %v4904_v34, 0.0 }
  0xe3   : > { %v3159_v24 = vpack.c.bf16 %v6647_v52, %v6645_v9  ;;  %v6652_v9 = vmax.f32 %v4796_v23, 0.0  ;;  %6654 = vst [vmem:[#allocation53_spill] sm:$0xff] %v4893_v57  ;;  %v6656_v52 = vmax.f32 %v4574_v3, 0.0  ;;  %6657 = vst [vmem:[#allocation54_spill] sm:$0xff] %v4912_v61  ;;  %v4920_v3 = vld [vmem:[%s4032_s10 + $0x3b0] sm:$0xff]  ;;  %v4930_v15 = vsub.f32 %v4821_v55, %v6659_v50  ;;  %3128 = vmatpush3.bf16.msra.mxu0 %v3127_v38  ;;  %v4946_v44 = vld [vmem:[%s4032_s10 + $0x2c0] sm:$0xff] }
  0xe4   : > { %6651 = vst [vmem:[#allocation51_spill] sm:$0xff] %v4884_v49  ;;  %6658 = vst [vmem:[#allocation55_spill] sm:$0xff] %v4917_v8  ;;  %v4935_v13 = vsub.f32 %v4824_v39, %v6661_v6  ;;  %v6663_v50 = vmax.f32 %v4848_v30, 0.0  ;;  %v4954_v6 = vld [vmem:[%s4025_s14 + $0x138] sm:$0xff]  ;;  %v4957_v38 = vld [vmem:[%s4025_s14 + $0x120] sm:$0xff]  ;;  %3162 = vmatprep.subr.bf16.mxu0 %v3161_v40  ;;  %976 = vmatmul.mubr.f32.gmra.mrb[16].mxu0 %v4874_v31  ;;  %v6669_v31 = vmax.f32 %v4879_v26, 0.0 }
  0xe5   : > { %v4889_v45 = vsub.f32 %v4796_v23, %v6652_v9  ;;  %v3193_v10 = vpack.c.bf16 %v6656_v52, %v6655_v59  ;;  %v4907_v9 = vld [vmem:[%s4032_s10 + $0x238] sm:$0xff]  ;;  %6660 = vst [vmem:[#allocation56_spill] sm:$0xff] %v4930_v15  ;;  %6665 = vst [vmem:[#allocation59_spill] sm:$0xff] %v4954_v6  ;;  %3160 = vmatpush3.bf16.msra.mxu1 %v3159_v24  ;;  %v4969_v56 = vld [vmem:[%s4025_s14 + $0x130] sm:$0xff]  ;;  %980 = vmatprep.mubr.f32.mxu0 %v4917_v8  ;;  %v6687_v12 = vmax.f32 %v4940_v29, 0.0 }
  0xe6   : > { %v4923_v59 = vld [vmem:[%s4032_s10 + $0x3b8] sm:$0xff]  ;;  %6662 = vst [vmem:[#allocation57_spill] sm:$0xff] %v4935_v13  ;;  %v4951_v41 = vsub.f32 %v4848_v30, %v6663_v50  ;;  %6666 = vst [vmem:[#allocation60_spill] sm:$0xff] %v4957_v38  ;;  %v4972_v24 = vld [vmem:[%s4025_s14 + $0x148] sm:$0xff]  ;;  %v4987_v61 = vsub.f32 %v4879_v26, %v6669_v31  ;;  %1121 = vmatmul.mubr.f32.gmra.mrb[16].mxu1 %v4893_v57  ;;  %v6672_v57 = vmax.f32 %v4901_v48, 0.0  ;;  %v6676_v0 = vmax.f32 %v4907_v9, 0.0 }
  0xe7   : > { %6653 = vst [vmem:[#allocation52_spill] sm:$0xff] %v4889_v45  ;;  %v4943_v52 = vld [vmem:[%s4032_s10 + $0x338] sm:$0xff]  ;;  %v4963_v45 = vld [vmem:[%s4032_s10 + $0x2c8] sm:$0xff]  ;;  %6667 = vst [vmem:[#allocation61_spill] sm:$0xff] %v4969_v56  ;;  %3194 = vmatprep.subr.bf16.mxu1 %v3193_v10  ;;  %1125 = vmatprep.mubr.f32.mxu1 %v4954_v6  ;;  %v5025_v21 = vsub.f32 %v4904_v34, %v6674_v53  ;;  %v6678_v6 = vmax.f32 %v4920_v3, 0.0  ;;  %v6682_v7 = vmax.f32 %v4923_v59, 0.0 }
  0xe8   : > { %6664 = vst [vmem:[#allocation58_spill] sm:$0xff] %v4951_v41  ;;  %6668 = vst [vmem:[#allocation62_spill] sm:$0xff] %v4972_v24  ;;  %v4977_v49 = vld [vmem:[%s4032_s10 + $0x240] sm:$0xff]  ;;  %v4980_v43 = vld [vmem:[%s4032_s10 + $0x248] sm:$0xff]  ;;  %v5009_v8 = vsub.f32 %v4901_v48, %v6672_v57  ;;  %v5030_v57 = vsub.f32 %v4907_v9, %v6676_v0  ;;  %981 = vmatmul.mubr.f32.gmra.mrb[18].mxu0 %v4957_v38  ;;  %v6695_v20 = vmax.f32 %v4963_v45, 0.0 }
  0xe9   : > { %6670 = vst [vmem:[#allocation63_spill] sm:$0xff] %v4987_v61  ;;  %v4992_v10 = vld [vmem:[%s4025_s14 + $0x158] sm:$0xff]  ;;  %v4998_v50 = vld [vmem:[%s4032_s10 + $0x3c0] sm:$0xff]  ;;  %v5001_v13 = vld [vmem:[%s4032_s10 + $0x3c8] sm:$0xff]  ;;  %v5035_v40 = vsub.f32 %v4920_v3, %v6678_v6  ;;  %v5053_v6 = vsub.f32 %v4923_v59, %v6682_v7  ;;  %985 = vmatprep.mubr.f32.mxu0 %v4972_v24 }
  0xea   : > { %6671 = vst [vmem:[#allocation64_spill] sm:$0xff] %v4992_v10  ;;  %v5004_v31 = vld [vmem:[%s4032_s10 + $0x340] sm:$0xff]  ;;  %6673 = vst [vmem:[#allocation65_spill] sm:$0xff] %v5009_v8  ;;  %v5014_v63 = vld [vmem:[%s4032_s10 + $0x348] sm:$0xff]  ;;  %1126 = vmatmul.mubr.f32.gmra.mrb[18].mxu1 %v4969_v56  ;;  %v5082_v56 = vsub.f32 %v4940_v29, %v6687_v12  ;;  %v6699_v8 = vmax.f32 %v4980_v43, 0.0  ;;  %v6701_v58 = vmax.f32 %v4998_v50, 0.0 }
  0xeb   : > { %v5017_v15 = vld [vmem:[%s4032_s10 + $0x2d0] sm:$0xff]  ;;  %v5020_v41 = vld [vmem:[%s4032_s10 + $0x2d8] sm:$0xff]  ;;  %6675 = vst [vmem:[#allocation66_spill] sm:$0xff] %v5025_v21  ;;  %6677 = vst [vmem:[#allocation67_spill] sm:$0xff] %v5030_v57  ;;  %1130 = vmatprep.mubr.f32.mxu1 %v4992_v10  ;;  %v6693_v21 = vmax.f32 %v4946_v44, 0.0  ;;  %v5112_v57 = vsub.f32 %v4963_v45, %v6695_v20  ;;  %v6704_v32 = vmax.f32 %v5001_v13, 0.0 }
  0xec   : > { %6679 = vst [vmem:[#allocation68_spill] sm:$0xff] %v5035_v40  ;;  %v5040_v37 = vld [vmem:[%s4032_s10 + $0x250] sm:$0xff]  ;;  %v5043_v53 = vld [vmem:[%s4032_s10 + $0x258] sm:$0xff]  ;;  %6683 = vst [vmem:[#allocation71_spill] sm:$0xff] %v5053_v6  ;;  %v6691_v40 = vmax.f32 %v4943_v52, 0.0  ;;  %v6697_v6 = vmax.f32 %v4977_v49, 0.0  ;;  %v5129_v20 = vsub.f32 %v4998_v50, %v6701_v58 }
  0xed   : > { %6680 = vst [vmem:[#allocation69_spill] sm:$0xff] %v5040_v37  ;;  %6681 = vst [vmem:[#allocation70_spill] sm:$0xff] %v5043_v53  ;;  %v5046_v18 = vld [vmem:[%s4032_s10 + $0x3d0] sm:$0xff]  ;;  %v5067_v7 = vld [vmem:[%s4025_s14 + $0x140] sm:$0xff]  ;;  %v5107_v47 = vsub.f32 %v4946_v44, %v6693_v21  ;;  %v5124_v21 = vsub.f32 %v4980_v43, %v6699_v8  ;;  %v5144_v58 = vsub.f32 %v5001_v13, %v6704_v32  ;;  %v6710_v32 = vmax.f32 %v5014_v63, 0.0 }
  0xee   : > { %6684 = vst [vmem:[#allocation72_spill] sm:$0xff] %v5067_v7  ;;  %v5070_v0 = vld [vmem:[%s4025_s14 + $0x150] sm:$0xff]  ;;  %6688 = vst [vmem:[#allocation75_spill] sm:$0xff] %v5082_v56  ;;  %v5086_v24 = vld [vmem:[%s4025_s14 + $0x168] sm:$0xff]  ;;  %v5102_v10 = vsub.f32 %v4943_v52, %v6691_v40  ;;  %986 = vmatmul.mubr.f32.gmra.mrb[20].mxu0 %v5067_v7  ;;  %v5119_v40 = vsub.f32 %v4977_v49, %v6697_v6  ;;  %v6708_v6 = vmax.f32 %v5004_v31, 0.0  ;;  %v6720_v11 = vmax.f32 %v5043_v53, 0.0 }
  0xef   : > { %6685 = vst [vmem:[#allocation73_spill] sm:$0xff] %v5070_v0  ;;  %v5075_v60 = vld [vmem:[%s4032_s10 + $0x350] sm:$0xff]  ;;  %6689 = vst [vmem:[#allocation76_spill] sm:$0xff] %v5086_v24  ;;  %v5093_v61 = vld [vmem:[%s4032_s10 + $0x358] sm:$0xff]  ;;  %1131 = vmatmul.mubr.f32.gmra.mrb[20].mxu1 %v5070_v0  ;;  %990 = vmatprep.mubr.f32.mxu0 %v5086_v24 }
  0xf0   : > { %6686 = vst [vmem:[#allocation74_spill] sm:$0xff] %v5075_v60  ;;  %v5096_v38 = vld [vmem:[%s4025_s14 + $0x178] sm:$0xff]  ;;  %6692 = vst [vmem:[#allocation78_spill] sm:$0xff] %v5102_v10  ;;  %v5134_v12 = vld [vmem:[%s4025_s14 + $0x160] sm:$0xff]  ;;  %v5158_v7 = vsub.f32 %v5004_v31, %v6708_v6  ;;  %v5194_v33 = vsub.f32 %v5043_v53, %v6720_v11  ;;  %v6726_v11 = vmax.f32 %v5060_v54, 0.0  ;;  %v6728_v28 = vmax.f32 %v5075_v60, 0.0 }
  0xf1   : > { %6690 = vst [vmem:[#allocation77_spill] sm:$0xff] %v5096_v38  ;;  %6694 = vst [vmem:[#allocation79_spill] sm:$0xff] %v5107_v47  ;;  %1135 = vmatprep.mubr.f32.mxu1 %v5096_v38  ;;  %v5148_v24 = vld [vmem:[%s4025_s14 + $0x170] sm:$0xff]  ;;  %v5151_v0 = vld [vmem:[%s4025_s14 + $0x188] sm:$0xff]  ;;  %v5163_v47 = vsub.f32 %v5014_v63, %v6710_v32  ;;  %v6712_v38 = vmax.f32 %v5017_v15, 0.0 }
  0xf2   : > { %6696 = vst [vmem:[#allocation80_spill] sm:$0xff] %v5112_v57  ;;  %6698 = vst [vmem:[#allocation81_spill] sm:$0xff] %v5119_v40  ;;  %v5171_v56 = vld [vmem:[%s4025_s14 + $0x198] sm:$0xff]  ;;  %v5174_v10 = vld [vmem:[%s4025_s14 + $0x180] sm:$0xff]  ;;  %v6716_v40 = vmax.f32 %v5020_v41, 0.0  ;;  %991 = vmatmul.mubr.f32.gmra.mrb[22].mxu0 %v5134_v12  ;;  %v5221_v53 = vsub.f32 %v5075_v60, %v6728_v28 }
  0xf3   : > { %6700 = vst [vmem:[#allocation82_spill] sm:$0xff] %v5124_v21  ;;  %6702 = vst [vmem:[#allocation83_spill] sm:$0xff] %v5129_v20  ;;  %v5168_v57 = vsub.f32 %v5017_v15, %v6712_v38  ;;  %v5177_v8 = vld [vmem:[%s4032_s10 + $0x2e0] sm:$0xff]  ;;  %v6718_v38 = vmax.f32 %v5040_v37, 0.0  ;;  %v6724_v20 = vmax.f32 %v5046_v18, 0.0  ;;  %1136 = vmatmul.mubr.f32.gmra.mrb[22].mxu1 %v5148_v24  ;;  %995 = vmatprep.mubr.f32.mxu0 %v5151_v0  ;;  %v5251_v60 = vld [vmem:[%s4032_s10 + $0x368] sm:$0xff] }
  0xf4   : > { %6703 = vst [vmem:[#allocation84_spill] sm:$0xff] %v5134_v12  ;;  %6705 = vst [vmem:[#allocation85_spill] sm:$0xff] %v5144_v58  ;;  %v5184_v32 = vsub.f32 %v5020_v41, %v6716_v40  ;;  %v5201_v6 = vld [vmem:[%s4032_s10 + $0x260] sm:$0xff]  ;;  %v5204_v40 = vld [vmem:[%s4032_s10 + $0x268] sm:$0xff]  ;;  %v5216_v12 = vsub.f32 %v5060_v54, %v6726_v11  ;;  %1140 = vmatprep.mubr.f32.mxu1 %v5171_v56 }
  0xf5   : > { %6706 = vst [vmem:[#allocation86_spill] sm:$0xff] %v5148_v24  ;;  %6707 = vst [vmem:[#allocation87_spill] sm:$0xff] %v5151_v0  ;;  %v5189_v21 = vsub.f32 %v5040_v37, %v6718_v38  ;;  %v5211_v58 = vsub.f32 %v5046_v18, %v6724_v20  ;;  %v5226_v38 = vld [vmem:[%s4032_s10 + $0x3e0] sm:$0xff]  ;;  %v6733_v37 = vmax.f32 %v5093_v61, 0.0  ;;  %v5245_v0 = vld [vmem:[%s4025_s14 + $0x190] sm:$0xff] }
  0xf6   : > { %6709 = vst [vmem:[#allocation88_spill] sm:$0xff] %v5158_v7  ;;  %6711 = vst [vmem:[#allocation89_spill] sm:$0xff] %v5163_v47  ;;  %v5229_v7 = vld [vmem:[%s4032_s10 + $0x3e8] sm:$0xff]  ;;  %v5232_v20 = vld [vmem:[%s4032_s10 + $0x360] sm:$0xff]  ;;  %996 = vmatmul.mubr.f32.gmra.mrb[24].mxu0 %v5174_v10  ;;  %v6741_v47 = vmax.f32 %v5198_v27, 0.0 }
  0xf7   : > { %6713 = vst [vmem:[#allocation90_spill] sm:$0xff] %v5168_v57  ;;  %6714 = vst [vmem:[#allocation91_spill] sm:$0xff] %v5171_v56  ;;  %v5241_v28 = vsub.f32 %v5093_v61, %v6733_v37  ;;  %v5248_v24 = vld [vmem:[%s4025_s14 + $0x1a8] sm:$0xff]  ;;  %v5256_v57 = vld [vmem:[%s4025_s14 + $0x1b8] sm:$0xff]  ;;  %1141 = vmatmul.mubr.f32.gmra.mrb[24].mxu1 %v5245_v0 }
  0xf8   : > { %6715 = vst [vmem:[#allocation92_spill] sm:$0xff] %v5174_v10  ;;  %6717 = vst [vmem:[#allocation93_spill] sm:$0xff] %v5184_v32  ;;  %1000 = vmatprep.mubr.f32.mxu0 %v5248_v24  ;;  %v5271_v37 = vld [vmem:[%s4025_s14 + $0x1a0] sm:$0xff]  ;;  %v5282_v11 = vsub.f32 %v5198_v27, %v6741_v47  ;;  %v6743_v32 = vmax.f32 %v5201_v6, 0.0  ;;  %1145 = vmatprep.mubr.f32.mxu1 %v5256_v57  ;;  %v5291_v56 = vld [vmem:[%s4025_s14 + $0x1b0] sm:$0xff]  ;;  %v6749_v47 = vmax.f32 %v5226_v38, 0.0 }
  0xf9   : > { %6719 = vst [vmem:[#allocation94_spill] sm:$0xff] %v5189_v21  ;;  %6721 = vst [vmem:[#allocation95_spill] sm:$0xff] %v5194_v33  ;;  %v6739_v21 = vmax.f32 %v5177_v8, 0.0 }
  0xfa   : > { %6722 = vst [vmem:[#allocation96_spill] sm:$0xff] %v5201_v6  ;;  %6723 = vst [vmem:[#allocation97_spill] sm:$0xff] %v5204_v40  ;;  %1001 = vmatmul.mubr.f32.gmra.mrb[26].mxu0 %v5271_v37 }
  0xfb   : > { %6725 = vst [vmem:[#allocation98_spill] sm:$0xff] %v5211_v58  ;;  %6727 = vst [vmem:[#allocation99_spill] sm:$0xff] %v5216_v12  ;;  %v5277_v33 = vsub.f32 %v5177_v8, %v6739_v21  ;;  %v6747_v21 = vmax.f32 %v5204_v40, 0.0  ;;  %v5320_v12 = vld [vmem:[%s4025_s14 + $0x1c0] sm:$0xff]  ;;  %1146 = vmatmul.mubr.f32.gmra.mrb[26].mxu1 %v5291_v56 }
  0xfc   : > { %6729 = vst [vmem:[#allocation100_spill] sm:$0xff] %v5221_v53  ;;  %6730 = vst [vmem:[#allocation101_spill] sm:$0xff] %v5226_v38  ;;  %v5304_v53 = vsub.f32 %v5226_v38, %v6749_v47  ;;  %v5361_v38 = vld [vmem:[%s4025_s14 + $0x1d0] sm:$0xff]  ;;  %v5367_v47 = vld [vmem:[%s4032_s10 + $0x378] sm:$0xff] }
  0xfd   : > { %6731 = vst [vmem:[#allocation102_spill] sm:$0xff] %v5229_v7  ;;  %6732 = vst [vmem:[#allocation103_spill] sm:$0xff] %v5232_v20  ;;  %v5299_v10 = vsub.f32 %v5204_v40, %v6747_v21  ;;  %v5317_v21 = vld [vmem:[%s4025_s14 + $0x1d8] sm:$0xff]  ;;  %v5323_v40 = vld [vmem:[%s4032_s10 + $0x2f0] sm:$0xff] }
  0xfe   : > { %6734 = vst [vmem:[#allocation104_spill] sm:$0xff] %v5241_v28  ;;  %6735 = vst [vmem:[#allocation105_spill] sm:$0xff] %v5245_v0  ;;  %v5294_v0 = vld [vmem:[%s4025_s14 + $0x1c8] sm:$0xff]  ;;  %1150 = vmatprep.mubr.f32.mxu1 %v5317_v21 }
  0xff   : > { %6736 = vst [vmem:[#allocation106_spill] sm:$0xff] %v5248_v24  ;;  %6737 = vst [vmem:[#allocation107_spill] sm:$0xff] %v5256_v57  ;;  %v5287_v24 = vsub.f32 %v5201_v6, %v6743_v32  ;;  %v6751_v32 = vmax.f32 %v5229_v7, 0.0  ;;  %v6753_v57 = vmax.f32 %v5232_v20, 0.0  ;;  %1005 = vmatprep.mubr.f32.mxu0 %v5294_v0  ;;  %1151 = vmatmul.mubr.f32.gmra.mrb[28].mxu1 %v5361_v38 }
 0x100   : > { %6738 = vst [vmem:[#allocation108_spill] sm:$0xff] %v5271_v37  ;;  %6740 = vst [vmem:[#allocation109_spill] sm:$0xff] %v5277_v33  ;;  %v5352_v37 = vld [vmem:[%s4032_s10 + $0x3f8] sm:$0xff]  ;;  %v5355_v33 = vld [vmem:[%s4032_s10 + $0x370] sm:$0xff]  ;;  %1006 = vmatmul.mubr.f32.gmra.mrb[28].mxu0 %v5320_v12 }
 0x101   : > { %6742 = vst [vmem:[#allocation110_spill] sm:$0xff] %v5282_v11  ;;  %6744 = vst [vmem:[#allocation111_spill] sm:$0xff] %v5287_v24  ;;  %v5309_v28 = vsub.f32 %v5229_v7, %v6751_v32  ;;  %v5314_v58 = vsub.f32 %v5232_v20, %v6753_v57  ;;  %v6757_v32 = vmax.f32 %v5251_v60, 0.0  ;;  %v5334_v57 = vld [vmem:[%s4032_s10 + $0x2f8] sm:$0xff]  ;;  %v5337_v20 = vld [vmem:[%s4032_s10 + $0x270] sm:$0xff] }
 0x102   : > { %6745 = vst [vmem:[#allocation112_spill] sm:$0xff] %v5291_v56  ;;  %6746 = vst [vmem:[#allocation113_spill] sm:$0xff] %v5294_v0  ;;  %v5340_v7 = vld [vmem:[%s4032_s10 + $0x278] sm:$0xff]  ;;  %v5364_v24 = vld [vmem:[%s4025_s14 + $0x1e8] sm:$0xff] }
 0x103   : > { %6748 = vst [vmem:[#allocation114_spill] sm:$0xff] %v5299_v10  ;;  %6750 = vst [vmem:[#allocation115_spill] sm:$0xff] %v5304_v53  ;;  %v5330_v6 = vsub.f32 %v5251_v60, %v6757_v32  ;;  %v5349_v32 = vld [vmem:[%s4032_s10 + $0x3f0] sm:$0xff]  ;;  %v5370_v56 = vld [vmem:[%s4025_s14 + $0x1f8] sm:$0xff]  ;;  %1010 = vmatprep.mubr.f32.mxu0 %v5364_v24  ;;  %v6768_v53 = vmax.f32 %v5323_v40, 0.0 }
 0x104   : > { %6752 = vst [vmem:[#allocation116_spill] sm:$0xff] %v5309_v28  ;;  %6754 = vst [vmem:[#allocation117_spill] sm:$0xff] %v5314_v58  ;;  %v5383_v0 = vld [vmem:[%s4025_s14 + $0x1e0] sm:$0xff]  ;;  %1155 = vmatprep.mubr.f32.mxu1 %v5370_v56  ;;  %v5406_v10 = vld [vmem:[%s4018_s3 + $0x8] sm:$0xff] }
 0x105   : > { %6755 = vst [vmem:[#allocation118_spill] sm:$0xff] %v5317_v21  ;;  %6756 = vst [vmem:[#allocation119_spill] sm:$0xff] %v5320_v12  ;;  %v5389_v12 = vsub.f32 %v5323_v40, %v6768_v53  ;;  %v6770_v21 = vmax.f32 %v5334_v57, 0.0  ;;  %v6775_v53 = vmax.f32 %v5340_v7, 0.0  ;;  %1011 = vmatmul.mubr.f32.gmra.mrb[30].mxu0 %v5383_v0 }
 0x106   : > { %6758 = vst [vmem:[#allocation120_spill] sm:$0xff] %v5330_v6  ;;  %6759 = vst [vmem:[#allocation121_spill] sm:$0xff] %v5334_v57  ;;  %v6771_v6 = vmax.f32 %v5337_v20, 0.0  ;;  %1225 = vmatprep.mubr.f32.mxu0 %v5406_v10 }
 0x107   : > { %6760 = vst [vmem:[#allocation122_spill] sm:$0xff] %v5337_v20  ;;  %6761 = vst [vmem:[#allocation123_spill] sm:$0xff] %v5340_v7  ;;  %v5394_v58 = vsub.f32 %v5334_v57, %v6770_v21  ;;  %v6776_v21 = vmax.f32 %v5349_v32, 0.0 }
 0x108   : > { %6762 = vst [vmem:[#allocation124_spill] sm:$0xff] %v5349_v32  ;;  %6763 = vst [vmem:[#allocation125_spill] sm:$0xff] %v5352_v37  ;;  %v5399_v11 = vsub.f32 %v5337_v20, %v6771_v6  ;;  %v6777_v6 = vmax.f32 %v5352_v37, 0.0  ;;  %v6778_v20 = vmax.f32 %v5355_v33, 0.0 }
 0x109   : > { %6764 = vst [vmem:[#allocation126_spill] sm:$0xff] %v5361_v38  ;;  %6765 = vst [vmem:[#allocation127_spill] sm:$0xff] %v5364_v24  ;;  %v5403_v24 = vld [vmem:[%s4025_s14 + $0x1f0] sm:$0xff]  ;;  %v5411_v38 = vsub.f32 %v5340_v7, %v6775_v53  ;;  %v5416_v28 = vsub.f32 %v5349_v32, %v6776_v21  ;;  %v5429_v53 = vld [vmem:[%s4018_s3 + $0x18] sm:$0xff]  ;;  %v6781_v21 = vmax.f32 %v5367_v47, 0.0  ;;  %v6783_v7 = vmax.f32 %v4552_v1, 0.0 }
 0x10a   : > { %6766 = vst [vmem:[#allocation128_spill] sm:$0xff] %v5370_v56  ;;  %6767 = vst [vmem:[#allocation129_spill] sm:$0xff] %v5383_v0  ;;  %v5421_v56 = vsub.f32 %v5352_v37, %v6777_v6  ;;  %v5426_v57 = vsub.f32 %v5355_v33, %v6778_v20  ;;  %1156 = vmatmul.mubr.f32.gmra.mrb[30].mxu1 %v5403_v24  ;;  %v5446_v20 = vld [vmem:[%s4018_s3] sm:$0xff]  ;;  %v5456_v37 = vld [vmem:[%s4018_s3 + $0x10] sm:$0xff]  ;;  %v6785_v0 = vmax.f32 %v4577_v16, 0.0  ;;  %v6786_v1 = vmax.f32 %v4597_v19, 0.0 }
 0x10b   : > { %6769 = vst [vmem:[#allocation130_spill] sm:$0xff] %v5389_v12  ;;  %6772 = vst [vmem:[#allocation131_spill] sm:$0xff] %v5399_v11  ;;  %v5436_v32 = vsub.f32 %v5367_v47, %v6781_v21  ;;  %v6784_v21 = vmax.f32 %v4555_v2, 0.0  ;;  %1370 = vmatprep.mubr.f32.mxu1 %v5429_v53  ;;  %1226 = vmatmul.mubr.f32.vlgmr.msra.gmra.mrb[32].mxu0 %v5446_v20  ;;  %v6789_v6 = vmax.f32 %v4672_v4, 0.0  ;;  %v5484_v16 = vld [vmem:[%s4018_s3 + $0x30] sm:$0xff]  ;;  %v5487_v19 = vld [vmem:[%s4018_s3 + $0x48] sm:$0xff] }
 0x10c   : > { %6773 = vst [vmem:[#allocation132_spill] sm:$0xff] %v5403_v24  ;;  %6774 = vst [vmem:[#allocation133_spill] sm:$0xff] %v5406_v10  ;;  %v5459_v24 = vld [vmem:[%s4018_s3 + $0x28] sm:$0xff]  ;;  %v5462_v10 = vld [vmem:[%s4018_s3 + $0x38] sm:$0xff]  ;;  %v3195_v2 = vpack.c.bf16 %v6786_v1, %v6785_v0  ;;  %v6793_v0 = vmax.f32 %v4697_v42, 0.0  ;;  %v6796_v1 = vmax.f32 %v4747_v46, 0.0 }
 0x10d   : > { %6779 = vst [vmem:[#allocation134_spill] sm:$0xff] %v5426_v57  ;;  %6780 = vst [vmem:[#allocation135_spill] sm:$0xff] %v5429_v53  ;;  %v3163_v12 = vpack.c.bf16 %v6784_v21, %v6783_v7  ;;  %v6787_v7 = vmax.f32 %v4616_v62, 0.0  ;;  %v6788_v21 = vmax.f32 %v4634_v22, 0.0  ;;  %v6790_v53 = vmax.f32 %v4694_v36, 0.0  ;;  %1230 = vmatprep.mubr.f32.mxu0 %v5459_v24  ;;  %v5494_v36 = vld [vmem:[%s4018_s3 + $0x58] sm:$0xff] }
 0x10e   : > { %6782 = vst [vmem:[#allocation136_spill] sm:$0xff] %v5436_v32  ;;  %1371 = vmatmul.mubr.f32.vlgmr.msra.gmra.mrb[32].mxu1 %v5456_v37  ;;  %v5479_v32 = vld [vmem:[%s4018_s3 + $0x20] sm:$0xff]  ;;  %v6791_v62 = vmax.f32 %v4643_v5, 0.0  ;;  %v6792_v22 = vmax.f32 %v4646_v17, 0.0  ;;  %v6797_v5 = vmax.f32 %v4806_v14, 0.0  ;;  %v6798_v17 = vmax.f32 %v4821_v55, 0.0 }
 0x10f   : > { %v3165_v11 = vpack.c.bf16 %v6788_v21, %v6787_v7  ;;  %v3197_v57 = vpack.c.bf16 %v6790_v53, %v6789_v6  ;;  %3164 = vmatpush3.bf16.msra.mxu0 %v3163_v12  ;;  %1375 = vmatprep.mubr.f32.mxu1 %v5462_v10  ;;  %v6794_v12 = vmax.f32 %v4728_v25, 0.0  ;;  %v6795_v6 = vmax.f32 %v4744_v51, 0.0  ;;  %v5512_v42 = vld [vmem:[%s4018_s3 + $0x40] sm:$0xff]  ;;  %v5516_v25 = vld [vmem:[%s4018_s3 + $0x50] sm:$0xff]  ;;  %v5519_v51 = vld [vmem:[%s4018_s3 + $0x68] sm:$0xff] }
 0x110   : > { %v3167_v4 = vpack.c.bf16 %v6792_v22, %v6791_v62  ;;  %3196 = vmatpush3.bf16.msra.mxu1 %v3195_v2  ;;  %1231 = vmatmul.mubr.f32.gmra.mrb[34].mxu0 %v5479_v32  ;;  %v3201_v2 = vpack.c.bf16 %v6798_v17, %v6797_v5  ;;  %v6799_v46 = vmax.f32 %v4793_v35, 0.0  ;;  %v6800_v14 = vmax.f32 %v4796_v23, 0.0 }
 0x111   : > { %3166 = vmatprep.subr.bf16.mxu0 %v3165_v11  ;;  %v3199_v53 = vpack.c.bf16 %v6794_v12, %v6793_v0  ;;  %v3169_v7 = vpack.c.bf16 %v6796_v1, %v6795_v6  ;;  %3198 = vmatprep.subr.bf16.mxu1 %v3197_v57  ;;  %v5526_v11 = vld [vmem:[%s4018_s3 + $0x78] sm:$0xff]  ;;  %v6801_v57 = vmax.f32 %v4824_v39, 0.0  ;;  %v6802_v21 = vmax.f32 %v4848_v30, 0.0  ;;  %v5544_v39 = vld [vmem:[%s4018_s3 + $0x60] sm:$0xff]  ;;  %v5548_v30 = vld [vmem:[%s4018_s3 + $0x70] sm:$0xff] }
 0x112   : > { %1376 = vmatmul.mubr.f32.gmra.mrb[34].mxu1 %v5484_v16  ;;  %1235 = vmatprep.mubr.f32.mxu0 %v5487_v19  ;;  %v3171_v55 = vpack.c.bf16 %v6800_v14, %v6799_v46  ;;  %v6803_v22 = vmax.f32 %v4879_v26, 0.0  ;;  %v6805_v23 = vmax.f32 %v4920_v3, 0.0  ;;  %v6806_v35 = vmax.f32 %v4923_v59, 0.0  ;;  %v5551_v26 = vld [vmem:[%s4018_s3 + $0x88] sm:$0xff]  ;;  %v5590_v14 = vld [vmem:[%s4018_s3 + $0xb8] sm:$0xff] }
 0x113   : > { %1380 = vmatprep.mubr.f32.mxu1 %v5494_v36  ;;  %3168 = vmatpush3.bf16.msra.mxu0 %v3167_v4  ;;  %v3203_v62 = vpack.c.bf16 %v6802_v21, %v6801_v57  ;;  %v6804_v4 = vmax.f32 %v4901_v48, 0.0  ;;  %v6807_v48 = vmax.f32 %v4904_v34, 0.0  ;;  %v6808_v3 = vmax.f32 %v4907_v9, 0.0 }
 0x114   : > { %3200 = vmatpush3.bf16.msra.mxu1 %v3199_v53  ;;  %3170 = vmatprep.subr.bf16.mxu0 %v3169_v7  ;;  %v3205_v12 = vpack.c.bf16 %v6806_v35, %v6805_v23  ;;  %v5558_v53 = vld [vmem:[%s4018_s3 + $0x98] sm:$0xff]  ;;  %v6809_v6 = vmax.f32 %v4940_v29, 0.0  ;;  %v6810_v1 = vmax.f32 %v4943_v52, 0.0  ;;  %v6811_v5 = vmax.f32 %v4946_v44, 0.0  ;;  %v5576_v29 = vld [vmem:[%s4018_s3 + $0x80] sm:$0xff]  ;;  %v5580_v44 = vld [vmem:[%s4018_s3 + $0x90] sm:$0xff] }
 0x115   : > { %v3173_v0 = vpack.c.bf16 %v6804_v4, %v6803_v22  ;;  %1236 = vmatmul.mubr.f32.gmra.mrb[36].mxu0 %v5512_v42  ;;  %3202 = vmatprep.subr.bf16.mxu1 %v3201_v2  ;;  %v3175_v59 = vpack.c.bf16 %v6808_v3, %v6807_v48  ;;  %v6812_v17 = vmax.f32 %v4963_v45, 0.0  ;;  %v6813_v34 = vmax.f32 %v4998_v50, 0.0  ;;  %v5583_v45 = vld [vmem:[%s4018_s3 + $0xa8] sm:$0xff]  ;;  %v6827_v48 = vld [vmem:[#allocation74_spill] sm:$0xff] }
 0x116   : > { %1381 = vmatmul.mubr.f32.gmra.mrb[36].mxu1 %v5516_v25  ;;  %1240 = vmatprep.mubr.f32.mxu0 %v5519_v51  ;;  %v3207_v7 = vpack.c.bf16 %v6810_v1, %v6809_v6  ;;  %v6814_v9 = vmax.f32 %v5001_v13, 0.0  ;;  %v6815_v52 = vmax.f32 %v4977_v49, 0.0  ;;  %v6816_v13 = vmax.f32 %v4980_v43, 0.0 }
 0x117   : > { %1385 = vmatprep.mubr.f32.mxu1 %v5526_v11  ;;  %3172 = vmatpush3.bf16.msra.mxu0 %v3171_v55  ;;  %v3177_v2 = vpack.c.bf16 %v6812_v17, %v6811_v5  ;;  %v6817_v55 = vmax.f32 %v5004_v31, 0.0  ;;  %v6818_v57 = vmax.f32 %v5014_v63, 0.0  ;;  %v6820_v22 = vmax.f32 %v5020_v41, 0.0  ;;  %v5608_v31 = vld [vmem:[%s4018_s3 + $0xa0] sm:$0xff]  ;;  %v5615_v41 = vld [vmem:[%s4018_s3 + $0xc8] sm:$0xff] }
 0x118   : > { %3204 = vmatpush3.bf16.msra.mxu1 %v3203_v62  ;;  %3174 = vmatprep.subr.bf16.mxu0 %v3173_v0  ;;  %v3209_v46 = vpack.c.bf16 %v6814_v9, %v6813_v34  ;;  %v3179_v50 = vpack.c.bf16 %v6816_v13, %v6815_v52  ;;  %v6819_v62 = vmax.f32 %v5017_v15, 0.0  ;;  %v6821_v43 = vmax.f32 %v5046_v18, 0.0  ;;  %v5612_v15 = vld [vmem:[%s4018_s3 + $0xb0] sm:$0xff]  ;;  %v6823_v18 = vld [vmem:[#allocation69_spill] sm:$0xff]  ;;  %v5640_v52 = vld [vmem:[%s4018_s3 + $0xc0] sm:$0xff] }
 0x119   : > { %1241 = vmatmul.mubr.f32.gmra.mrb[38].mxu0 %v5544_v39  ;;  %3206 = vmatprep.subr.bf16.mxu1 %v3205_v12  ;;  %v3211_v21 = vpack.c.bf16 %v6818_v57, %v6817_v55  ;;  %v6822_v49 = vmax.f32 %v5060_v54, 0.0  ;;  %v6824_v63 = vmax.f32 %v6823_v18, 0.0  ;;  %v6825_v54 = vld [vmem:[#allocation70_spill] sm:$0xff]  ;;  %v5622_v12 = vld [vmem:[%s4018_s3 + $0xd8] sm:$0xff]  ;;  %v6828_v3 = vmax.f32 %v6827_v48, 0.0  ;;  %v6832_v17 = vld [vmem:[#allocation101_spill] sm:$0xff] }
 0x11a   : > { %1386 = vmatmul.mubr.f32.gmra.mrb[38].mxu1 %v5548_v30  ;;  %1245 = vmatprep.mubr.f32.mxu0 %v5551_v26  ;;  %v3181_v4 = vpack.c.bf16 %v6820_v22, %v6819_v62  ;;  %v6826_v23 = vmax.f32 %v6825_v54, 0.0  ;;  %v6830_v1 = vmax.f32 %v5177_v8, 0.0  ;;  %v6834_v34 = vld [vmem:[#allocation102_spill] sm:$0xff]  ;;  %v6836_v8 = vld [vmem:[#allocation96_spill] sm:$0xff]  ;;  %v6840_v62 = vld [vmem:[#allocation103_spill] sm:$0xff] }
 0x11b   : > { %1390 = vmatprep.mubr.f32.mxu1 %v5558_v53  ;;  %3176 = vmatpush3.bf16.msra.mxu0 %v3175_v59  ;;  %v3213_v0 = vpack.c.bf16 %v6822_v49, %v6821_v43  ;;  %v6829_v59 = vmax.f32 %v5093_v61, 0.0  ;;  %v6835_v9 = vmax.f32 %v6834_v34, 0.0  ;;  %v5644_v61 = vld [vmem:[%s4018_s3 + $0xd0] sm:$0xff]  ;;  %v6837_v13 = vmax.f32 %v6836_v8, 0.0  ;;  %v6846_v54 = vld [vmem:[#allocation124_spill] sm:$0xff] }
 0x11c   : > { %3208 = vmatpush3.bf16.msra.mxu1 %v3207_v7  ;;  %3178 = vmatprep.subr.bf16.mxu0 %v3177_v2  ;;  %v3183_v35 = vpack.c.bf16 %v6826_v23, %v6824_v63  ;;  %v6831_v7 = vmax.f32 %v5198_v27, 0.0  ;;  %v6833_v2 = vmax.f32 %v6832_v17, 0.0  ;;  %v5647_v27 = vld [vmem:[%s4018_s3 + $0xe8] sm:$0xff]  ;;  %v6841_v22 = vmax.f32 %v6840_v62, 0.0  ;;  %v5696_v8 = vld [vmem:[%s4018_s3 + $0x100] sm:$0xff]  ;;  %v6859_v62 = vld [vmem:[#allocation46_spill] sm:$0xff] }
 0x11d   : > { %1246 = vmatmul.mubr.f32.gmra.mrb[40].mxu0 %v5576_v29  ;;  %3210 = vmatprep.subr.bf16.mxu1 %v3209_v46  ;;  %v3215_v6 = vpack.c.bf16 %v6829_v59, %v6828_v3  ;;  %v6843_v49 = vmax.f32 %v5323_v40, 0.0  ;;  %v6847_v23 = vmax.f32 %v6846_v54, 0.0  ;;  %v5676_v40 = vld [vmem:[%s4018_s3 + $0xf0] sm:$0xff]  ;;  %v5679_v59 = vld [vmem:[%s4018_s3 + $0x108] sm:$0xff]  ;;  %v6854_v34 = vmax.f32 %v5355_v33, 0.0 }
 0x11e   : > { %1391 = vmatmul.mubr.f32.gmra.mrb[40].mxu1 %v5580_v44  ;;  %1250 = vmatprep.mubr.f32.mxu0 %v5583_v45  ;;  %v3185_v5 = vpack.c.bf16 %v6831_v7, %v6830_v1  ;;  %v3217_v46 = vpack.c.bf16 %v6835_v9, %v6833_v2  ;;  %v6852_v7 = vld [vmem:[#allocation123_spill] sm:$0xff]  ;;  %v6855_v9 = vmax.f32 %v5367_v47, 0.0  ;;  %v5703_v33 = vld [vmem:[%s4018_s3 + $0x128] sm:$0xff]  ;;  %v5738_v54 = vld [vmem:[%s4018_s3 + $0x150] sm:$0xff] }
 0x11f   : > { %1395 = vmatprep.mubr.f32.mxu1 %v5590_v14  ;;  %3180 = vmatpush3.bf16.msra.mxu0 %v3179_v50  ;;  %v6838_v50 = vld [vmem:[#allocation97_spill] sm:$0xff]  ;;  %v5686_v2 = vld [vmem:[%s4018_s3 + $0x118] sm:$0xff] }
 0x120   : > { %3212 = vmatpush3.bf16.msra.mxu1 %v3211_v21  ;;  %3182 = vmatprep.subr.bf16.mxu0 %v3181_v4  ;;  %v6839_v55 = vmax.f32 %v6838_v50, 0.0  ;;  %v5654_v21 = vld [vmem:[%s4018_s3 + $0xf8] sm:$0xff]  ;;  %v6842_v4 = vmax.f32 %v5251_v60, 0.0  ;;  %v5672_v60 = vld [vmem:[%s4018_s3 + $0xe0] sm:$0xff]  ;;  %v6856_v50 = vld [vmem:[#allocation42_spill] sm:$0xff] }
 0x121   : > { %1251 = vmatmul.mubr.f32.gmra.mrb[42].mxu0 %v5608_v31  ;;  %3214 = vmatprep.subr.bf16.mxu1 %v3213_v0  ;;  %v6844_v0 = vld [vmem:[#allocation121_spill] sm:$0xff]  ;;  %v5706_v47 = vld [vmem:[%s4018_s3 + $0x138] sm:$0xff] }
 0x122   : > { %1396 = vmatmul.mubr.f32.gmra.mrb[42].mxu1 %v5612_v15  ;;  %1255 = vmatprep.mubr.f32.mxu0 %v5615_v41  ;;  %v3187_v57 = vpack.c.bf16 %v6839_v55, %v6837_v13  ;;  %v3219_v43 = vpack.c.bf16 %v6842_v4, %v6841_v22  ;;  %v6845_v18 = vmax.f32 %v6844_v0, 0.0  ;;  %v5700_v13 = vld [vmem:[%s4018_s3 + $0x110] sm:$0xff]  ;;  %v6857_v55 = vld [vmem:[#allocation41_spill] sm:$0xff] }
 0x123   : > { %1400 = vmatprep.mubr.f32.mxu1 %v5622_v12  ;;  %3184 = vmatpush3.bf16.msra.mxu0 %v3183_v35  ;;  %v6848_v35 = vld [vmem:[#allocation125_spill] sm:$0xff] }
 0x124   : > { %3216 = vmatpush3.bf16.msra.mxu1 %v3215_v6  ;;  %3186 = vmatprep.subr.bf16.mxu0 %v3185_v5  ;;  %v3189_v63 = vpack.c.bf16 %v6845_v18, %v6843_v49  ;;  %v6849_v48 = vmax.f32 %v6848_v35, 0.0  ;;  %v6850_v6 = vld [vmem:[#allocation122_spill] sm:$0xff]  ;;  %v6853_v5 = vmax.f32 %v6852_v7, 0.0  ;;  %v6860_v22 = vld [vmem:[#allocation45_spill] sm:$0xff]  ;;  %v5728_v18 = vld [vmem:[%s4018_s3 + $0x158] sm:$0xff] }
 0x125   : > { %1256 = vmatmul.mubr.f32.gmra.mrb[44].mxu0 %v5640_v52  ;;  %3218 = vmatprep.subr.bf16.mxu1 %v3217_v46  ;;  %v6851_v1 = vmax.f32 %v6850_v6, 0.0  ;;  %v3223_v46 = vpack.c.bf16 %v6855_v9, %v6854_v34  ;;  %v6861_v4 = vpack.c.bf16 %v6859_v62, %v6860_v22  ;;  %v5722_v49 = vld [vmem:[%s4018_s3 + $0x130] sm:$0xff]  ;;  %v5725_v0 = vld [vmem:[%s4018_s3 + $0x148] sm:$0xff]  ;;  %v5744_v35 = vld [vmem:[%s4018_s3 + $0x178] sm:$0xff] }
 0x126   : > { %v3221_v3 = vpack.c.bf16 %v6849_v48, %v6847_v23  ;;  %1401 = vmatmul.mubr.f32.gmra.mrb[44].mxu1 %v5644_v61  ;;  %1260 = vmatprep.mubr.f32.mxu0 %v5647_v27  ;;  %v5741_v23 = vld [vmem:[%s4018_s3 + $0x168] sm:$0xff]  ;;  %v5750_v48 = vld [vmem:[%s4018_s3 + $0x160] sm:$0xff]  ;;  %v5776_v34 = vld [vmem:[%s4018_s3 + $0x1b8] sm:$0xff] }
 0x127   : > { %1405 = vmatprep.mubr.f32.mxu1 %v5654_v21  ;;  %3188 = vmatpush3.bf16.msra.mxu0 %v3187_v57  ;;  %v3191_v17 = vpack.c.bf16 %v6853_v5, %v6851_v1  ;;  %v6858_v57 = vpack.c.bf16 %v6856_v50, %v6857_v55  ;;  %v5757_v6 = vld [vmem:[%s4018_s3 + $0x188] sm:$0xff]  ;;  %v5760_v1 = vld [vmem:[%s4018_s3 + $0x198] sm:$0xff]  ;;  %v5766_v7 = vld [vmem:[%s4018_s3 + $0x180] sm:$0xff]  ;;  %6868 = vst [vmem:[#allocation97_spill] sm:$0xff] %v5776_v34 }
 0x128   : > { %3220 = vmatpush3.bf16.msra.mxu1 %v3219_v43  ;;  %3190 = vmatprep.subr.bf16.mxu0 %v3189_v63  ;;  %v5718_v43 = vld [vmem:[%s4018_s3 + $0x120] sm:$0xff]  ;;  %6863 = vst [vmem:[#allocation70_spill] sm:$0xff] %v5757_v6  ;;  %6864 = vst [vmem:[#allocation74_spill] sm:$0xff] %v5760_v1  ;;  %v5770_v5 = vld [vmem:[%s4018_s3 + $0x190] sm:$0xff] }
 0x129   : > { %1261 = vmatmul.mubr.f32.gmra.mrb[46].mxu0 %v5672_v60  ;;  %3222 = vmatprep.subr.bf16.mxu1 %v3221_v3  ;;  %v5734_v63 = vld [vmem:[%s4018_s3 + $0x140] sm:$0xff]  ;;  %v5754_v3 = vld [vmem:[%s4018_s3 + $0x170] sm:$0xff]  ;;  %6865 = vst [vmem:[#allocation101_spill] sm:$0xff] %v5766_v7  ;;  %6866 = vst [vmem:[#allocation102_spill] sm:$0xff] %v5770_v5 }
 0x12a   : > { %1406 = vmatmul.mubr.f32.gmra.mrb[46].mxu1 %v5676_v40  ;;  %1265 = vmatprep.mubr.f32.mxu0 %v5679_v59  ;;  %6862 = vst [vmem:[#allocation69_spill] sm:$0xff] %v5754_v3  ;;  %v5782_v9 = vld [vmem:[%s4018_s3 + $0x1a0] sm:$0xff]  ;;  %v5789_v50 = vld [vmem:[%s4018_s3 + $0x1c8] sm:$0xff]  ;;  %v5792_v55 = vld [vmem:[%s4018_s3 + $0x1d8] sm:$0xff] }
 0x12b   : > { %1410 = vmatprep.mubr.f32.mxu1 %v5686_v2  ;;  %3192 = vmatpush3.bf16.msra.mxu0 %v3191_v17  ;;  %v5773_v17 = vld [vmem:[%s4018_s3 + $0x1a8] sm:$0xff]  ;;  %6869 = vst [vmem:[#allocation103_spill] sm:$0xff] %v5782_v9  ;;  %6871 = vst [vmem:[#allocation124_spill] sm:$0xff] %v5789_v50  ;;  %v5802_v62 = vld [vmem:[%s4018_s3 + $0x1d0] sm:$0xff] }
 0x12c   : > { %3224 = vmatpush3.bf16.msra.mxu1 %v3223_v46  ;;  %3226 = vmatprep.subr.bf16.mxu0 %v6858_v57  ;;  %6867 = vst [vmem:[#allocation96_spill] sm:$0xff] %v5773_v17  ;;  %v5786_v46 = vld [vmem:[%s4018_s3 + $0x1b0] sm:$0xff]  ;;  %6872 = vst [vmem:[#allocation125_spill] sm:$0xff] %v5792_v55  ;;  %v5798_v57 = vld [vmem:[%s4018_s3 + $0x1c0] sm:$0xff] }
 0x12d   : > { %1266 = vmatmul.mubr.f32.gmra.mrb[48].mxu0 %v5696_v8  ;;  %3258 = vmatprep.subr.bf16.mxu1 %v6861_v4  ;;  %6870 = vst [vmem:[#allocation121_spill] sm:$0xff] %v5786_v46  ;;  %6873 = vst [vmem:[#allocation122_spill] sm:$0xff] %v5798_v57  ;;  %v5805_v22 = vld [vmem:[%s4018_s3 + $0x1e8] sm:$0xff]  ;;  %v5808_v4 = vld [vmem:[%s4018_s3 + $0x1f8] sm:$0xff] }
 0x12e   : > { %1411 = vmatmul.mubr.f32.gmra.mrb[48].mxu1 %v5700_v13  ;;  %1270 = vmatprep.mubr.f32.mxu0 %v5703_v33  ;;  %6874 = vst [vmem:[#allocation123_spill] sm:$0xff] %v5802_v62  ;;  %6875 = vst [vmem:[#allocation42_spill] sm:$0xff] %v5805_v22 }
 0x12f   : > { %1415 = vmatprep.mubr.f32.mxu1 %v5706_v47  ;;  %6876 = vst [vmem:[#allocation41_spill] sm:$0xff] %v5808_v4 }
 0x131   : > { %1271 = vmatmul.mubr.f32.gmra.mrb[50].mxu0 %v5718_v43 }
 0x132   : > { %1416 = vmatmul.mubr.f32.gmra.mrb[50].mxu1 %v5722_v49  ;;  %1275 = vmatprep.mubr.f32.mxu0 %v5725_v0 }
 0x133   : > { %1420 = vmatprep.mubr.f32.mxu1 %v5728_v18 }
 0x135   : > { %1276 = vmatmul.mubr.f32.gmra.mrb[52].mxu0 %v5734_v63 }
 0x136   : > { %1421 = vmatmul.mubr.f32.gmra.mrb[52].mxu1 %v5738_v54  ;;  %1280 = vmatprep.mubr.f32.mxu0 %v5741_v23 }
 0x137   : > { %1425 = vmatprep.mubr.f32.mxu1 %v5744_v35 }
 0x139   : > { %1281 = vmatmul.mubr.f32.gmra.mrb[54].mxu0 %v5750_v48 }
 0x13a   : > { %1426 = vmatmul.mubr.f32.gmra.mrb[54].mxu1 %v5754_v3  ;;  %1285 = vmatprep.mubr.f32.mxu0 %v5757_v6  ;;  %v6889_v6 = vld [vmem:[#allocation28_spill] sm:$0xff] }
 0x13b   : > { %1430 = vmatprep.mubr.f32.mxu1 %v5760_v1 }
 0x13d   : > { %1286 = vmatmul.mubr.f32.gmra.mrb[56].mxu0 %v5766_v7  ;;  %v6886_v7 = vld [vmem:[#allocation24_spill] sm:$0xff] }
 0x13e   : > { %1431 = vmatmul.mubr.f32.gmra.mrb[56].mxu1 %v5770_v5  ;;  %1290 = vmatprep.mubr.f32.mxu0 %v5773_v17  ;;  %v3449_v17 = vld [vmem:[%s4025_s14 + $0x28] sm:$0xff] }
 0x13f   : > { %1435 = vmatprep.mubr.f32.mxu1 %v5776_v34 }
 0x141   : > { %1291 = vmatmul.mubr.f32.gmra.mrb[58].mxu0 %v5782_v9  ;;  %v6879_v9 = vld [vmem:[#allocation44_spill] sm:$0xff] }
 0x142   : > { %1436 = vmatmul.mubr.f32.gmra.mrb[58].mxu1 %v5786_v46  ;;  %1295 = vmatprep.mubr.f32.mxu0 %v5789_v50  ;;  %v5814_v50 = vld [vmem:[%s4018_s3 + $0x1e0] sm:$0xff]  ;;  %v3445_v46 = vld [vmem:[%s4025_s14 + $0x8] sm:$0xff] }
 0x143   : > { %1440 = vmatprep.mubr.f32.mxu1 %v5792_v55  ;;  %6877 = vst [vmem:[#allocation46_spill] sm:$0xff] %v5814_v50  ;;  %v5818_v55 = vld [vmem:[%s4018_s3 + $0x1f0] sm:$0xff] }
 0x144   : > { %6878 = vst [vmem:[#allocation45_spill] sm:$0xff] %v5818_v55 }
 0x145   : > { %1296 = vmatmul.mubr.f32.gmra.mrb[60].mxu0 %v5798_v57  ;;  %v3446_v57 = vld [vmem:[%s4025_s14 + $0x18] sm:$0xff] }
 0x146   : > { %1441 = vmatmul.mubr.f32.gmra.mrb[60].mxu1 %v5802_v62  ;;  %1300 = vmatprep.mubr.f32.mxu0 %v5805_v22  ;;  %v3447_v62 = vld [vmem:[%s4025_s14] sm:$0xff]  ;;  %v3448_v22 = vld [vmem:[%s4025_s14 + $0x10] sm:$0xff] }
 0x147   : > { %1445 = vmatprep.mubr.f32.mxu1 %v5808_v4  ;;  %v6880_v4 = vld [vmem:[#allocation43_spill] sm:$0xff] }
 0x148   : > { %v6881_v34 = vpack.c.bf16 %v6879_v9, %v6880_v4 }
 0x149   : > { %1301 = vmatmul.mubr.f32.gmra.mrb[62].mxu0 %v5814_v50  ;;  %v3450_v50 = vld [vmem:[%s4025_s14 + $0x38] sm:$0xff] }
 0x14a   : > { %1446 = vmatmul.mubr.f32.gmra.mrb[62].mxu1 %v5818_v55  ;;  %1564 = vmatprep.mubr.f32.mxu0 %v3445_v46  ;;  %v6882_v55 = vld [vmem:[#allocation48_spill] sm:$0xff]  ;;  %v6883_v46 = vld [vmem:[#allocation47_spill] sm:$0xff] }
 0x14b   : > { %1709 = vmatprep.mubr.f32.mxu1 %v3446_v57  ;;  %v6884_v5 = vpack.c.bf16 %v6882_v55, %v6883_v46  ;;  %v6885_v57 = vld [vmem:[#allocation25_spill] sm:$0xff]  ;;  %v6892_v55 = vld [vmem:[#allocation26_spill] sm:$0xff] }
 0x14c   : > { %v6887_v1 = vpack.c.bf16 %v6885_v57, %v6886_v7  ;;  %v6895_v7 = vld [vmem:[#allocation32_spill] sm:$0xff]  ;;  %v6897_v57 = vld [vmem:[#allocation37_spill] sm:$0xff] }
 0x14d   : > { %1565 = vmatmul.mubr.f32.vlgmr.msra.gmra.mrb[64].mxu0 %v3447_v62  ;;  %v3451_v62 = vld [vmem:[%s4025_s14 + $0x20] sm:$0xff] }
 0x14e   : > { %1710 = vmatmul.mubr.f32.vlgmr.msra.gmra.mrb[64].mxu1 %v3448_v22  ;;  %3228 = vmatpush3.bf16.msra.mxu0 %v6881_v34  ;;  %v6888_v22 = vld [vmem:[#allocation31_spill] sm:$0xff]  ;;  %v3453_v34 = vld [vmem:[%s4025_s14 + $0x48] sm:$0xff] }
 0x14f   : > { %1569 = vmatprep.mubr.f32.mxu0 %v3449_v17  ;;  %1714 = vmatprep.mubr.f32.mxu1 %v3450_v50  ;;  %v6890_v9 = vpack.c.bf16 %v6888_v22, %v6889_v6  ;;  %v3452_v17 = vld [vmem:[%s4025_s14 + $0x30] sm:$0xff]  ;;  %v3454_v50 = vld [vmem:[%s4025_s14 + $0x58] sm:$0xff]  ;;  %v6898_v6 = vld [vmem:[#allocation36_spill] sm:$0xff] }
 0x150   : > { %3260 = vmatpush3.bf16.msra.mxu1 %v6884_v5  ;;  %3230 = vmatprep.subr.bf16.mxu0 %v6887_v1  ;;  %v6891_v5 = vld [vmem:[#allocation27_spill] sm:$0xff]  ;;  %v3455_v22 = vld [vmem:[%s4025_s14 + $0x40] sm:$0xff] }
 0x151   : > { %1570 = vmatmul.mubr.f32.gmra.mrb[66].mxu0 %v3451_v62  ;;  %3262 = vmatprep.subr.bf16.mxu1 %v6890_v9  ;;  %v6893_v4 = vpack.c.bf16 %v6891_v5, %v6892_v55  ;;  %v6894_v1 = vld [vmem:[#allocation35_spill] sm:$0xff]  ;;  %v6899_v62 = vpack.c.bf16 %v6897_v57, %v6898_v6  ;;  %v6900_v9 = vld [vmem:[#allocation56_spill] sm:$0xff]  ;;  %v3457_v5 = vld [vmem:[%s4025_s14 + $0x68] sm:$0xff] }
 0x152   : > { %1715 = vmatmul.mubr.f32.gmra.mrb[66].mxu1 %v3452_v17  ;;  %1574 = vmatprep.mubr.f32.mxu0 %v3453_v34  ;;  %v6896_v46 = vpack.c.bf16 %v6894_v1, %v6895_v7  ;;  %v6901_v17 = vld [vmem:[#allocation54_spill] sm:$0xff]  ;;  %v3458_v55 = vld [vmem:[%s4025_s14 + $0x78] sm:$0xff]  ;;  %v6907_v57 = vld [vmem:[#allocation57_spill] sm:$0xff] }
 0x153   : > { %1719 = vmatprep.mubr.f32.mxu1 %v3454_v50  ;;  %3232 = vmatpush3.bf16.msra.mxu0 %v6893_v4  ;;  %v6902_v34 = vpack.c.bf16 %v6900_v9, %v6901_v17  ;;  %v3456_v50 = vld [vmem:[%s4025_s14 + $0x50] sm:$0xff]  ;;  %v6903_v4 = vld [vmem:[#allocation52_spill] sm:$0xff]  ;;  %v6904_v1 = vld [vmem:[#allocation51_spill] sm:$0xff] }
 0x154   : > { %3264 = vmatpush3.bf16.msra.mxu1 %v6896_v46  ;;  %3234 = vmatprep.subr.bf16.mxu0 %v6899_v62  ;;  %v6905_v7 = vpack.c.bf16 %v6903_v4, %v6904_v1  ;;  %v6906_v46 = vld [vmem:[#allocation58_spill] sm:$0xff]  ;;  %v6909_v62 = vld [vmem:[#allocation65_spill] sm:$0xff]  ;;  %v3459_v17 = vld [vmem:[%s4025_s14 + $0x60] sm:$0xff] }
 0x155   : > { %1575 = vmatmul.mubr.f32.gmra.mrb[68].mxu0 %v3455_v22  ;;  %3266 = vmatprep.subr.bf16.mxu1 %v6902_v34  ;;  %v6908_v6 = vpack.c.bf16 %v6906_v46, %v6907_v57  ;;  %v6910_v22 = vld [vmem:[#allocation63_spill] sm:$0xff]  ;;  %v3461_v4 = vld [vmem:[%s4025_s14 + $0x88] sm:$0xff]  ;;  %v6916_v46 = vld [vmem:[#allocation66_spill] sm:$0xff] }
 0x156   : > { %1720 = vmatmul.mubr.f32.gmra.mrb[68].mxu1 %v3456_v50  ;;  %1579 = vmatprep.mubr.f32.mxu0 %v3457_v5  ;;  %v6911_v9 = vpack.c.bf16 %v6909_v62, %v6910_v22  ;;  %v6912_v34 = vld [vmem:[#allocation71_spill] sm:$0xff]  ;;  %v6913_v50 = vld [vmem:[#allocation68_spill] sm:$0xff] }
 0x157   : > { %1724 = vmatprep.mubr.f32.mxu1 %v3458_v55  ;;  %3236 = vmatpush3.bf16.msra.mxu0 %v6905_v7  ;;  %v6914_v5 = vpack.c.bf16 %v6912_v34, %v6913_v50  ;;  %v3460_v55 = vld [vmem:[%s4025_s14 + $0x70] sm:$0xff]  ;;  %v3462_v1 = vld [vmem:[%s4025_s14 + $0x98] sm:$0xff]  ;;  %v3463_v50 = vld [vmem:[%s4025_s14 + $0x80] sm:$0xff] }
 0x158   : > { %3268 = vmatpush3.bf16.msra.mxu1 %v6908_v6  ;;  %3238 = vmatprep.subr.bf16.mxu0 %v6911_v9  ;;  %v6915_v7 = vld [vmem:[#allocation67_spill] sm:$0xff]  ;;  %v6918_v6 = vld [vmem:[#allocation78_spill] sm:$0xff]  ;;  %v6921_v9 = vld [vmem:[#allocation80_spill] sm:$0xff] }
 0x159   : > { %1580 = vmatmul.mubr.f32.gmra.mrb[70].mxu0 %v3459_v17  ;;  %3270 = vmatprep.subr.bf16.mxu1 %v6914_v5  ;;  %v6917_v57 = vpack.c.bf16 %v6915_v7, %v6916_v46  ;;  %v6919_v62 = vld [vmem:[#allocation75_spill] sm:$0xff]  ;;  %v6924_v5 = vld [vmem:[#allocation85_spill] sm:$0xff] }
 0x15a   : > { %1725 = vmatmul.mubr.f32.gmra.mrb[70].mxu1 %v3460_v55  ;;  %1584 = vmatprep.mubr.f32.mxu0 %v3461_v4  ;;  %v6920_v22 = vpack.c.bf16 %v6918_v6, %v6919_v62  ;;  %v6922_v17 = vld [vmem:[#allocation79_spill] sm:$0xff]  ;;  %v3465_v7 = vld [vmem:[%s4025_s14 + $0xa8] sm:$0xff] }
 0x15b   : > { %1729 = vmatprep.mubr.f32.mxu1 %v3462_v1  ;;  %3240 = vmatpush3.bf16.msra.mxu0 %v6917_v57  ;;  %v6923_v34 = vpack.c.bf16 %v6921_v9, %v6922_v17  ;;  %v6925_v55 = vld [vmem:[#allocation83_spill] sm:$0xff]  ;;  %v3464_v1 = vld [vmem:[%s4025_s14 + $0x90] sm:$0xff]  ;;  %v6928_v6 = vld [vmem:[#allocation81_spill] sm:$0xff] }
 0x15c   : > { %3272 = vmatpush3.bf16.msra.mxu1 %v6920_v22  ;;  %v6926_v4 = vpack.c.bf16 %v6924_v5, %v6925_v55  ;;  %v3466_v46 = vld [vmem:[%s4025_s14 + $0xb8] sm:$0xff]  ;;  %v6927_v57 = vld [vmem:[#allocation82_spill] sm:$0xff]  ;;  %v6930_v22 = vld [vmem:[#allocation89_spill] sm:$0xff] }
 0x15d   : > { %3242 = vmatprep.subr.bf16.mxu0 %v6923_v34  ;;  %1585 = vmatmul.mubr.f32.gmra.mrb[72].mxu0 %v3463_v50  ;;  %v6929_v62 = vpack.c.bf16 %v6927_v57, %v6928_v6  ;;  %v6931_v9 = vld [vmem:[#allocation88_spill] sm:$0xff]  ;;  %v6933_v34 = vld [vmem:[#allocation93_spill] sm:$0xff]  ;;  %v6934_v50 = vld [vmem:[#allocation90_spill] sm:$0xff] }
 0x15e   : > { %3274 = vmatprep.subr.bf16.mxu1 %v6926_v4  ;;  %1730 = vmatmul.mubr.f32.gmra.mrb[72].mxu1 %v3464_v1  ;;  %v6932_v17 = vpack.c.bf16 %v6930_v22, %v6931_v9  ;;  %v6935_v5 = vpack.c.bf16 %v6933_v34, %v6934_v50  ;;  %v3467_v55 = vld [vmem:[%s4025_s14 + $0xa0] sm:$0xff]  ;;  %v6936_v4 = vld [vmem:[#allocation99_spill] sm:$0xff]  ;;  %v6937_v1 = vld [vmem:[#allocation98_spill] sm:$0xff] }
 0x15f   : > { %1589 = vmatprep.mubr.f32.mxu0 %v3465_v7  ;;  %1734 = vmatprep.mubr.f32.mxu1 %v3466_v46  ;;  %v6938_v3 = vpack.c.bf16 %v6936_v4, %v6937_v1  ;;  %v3468_v7 = vld [vmem:[%s4025_s14 + $0xb0] sm:$0xff]  ;;  %v3469_v46 = vld [vmem:[%s4025_s14 + $0xc8] sm:$0xff]  ;;  %v3470_v57 = vld [vmem:[%s4025_s14 + $0xd8] sm:$0xff] }
 0x160   : > { %3244 = vmatpush3.bf16.msra.mxu0 %v6929_v62  ;;  %3276 = vmatpush3.bf16.msra.mxu1 %v6932_v17  ;;  %v6939_v6 = vld [vmem:[#allocation95_spill] sm:$0xff]  ;;  %v6940_v62 = vld [vmem:[#allocation94_spill] sm:$0xff]  ;;  %v6942_v9 = vld [vmem:[#allocation104_spill] sm:$0xff] }
 0x161   : > { %3246 = vmatprep.subr.bf16.mxu0 %v6935_v5  ;;  %1590 = vmatmul.mubr.f32.gmra.mrb[74].mxu0 %v3467_v55  ;;  %v6941_v22 = vpack.c.bf16 %v6939_v6, %v6940_v62  ;;  %v6943_v17 = vld [vmem:[#allocation100_spill] sm:$0xff]  ;;  %v6945_v50 = vld [vmem:[#allocation110_spill] sm:$0xff]  ;;  %v6946_v5 = vld [vmem:[#allocation109_spill] sm:$0xff] }
 0x162   : > { %3278 = vmatprep.subr.bf16.mxu1 %v6938_v3  ;;  %1735 = vmatmul.mubr.f32.gmra.mrb[74].mxu1 %v3468_v7  ;;  %v6944_v34 = vpack.c.bf16 %v6942_v9, %v6943_v17  ;;  %v6947_v55 = vpack.c.bf16 %v6945_v50, %v6946_v5  ;;  %v6948_v4 = vld [vmem:[#allocation29_spill] sm:$0xff]  ;;  %v6949_v3 = vld [vmem:[#allocation116_spill] sm:$0xff]  ;;  %v6950_v1 = vld [vmem:[#allocation115_spill] sm:$0xff] }
 0x163   : > { %1594 = vmatprep.mubr.f32.mxu0 %v3469_v46  ;;  %1739 = vmatprep.mubr.f32.mxu1 %v3470_v57  ;;  %v6951_v7 = vpack.c.bf16 %v6949_v3, %v6950_v1  ;;  %v6952_v46 = vld [vmem:[#allocation30_spill] sm:$0xff]  ;;  %v6953_v57 = vld [vmem:[#allocation33_spill] sm:$0xff]  ;;  %v6958_v17 = vld [vmem:[#allocation120_spill] sm:$0xff]  ;;  %v6964_v3 = vpack.c.bf16 %v5421_v56, %v5416_v28 }
 0x164   : > { %3248 = vmatpush3.bf16.msra.mxu0 %v6941_v22  ;;  %3280 = vmatpush3.bf16.msra.mxu1 %v6944_v34  ;;  %v6954_v6 = vld [vmem:[#allocation34_spill] sm:$0xff]  ;;  %v6956_v22 = vld [vmem:[#allocation111_spill] sm:$0xff]  ;;  %v6959_v34 = vld [vmem:[#allocation117_spill] sm:$0xff] }
 0x165   : > { %3250 = vmatprep.subr.bf16.mxu0 %v6947_v55  ;;  %1595 = vmatmul.mubr.f32.gmra.mrb[76].mxu0 %v6948_v4  ;;  %v6955_v62 = vld [vmem:[#allocation114_spill] sm:$0xff]  ;;  %v6960_v50 = vpack.c.bf16 %v6958_v17, %v6959_v34  ;;  %v6965_v1 = vld [vmem:[#allocation49_spill] sm:$0xff]  ;;  %v6975_v56 = vld [vmem:[#allocation55_spill] sm:$0xff] }
 0x166   : > { %3282 = vmatprep.subr.bf16.mxu1 %v6951_v7  ;;  %1740 = vmatmul.mubr.f32.gmra.mrb[76].mxu1 %v6952_v46  ;;  %v6957_v9 = vpack.c.bf16 %v6955_v62, %v6956_v22  ;;  %v6961_v5 = vld [vmem:[#allocation130_spill] sm:$0xff]  ;;  %v6967_v46 = vld [vmem:[#allocation39_spill] sm:$0xff]  ;;  %v6970_v62 = vld [vmem:[#allocation136_spill] sm:$0xff] }
 0x167   : > { %1599 = vmatprep.mubr.f32.mxu0 %v6953_v57  ;;  %1744 = vmatprep.mubr.f32.mxu1 %v6954_v6  ;;  %v6962_v55 = vpack.c.bf16 %v5394_v58, %v6961_v5  ;;  %v6963_v4 = vld [vmem:[#allocation38_spill] sm:$0xff]  ;;  %v6968_v57 = vld [vmem:[#allocation131_spill] sm:$0xff]  ;;  %v6974_v17 = vld [vmem:[#allocation53_spill] sm:$0xff] }
 0x168   : > { %3252 = vmatpush3.bf16.msra.mxu0 %v6957_v9  ;;  %3284 = vmatpush3.bf16.msra.mxu1 %v6960_v50  ;;  %v6966_v7 = vld [vmem:[#allocation50_spill] sm:$0xff]  ;;  %v6969_v6 = vpack.c.bf16 %v5411_v38, %v6968_v57  ;;  %v6973_v9 = vld [vmem:[#allocation40_spill] sm:$0xff]  ;;  %v6976_v28 = vld [vmem:[#allocation59_spill] sm:$0xff] }
 0x169   : > { %3254 = vmatprep.subr.bf16.mxu0 %v6962_v55  ;;  %1600 = vmatmul.mubr.f32.gmra.mrb[78].mxu0 %v6963_v4  ;;  %v6971_v22 = vld [vmem:[#allocation134_spill] sm:$0xff]  ;;  %v6977_v34 = vld [vmem:[#allocation60_spill] sm:$0xff]  ;;  %v6978_v50 = vld [vmem:[#allocation61_spill] sm:$0xff] }
 0x16a   : > { %3286 = vmatprep.subr.bf16.mxu1 %v6964_v3  ;;  %1745 = vmatmul.mubr.f32.gmra.mrb[78].mxu1 %v6965_v1  ;;  %v6972_v58 = vpack.c.bf16 %v6970_v62, %v6971_v22  ;;  %v6979_v5 = vld [vmem:[#allocation62_spill] sm:$0xff]  ;;  %v6980_v38 = vld [vmem:[#allocation64_spill] sm:$0xff]  ;;  %v6982_v4 = vld [vmem:[#allocation73_spill] sm:$0xff] }
 0x16b   : > { %1604 = vmatprep.mubr.f32.mxu0 %v6966_v7  ;;  %1749 = vmatprep.mubr.f32.mxu1 %v6967_v46  ;;  %v6981_v55 = vld [vmem:[#allocation72_spill] sm:$0xff]  ;;  %v6984_v1 = vld [vmem:[#allocation77_spill] sm:$0xff]  ;;  %v6986_v46 = vld [vmem:[#allocation86_spill] sm:$0xff] }
 0x16c   : > { %3256 = vmatpush3.bf16.msra.mxu0 %v6969_v6  ;;  %3288 = vmatpush3.bf16.msra.mxu1 %v6972_v58  ;;  %v6983_v3 = vld [vmem:[#allocation76_spill] sm:$0xff]  ;;  %v6987_v57 = vld [vmem:[#allocation87_spill] sm:$0xff]  ;;  %v6990_v22 = vld [vmem:[#allocation105_spill] sm:$0xff] }
 0x16d   : > { %1605 = vmatmul.mubr.f32.gmra.mrb[80].mxu0 %v6973_v9  ;;  %v6985_v7 = vld [vmem:[#allocation84_spill] sm:$0xff]  ;;  %v6988_v6 = vld [vmem:[#allocation91_spill] sm:$0xff]  ;;  %v6991_v58 = vld [vmem:[#allocation106_spill] sm:$0xff] }
 0x16e   : > { %1750 = vmatmul.mubr.f32.gmra.mrb[80].mxu1 %v6974_v17  ;;  %1609 = vmatprep.mubr.f32.mxu0 %v6975_v56  ;;  %v6989_v62 = vld [vmem:[#allocation92_spill] sm:$0xff]  ;;  %v6992_v9 = vld [vmem:[#allocation107_spill] sm:$0xff] }
 0x16f   : > { %1754 = vmatprep.mubr.f32.mxu1 %v6976_v28  ;;  %v6993_v17 = vld [vmem:[#allocation108_spill] sm:$0xff]  ;;  %v6995_v28 = vld [vmem:[#allocation113_spill] sm:$0xff] }
 0x170   : > { %v6994_v56 = vld [vmem:[#allocation112_spill] sm:$0xff] }
 0x171   : > { %1610 = vmatmul.mubr.f32.gmra.mrb[82].mxu0 %v6977_v34  ;;  %v6996_v34 = vld [vmem:[#allocation118_spill] sm:$0xff] }
 0x172   : > { %1755 = vmatmul.mubr.f32.gmra.mrb[82].mxu1 %v6978_v50  ;;  %1614 = vmatprep.mubr.f32.mxu0 %v6979_v5  ;;  %v6997_v50 = vld [vmem:[#allocation119_spill] sm:$0xff]  ;;  %v6998_v5 = vld [vmem:[#allocation126_spill] sm:$0xff] }
 0x173   : > { %1759 = vmatprep.mubr.f32.mxu1 %v6980_v38  ;;  %v6999_v38 = vld [vmem:[#allocation127_spill] sm:$0xff] }
 0x175   : > { %1615 = vmatmul.mubr.f32.gmra.mrb[84].mxu0 %v6981_v55  ;;  %v7000_v55 = vld [vmem:[#allocation128_spill] sm:$0xff] }
 0x176   : > { %1760 = vmatmul.mubr.f32.gmra.mrb[84].mxu1 %v6982_v4  ;;  %1619 = vmatprep.mubr.f32.mxu0 %v6983_v3  ;;  %v7001_v4 = vld [vmem:[#allocation129_spill] sm:$0xff]  ;;  %v7002_v3 = vld [vmem:[#allocation132_spill] sm:$0xff] }
 0x177   : > { %1764 = vmatprep.mubr.f32.mxu1 %v6984_v1  ;;  %v7003_v1 = vld [vmem:[#allocation133_spill] sm:$0xff] }
 0x179   : > { %1620 = vmatmul.mubr.f32.gmra.mrb[86].mxu0 %v6985_v7  ;;  %v7004_v7 = vld [vmem:[#allocation135_spill] sm:$0xff] }
 0x17a   : > { %1765 = vmatmul.mubr.f32.gmra.mrb[86].mxu1 %v6986_v46  ;;  %1624 = vmatprep.mubr.f32.mxu0 %v6987_v57 }
 0x17b   : > { %1769 = vmatprep.mubr.f32.mxu1 %v6988_v6 }
 0x17d   : > { %1625 = vmatmul.mubr.f32.gmra.mrb[88].mxu0 %v6989_v62 }
 0x17e   : > { %1770 = vmatmul.mubr.f32.gmra.mrb[88].mxu1 %v6990_v22  ;;  %1629 = vmatprep.mubr.f32.mxu0 %v6991_v58 }
 0x17f   : > { %1774 = vmatprep.mubr.f32.mxu1 %v6992_v9 }
 0x181   : > { %1630 = vmatmul.mubr.f32.gmra.mrb[90].mxu0 %v6993_v17  ;;  %v7005_v17 = vld [vmem:[#allocation69_spill] sm:$0xff] }
 0x182   : > { %1775 = vmatmul.mubr.f32.gmra.mrb[90].mxu1 %v6994_v56  ;;  %1634 = vmatprep.mubr.f32.mxu0 %v6995_v28 }
 0x183   : > { %1779 = vmatprep.mubr.f32.mxu1 %v6996_v34 }
 0x185   : > { %1635 = vmatmul.mubr.f32.gmra.mrb[92].mxu0 %v6997_v50  ;;  %v7008_v50 = vld [vmem:[#allocation101_spill] sm:$0xff] }
 0x186   : > { %1780 = vmatmul.mubr.f32.gmra.mrb[92].mxu1 %v6998_v5  ;;  %1639 = vmatprep.mubr.f32.mxu0 %v6999_v38 }
 0x187   : > { %1784 = vmatprep.mubr.f32.mxu1 %v7000_v55  ;;  %v7009_v55 = vld [vmem:[#allocation102_spill] sm:$0xff] }
 0x189   : > { %1640 = vmatmul.mubr.f32.gmra.mrb[94].mxu0 %v7001_v4 }
 0x18a   : > { %1785 = vmatmul.mubr.f32.gmra.mrb[94].mxu1 %v7002_v3  ;;  %1854 = vmatprep.mubr.f32.mxu0 %v7003_v1  ;;  %v7011_v3 = vld [vmem:[#allocation97_spill] sm:$0xff] }
 0x18b   : > { %1999 = vmatprep.mubr.f32.mxu1 %v7004_v7 }
 0x18d   : > { %1855 = vmatmul.mubr.f32.vlgmr.msra.gmra.mrb[96].mxu0 %v5446_v20 }
 0x18e   : > { %2000 = vmatmul.mubr.f32.vlgmr.msra.gmra.mrb[96].mxu1 %v5456_v37  ;;  %1859 = vmatprep.mubr.f32.mxu0 %v5459_v24 }
 0x18f   : > { %2004 = vmatprep.mubr.f32.mxu1 %v5462_v10 }
 0x191   : > { %1860 = vmatmul.mubr.f32.gmra.mrb[98].mxu0 %v5479_v32 }
 0x192   : > { %2005 = vmatmul.mubr.f32.gmra.mrb[98].mxu1 %v5484_v16  ;;  %1864 = vmatprep.mubr.f32.mxu0 %v5487_v19 }
 0x193   : > { %2009 = vmatprep.mubr.f32.mxu1 %v5494_v36 }
 0x195   : > { %1865 = vmatmul.mubr.f32.gmra.mrb[100].mxu0 %v5512_v42  ;;  %v2425_v24 = vpop.f32.mrb[0].mxu0 }
 0x196   : > { %2010 = vmatmul.mubr.f32.gmra.mrb[100].mxu1 %v5516_v25  ;;  %1869 = vmatprep.mubr.f32.mxu0 %v5519_v51  ;;  %v2505_v10 = vpop.f32.mrb[0].mxu1  ;;  %v2426_v37 = vpop.f32.mrb[1].mxu0 }
 0x197   : > { %2014 = vmatprep.mubr.f32.mxu1 %v5526_v11  ;;  %v2427_v32 = vadd.f32 %v2426_v37, %v2425_v24  ;;  %v2506_v20 = vpop.f32.mrb[1].mxu1  ;;  %v7012_v37 = vld [vmem:[#allocation103_spill] sm:$0xff] }
 0x198   : > { %v2507_v16 = vadd.f32 %v2506_v20, %v2505_v10 }
 0x199   : > { %1870 = vmatmul.mubr.f32.gmra.mrb[102].mxu0 %v5544_v39  ;;  %v2428_v19 = vpop.f32.mrb[2].mxu0 }
 0x19a   : > { %2015 = vmatmul.mubr.f32.gmra.mrb[102].mxu1 %v5548_v30  ;;  %1874 = vmatprep.mubr.f32.mxu0 %v5551_v26  ;;  %v6002_v36 = vadd.f32 %v2507_v16, %v2427_v32  ;;  %v2508_v42 = vpop.f32.mrb[2].mxu1  ;;  %v2429_v25 = vpop.f32.mrb[3].mxu0  ;;  %v7013_v16 = vld [vmem:[#allocation121_spill] sm:$0xff] }
 0x19b   : > { %2019 = vmatprep.mubr.f32.mxu1 %v5558_v53  ;;  %v2430_v51 = vadd.f32 %v2429_v25, %v2428_v19  ;;  %v2509_v11 = vpop.f32.mrb[3].mxu1  ;;  %v7014_v19 = vld [vmem:[#allocation124_spill] sm:$0xff]  ;;  %v7015_v25 = vld [vmem:[#allocation125_spill] sm:$0xff] }
 0x19c   : > { %v2510_v39 = vadd.f32 %v2509_v11, %v2508_v42 }
 0x19d   : > { %1875 = vmatmul.mubr.f32.gmra.mrb[104].mxu0 %v5576_v29  ;;  %v2431_v30 = vpop.f32.mrb[4].mxu0 }
 0x19e   : > { %2020 = vmatmul.mubr.f32.gmra.mrb[104].mxu1 %v5580_v44  ;;  %1879 = vmatprep.mubr.f32.mxu0 %v5583_v45  ;;  %v6008_v26 = vadd.f32 %v2510_v39, %v2430_v51  ;;  %v2511_v53 = vpop.f32.mrb[4].mxu1  ;;  %v2432_v29 = vpop.f32.mrb[5].mxu0 }
 0x19f   : > { %2024 = vmatprep.mubr.f32.mxu1 %v5590_v14  ;;  %v2433_v44 = vadd.f32 %v2432_v29, %v2431_v30  ;;  %v2512_v45 = vpop.f32.mrb[5].mxu1 }
 0x1a0   : > { %v2513_v14 = vadd.f32 %v2512_v45, %v2511_v53  ;;  %v7016_v53 = vld [vmem:[#allocation122_spill] sm:$0xff]  ;;  %v7017_v45 = vld [vmem:[#allocation123_spill] sm:$0xff] }
 0x1a1   : > { %1880 = vmatmul.mubr.f32.gmra.mrb[106].mxu0 %v5608_v31  ;;  %v2434_v31 = vpop.f32.mrb[6].mxu0 }
 0x1a2   : > { %2025 = vmatmul.mubr.f32.gmra.mrb[106].mxu1 %v5612_v15  ;;  %1884 = vmatprep.mubr.f32.mxu0 %v5615_v41  ;;  %v6014_v15 = vadd.f32 %v2513_v14, %v2433_v44  ;;  %v2514_v41 = vpop.f32.mrb[6].mxu1  ;;  %v7018_v14 = vld [vmem:[#allocation42_spill] sm:$0xff] }
 0x1a3   : > { %2029 = vmatprep.mubr.f32.mxu1 %v5622_v12  ;;  %v2435_v12 = vpop.f32.mrb[7].mxu0 }
 0x1a5   : > { %1885 = vmatmul.mubr.f32.gmra.mrb[108].mxu0 %v5640_v52  ;;  %v2436_v52 = vadd.f32 %v2435_v12, %v2434_v31 }
 0x1a6   : > { %2030 = vmatmul.mubr.f32.gmra.mrb[108].mxu1 %v5644_v61  ;;  %1889 = vmatprep.mubr.f32.mxu0 %v5647_v27  ;;  %v2515_v61 = vpop.f32.mrb[7].mxu1 }
 0x1a7   : > { %2034 = vmatprep.mubr.f32.mxu1 %v5654_v21  ;;  %v2516_v27 = vadd.f32 %v2515_v61, %v2514_v41  ;;  %v2437_v21 = vpop.f32.mrb[8].mxu0  ;;  %v7019_v41 = vld [vmem:[#allocation41_spill] sm:$0xff] }
 0x1a9   : > { %1890 = vmatmul.mubr.f32.gmra.mrb[110].mxu0 %v5672_v60  ;;  %v6020_v60 = vadd.f32 %v2516_v27, %v2436_v52 }
 0x1aa   : > { %2035 = vmatmul.mubr.f32.gmra.mrb[110].mxu1 %v5676_v40  ;;  %1894 = vmatprep.mubr.f32.mxu0 %v5679_v59  ;;  %v2517_v40 = vpop.f32.mrb[8].mxu1  ;;  %v2438_v59 = vpop.f32.mrb[9].mxu0 }
 0x1ab   : > { %2039 = vmatprep.mubr.f32.mxu1 %v5686_v2  ;;  %v2439_v2 = vadd.f32 %v2438_v59, %v2437_v21  ;;  %v2518_v46 = vpop.f32.mrb[9].mxu1  ;;  %v7020_v21 = vld [vmem:[#allocation46_spill] sm:$0xff] }
 0x1ad   : > { %1895 = vmatmul.mubr.f32.gmra.mrb[112].mxu0 %v5696_v8  ;;  %v2519_v8 = vadd.f32 %v2518_v46, %v2517_v40 }
 0x1ae   : > { %2040 = vmatmul.mubr.f32.gmra.mrb[112].mxu1 %v5700_v13  ;;  %1899 = vmatprep.mubr.f32.mxu0 %v5703_v33  ;;  %v2440_v13 = vpop.f32.mrb[10].mxu0 }
 0x1af   : > { %2044 = vmatprep.mubr.f32.mxu1 %v5706_v47  ;;  %v6026_v33 = vadd.f32 %v2519_v8, %v2439_v2  ;;  %v2520_v47 = vpop.f32.mrb[10].mxu1  ;;  %v2441_v57 = vpop.f32.mrb[11].mxu0  ;;  %v7021_v2 = vld [vmem:[#allocation45_spill] sm:$0xff] }
 0x1b0   : > { %v2442_v6 = vadd.f32 %v2441_v57, %v2440_v13  ;;  %v2521_v62 = vpop.f32.mrb[11].mxu1 }
 0x1b1   : > { %1900 = vmatmul.mubr.f32.gmra.mrb[114].mxu0 %v5718_v43  ;;  %v2522_v43 = vadd.f32 %v2521_v62, %v2520_v47 }
 0x1b2   : > { %2045 = vmatmul.mubr.f32.gmra.mrb[114].mxu1 %v5722_v49  ;;  %1904 = vmatprep.mubr.f32.mxu0 %v5725_v0  ;;  %v2443_v49 = vpop.f32.mrb[12].mxu0 }
 0x1b3   : > { %2049 = vmatprep.mubr.f32.mxu1 %v5728_v18  ;;  %v6032_v0 = vadd.f32 %v2522_v43, %v2442_v6  ;;  %v2523_v18 = vpop.f32.mrb[12].mxu1  ;;  %v2444_v22 = vpop.f32.mrb[13].mxu0 }
 0x1b4   : > { %v2445_v58 = vadd.f32 %v2444_v22, %v2443_v49  ;;  %v2524_v9 = vpop.f32.mrb[13].mxu1 }
 0x1b5   : > { %1905 = vmatmul.mubr.f32.gmra.mrb[116].mxu0 %v5734_v63  ;;  %v7006_v63 = vld [vmem:[#allocation70_spill] sm:$0xff]  ;;  %v2525_v56 = vadd.f32 %v2524_v9, %v2523_v18 }
 0x1b6   : > { %2050 = vmatmul.mubr.f32.gmra.mrb[116].mxu1 %v5738_v54  ;;  %1909 = vmatprep.mubr.f32.mxu0 %v5741_v23  ;;  %v7007_v54 = vld [vmem:[#allocation74_spill] sm:$0xff]  ;;  %v2446_v23 = vpop.f32.mrb[14].mxu0 }
 0x1b7   : > { %2054 = vmatprep.mubr.f32.mxu1 %v5744_v35  ;;  %v6038_v28 = vadd.f32 %v2525_v56, %v2445_v58  ;;  %v2526_v35 = vpop.f32.mrb[14].mxu1  ;;  %v2447_v34 = vpop.f32.mrb[15].mxu0 }
 0x1b8   : > { %v2448_v5 = vadd.f32 %v2447_v34, %v2446_v23  ;;  %v2527_v38 = vpop.f32.mrb[15].mxu1  ;;  %v2449_v1 = vpop.f32.mrb[16].mxu0 }
 0x1b9   : > { %1910 = vmatmul.mubr.f32.gmra.mrb[118].mxu0 %v5750_v48  ;;  %v7010_v48 = vld [vmem:[#allocation96_spill] sm:$0xff]  ;;  %v2528_v4 = vadd.f32 %v2527_v38, %v2526_v35  ;;  %v2529_v24 = vpop.f32.mrb[16].mxu1  ;;  %v2450_v10 = vpop.f32.mrb[17].mxu0 }
 0x1ba   : > { %2055 = vmatmul.mubr.f32.gmra.mrb[118].mxu1 %v7005_v17  ;;  %1914 = vmatprep.mubr.f32.mxu0 %v7006_v63  ;;  %v2451_v32 = vadd.f32 %v2450_v10, %v2449_v1  ;;  %v2530_v20 = vpop.f32.mrb[17].mxu1 }
 0x1bb   : > { %2059 = vmatprep.mubr.f32.mxu1 %v7007_v54  ;;  %v6044_v7 = vadd.f32 %v2528_v4, %v2448_v5  ;;  %v2531_v42 = vadd.f32 %v2530_v20, %v2529_v24  ;;  %v2452_v51 = vpop.f32.mrb[18].mxu0 }
 0x1bc   : > { %v2453_v30 = vpop.f32.mrb[19].mxu0 }
 0x1bd   : > { %1915 = vmatmul.mubr.f32.gmra.mrb[120].mxu0 %v7008_v50  ;;  %v6050_v11 = vadd.f32 %v2531_v42, %v2451_v32  ;;  %v2532_v39 = vpop.f32.mrb[18].mxu1  ;;  %v2454_v29 = vadd.f32 %v2453_v30, %v2452_v51 }
 0x1be   : > { %2060 = vmatmul.mubr.f32.gmra.mrb[120].mxu1 %v7009_v55  ;;  %1919 = vmatprep.mubr.f32.mxu0 %v7010_v48  ;;  %v2533_v44 = vpop.f32.mrb[19].mxu1 }
 0x1bf   : > { %2064 = vmatprep.mubr.f32.mxu1 %v7011_v3  ;;  %v2534_v31 = vadd.f32 %v2533_v44, %v2532_v39 }
 0x1c1   : > { %1920 = vmatmul.mubr.f32.gmra.mrb[122].mxu0 %v7012_v37  ;;  %v2455_v12 = vpop.f32.mrb[20].mxu0  ;;  %v6056_v52 = vadd.f32 %v2534_v31, %v2454_v29 }
 0x1c2   : > { %2065 = vmatmul.mubr.f32.gmra.mrb[122].mxu1 %v7013_v16  ;;  %1924 = vmatprep.mubr.f32.mxu0 %v7014_v19  ;;  %v2535_v61 = vpop.f32.mrb[20].mxu1  ;;  %v2456_v27 = vpop.f32.mrb[21].mxu0 }
 0x1c3   : > { %2069 = vmatprep.mubr.f32.mxu1 %v7015_v25  ;;  %v2457_v40 = vadd.f32 %v2456_v27, %v2455_v12  ;;  %v2536_v59 = vpop.f32.mrb[21].mxu1 }
 0x1c4   : > { %v2537_v46 = vadd.f32 %v2536_v59, %v2535_v61 }
 0x1c5   : > { %1925 = vmatmul.mubr.f32.gmra.mrb[124].mxu0 %v7016_v53  ;;  %v2458_v8 = vpop.f32.mrb[22].mxu0 }
 0x1c6   : > { %2070 = vmatmul.mubr.f32.gmra.mrb[124].mxu1 %v7017_v45  ;;  %1929 = vmatprep.mubr.f32.mxu0 %v7018_v14  ;;  %v6060_v13 = vadd.f32 %v2537_v46, %v2457_v40  ;;  %v2538_v47 = vpop.f32.mrb[22].mxu1  ;;  %v2459_v57 = vpop.f32.mrb[23].mxu0 }
 0x1c7   : > { %2074 = vmatprep.mubr.f32.mxu1 %v7019_v41  ;;  %v2460_v6 = vadd.f32 %v2459_v57, %v2458_v8  ;;  %v2539_v62 = vpop.f32.mrb[23].mxu1 }
 0x1c8   : > { %v2540_v43 = vadd.f32 %v2539_v62, %v2538_v47 }
 0x1c9   : > { %1930 = vmatmul.mubr.f32.gmra.mrb[126].mxu0 %v7020_v21  ;;  %v2461_v49 = vpop.f32.mrb[24].mxu0 }
 0x1ca   : > { %2075 = vmatmul.mubr.f32.gmra.mrb[126].mxu1 %v7021_v2  ;;  %v6062_v18 = vadd.f32 %v2540_v43, %v2460_v6  ;;  %v2541_v22 = vpop.f32.mrb[24].mxu1  ;;  %v2462_v58 = vpop.f32.mrb[25].mxu0 }
 0x1cb   : > { %v2463_v9 = vadd.f32 %v2462_v58, %v2461_v49  ;;  %v2542_v17 = vpop.f32.mrb[25].mxu1 }
 0x1cc   : > { %v2543_v63 = vadd.f32 %v2542_v17, %v2541_v22 }
 0x1cd   : > { %v2464_v56 = vpop.f32.mrb[26].mxu0 }
 0x1ce   : > { %v6064_v54 = vadd.f32 %v2543_v63, %v2463_v9  ;;  %v2544_v23 = vpop.f32.mrb[26].mxu1  ;;  %v2465_v35 = vpop.f32.mrb[27].mxu0 }
 0x1cf   : > { %v2466_v34 = vadd.f32 %v2465_v35, %v2464_v56  ;;  %v2545_v50 = vpop.f32.mrb[27].mxu1 }
 0x1d0   : > { %v2546_v5 = vadd.f32 %v2545_v50, %v2544_v23 }
 0x1d2   : > { %v6066_v55 = vadd.f32 %v2546_v5, %v2466_v34  ;;  %v2547_v48 = vpop.f32.mrb[28].mxu1 }
 0x1d3   : > { %v2467_v38 = vpop.f32.mrb[28].mxu0  ;;  %v2548_v1 = vpop.f32.mrb[29].mxu1 }
 0x1d4   : > { %v2468_v4 = vpop.f32.mrb[29].mxu0  ;;  %v2549_v24 = vadd.f32 %v2548_v1, %v2547_v48 }
 0x1d5   : > { %v2469_v3 = vadd.f32 %v2468_v4, %v2467_v38 }
 0x1d7   : > { %v6068_v37 = vadd.f32 %v2549_v24, %v2469_v3 }
 0x1d8   : > { %v2470_v10 = vpop.f32.mrb[30].mxu0 }
 0x1d9   : > { %v2471_v20 = vpop.f32.mrb[31].mxu0 }
 0x1da   : > { %v2472_v16 = vadd.f32 %v2471_v20, %v2470_v10 }
 0x1dd   : > { %v2550_v32 = vpop.f32.mrb[30].mxu1 }
 0x1de   : > { %v2551_v19 = vpop.f32.mrb[31].mxu1  ;;  %v2585_v25 = vpop.f32.mrb[32].mxu0 }
 0x1df   : > { %v2552_v42 = vadd.f32 %v2551_v19, %v2550_v32  ;;  %v2586_v39 = vpop.f32.mrb[33].mxu0 }
 0x1e0   : > { %v2587_v53 = vadd.f32 %v2586_v39, %v2585_v25 }
 0x1e1   : > { %v6071_v51 = vadd.f32 %v2552_v42, %v2472_v16  ;;  %v2665_v30 = vpop.f32.mrb[32].mxu1 }
 0x1e2   : > { %v2666_v29 = vpop.f32.mrb[33].mxu1  ;;  %v1228_v45 = vadd.f32 %v2587_v53, %v6002_v36 }
 0x1e3   : > { %v2667_v44 = vadd.f32 %v2666_v29, %v2665_v30  ;;  %v2588_v14 = vpop.f32.mrb[34].mxu0 }
 0x1e4   : > { %v2589_v31 = vpop.f32.mrb[35].mxu0 }
 0x1e5   : > { %v2668_v41 = vpop.f32.mrb[34].mxu1  ;;  %v1373_v12 = vadd.f32 %v2667_v44, %v1228_v45  ;;  %v2590_v61 = vadd.f32 %v2589_v31, %v2588_v14 }
 0x1e6   : > { %v2669_v27 = vpop.f32.mrb[35].mxu1 }
 0x1e7   : > { %v2670_v21 = vadd.f32 %v2669_v27, %v2668_v41  ;;  %2147 = vst [vmem:[%s6076_s8] sm:$0xff] %v1373_v12  ;;  %v1233_v40 = vadd.f32 %v2590_v61, %v6008_v26 }
 0x1e8   : > { %v2591_v59 = vpop.f32.mrb[36].mxu0 }
 0x1e9   : > { %v2592_v2 = vpop.f32.mrb[37].mxu0  ;;  %v2671_v46 = vpop.f32.mrb[36].mxu1  ;;  %v1378_v8 = vadd.f32 %v2670_v21, %v1233_v40 }
 0x1ea   : > { %v2593_v36 = vadd.f32 %v2592_v2, %v2591_v59  ;;  %v2672_v47 = vpop.f32.mrb[37].mxu1 }
 0x1eb   : > { %v2673_v57 = vadd.f32 %v2672_v47, %v2671_v46  ;;  %2148 = vst [vmem:[%s6076_s8 + $0x8] sm:$0xff] %v1378_v8 }
 0x1ec   : > { %v1238_v6 = vadd.f32 %v2593_v36, %v6014_v15  ;;  %v2594_v62 = vpop.f32.mrb[38].mxu0 }
 0x1ed   : > { %v2595_v43 = vpop.f32.mrb[39].mxu0  ;;  %v2674_v49 = vpop.f32.mrb[38].mxu1 }
 0x1ee   : > { %v1383_v22 = vadd.f32 %v2673_v57, %v1238_v6  ;;  %v2596_v58 = vadd.f32 %v2595_v43, %v2594_v62  ;;  %v2675_v9 = vpop.f32.mrb[39].mxu1 }
 0x1ef   : > { %v2676_v17 = vadd.f32 %v2675_v9, %v2674_v49 }
 0x1f0   : > { %2149 = vst [vmem:[%s6076_s8 + $0x10] sm:$0xff] %v1383_v22  ;;  %v1243_v26 = vadd.f32 %v2596_v58, %v6020_v60  ;;  %v2597_v63 = vpop.f32.mrb[40].mxu0 }
 0x1f1   : > { %v2598_v56 = vpop.f32.mrb[41].mxu0  ;;  %v2677_v23 = vpop.f32.mrb[40].mxu1 }
 0x1f2   : > { %v1388_v35 = vadd.f32 %v2676_v17, %v1243_v26  ;;  %v2599_v34 = vadd.f32 %v2598_v56, %v2597_v63  ;;  %v2678_v50 = vpop.f32.mrb[41].mxu1 }
 0x1f3   : > { %v2679_v5 = vadd.f32 %v2678_v50, %v2677_v23 }
 0x1f4   : > { %2150 = vst [vmem:[%s6076_s8 + $0x18] sm:$0xff] %v1388_v35  ;;  %v1248_v15 = vadd.f32 %v2599_v34, %v6026_v33  ;;  %v2600_v38 = vpop.f32.mrb[42].mxu0 }
 0x1f5   : > { %v2601_v48 = vpop.f32.mrb[43].mxu0  ;;  %v2680_v4 = vpop.f32.mrb[42].mxu1 }
 0x1f6   : > { %v1393_v3 = vadd.f32 %v2679_v5, %v1248_v15  ;;  %v2602_v1 = vadd.f32 %v2601_v48, %v2600_v38  ;;  %v2681_v24 = vpop.f32.mrb[43].mxu1 }
 0x1f7   : > { %v2682_v10 = vadd.f32 %v2681_v24, %v2680_v4 }
 0x1f8   : > { %2151 = vst [vmem:[%s6076_s8 + $0x20] sm:$0xff] %v1393_v3  ;;  %v1253_v60 = vadd.f32 %v2602_v1, %v6032_v0  ;;  %v2603_v32 = vpop.f32.mrb[44].mxu0 }
 0x1f9   : > { %v2604_v20 = vpop.f32.mrb[45].mxu0  ;;  %v2683_v16 = vpop.f32.mrb[44].mxu1 }
 0x1fa   : > { %v1398_v19 = vadd.f32 %v2682_v10, %v1253_v60  ;;  %v2605_v42 = vadd.f32 %v2604_v20, %v2603_v32  ;;  %v2684_v25 = vpop.f32.mrb[45].mxu1 }
 0x1fb   : > { %v2685_v39 = vadd.f32 %v2684_v25, %v2683_v16 }
 0x1fc   : > { %2152 = vst [vmem:[%s6076_s8 + $0x28] sm:$0xff] %v1398_v19  ;;  %v1258_v33 = vadd.f32 %v2605_v42, %v6038_v28  ;;  %v2606_v30 = vpop.f32.mrb[46].mxu0 }
 0x1fd   : > { %v2607_v53 = vpop.f32.mrb[47].mxu0  ;;  %v2686_v29 = vpop.f32.mrb[46].mxu1 }
 0x1fe   : > { %v1403_v44 = vadd.f32 %v2685_v39, %v1258_v33  ;;  %v2608_v45 = vadd.f32 %v2607_v53, %v2606_v30  ;;  %v2687_v14 = vpop.f32.mrb[47].mxu1 }
 0x1ff   : > { %v2688_v31 = vadd.f32 %v2687_v14, %v2686_v29 }
 0x200   : > { %2153 = vst [vmem:[%s6076_s8 + $0x30] sm:$0xff] %v1403_v44  ;;  %v1263_v0 = vadd.f32 %v2608_v45, %v6044_v7  ;;  %v2609_v41 = vpop.f32.mrb[48].mxu0 }
 0x201   : > { %v2610_v12 = vpop.f32.mrb[49].mxu0  ;;  %v2689_v61 = vpop.f32.mrb[48].mxu1 }
 0x202   : > { %v1408_v27 = vadd.f32 %v2688_v31, %v1263_v0  ;;  %v2611_v21 = vadd.f32 %v2610_v12, %v2609_v41  ;;  %v2690_v40 = vpop.f32.mrb[49].mxu1 }
 0x203   : > { %v2691_v59 = vadd.f32 %v2690_v40, %v2689_v61 }
 0x204   : > { %2154 = vst [vmem:[%s6076_s8 + $0x38] sm:$0xff] %v1408_v27  ;;  %v1268_v28 = vadd.f32 %v2611_v21, %v6050_v11  ;;  %v2612_v2 = vpop.f32.mrb[50].mxu0 }
 0x205   : > { %v2613_v46 = vpop.f32.mrb[51].mxu0  ;;  %v2692_v8 = vpop.f32.mrb[50].mxu1 }
 0x206   : > { %v1413_v36 = vadd.f32 %v2691_v59, %v1268_v28  ;;  %v2614_v47 = vadd.f32 %v2613_v46, %v2612_v2  ;;  %v2693_v57 = vpop.f32.mrb[51].mxu1 }
 0x207   : > { %v2694_v6 = vadd.f32 %v2693_v57, %v2692_v8 }
 0x208   : > { %2155 = vst [vmem:[%s6076_s8 + $0x40] sm:$0xff] %v1413_v36  ;;  %v1273_v7 = vadd.f32 %v2614_v47, %v6056_v52  ;;  %v2615_v62 = vpop.f32.mrb[52].mxu0 }
 0x209   : > { %v2616_v43 = vpop.f32.mrb[53].mxu0  ;;  %v2695_v49 = vpop.f32.mrb[52].mxu1 }
 0x20a   : > { %v1418_v22 = vadd.f32 %v2694_v6, %v1273_v7  ;;  %v2617_v58 = vadd.f32 %v2616_v43, %v2615_v62  ;;  %v2696_v9 = vpop.f32.mrb[53].mxu1 }
 0x20b   : > { %v2697_v17 = vadd.f32 %v2696_v9, %v2695_v49 }
 0x20c   : > { %2156 = vst [vmem:[%s6076_s8 + $0x48] sm:$0xff] %v1418_v22  ;;  %v1278_v11 = vadd.f32 %v2617_v58, %v6060_v13  ;;  %v2618_v26 = vpop.f32.mrb[54].mxu0 }
 0x20d   : > { %v2619_v63 = vpop.f32.mrb[55].mxu0  ;;  %v2698_v56 = vpop.f32.mrb[54].mxu1 }
 0x20e   : > { %v1423_v23 = vadd.f32 %v2697_v17, %v1278_v11  ;;  %v2620_v35 = vadd.f32 %v2619_v63, %v2618_v26  ;;  %v2699_v34 = vpop.f32.mrb[55].mxu1 }
 0x20f   : > { %v2700_v50 = vadd.f32 %v2699_v34, %v2698_v56 }
 0x210   : > { %2157 = vst [vmem:[%s6076_s8 + $0x50] sm:$0xff] %v1423_v23  ;;  %v1283_v52 = vadd.f32 %v2620_v35, %v6062_v18  ;;  %v2621_v5 = vpop.f32.mrb[56].mxu0 }
 0x211   : > { %v2622_v15 = vpop.f32.mrb[57].mxu0  ;;  %v2701_v38 = vpop.f32.mrb[56].mxu1 }
 0x212   : > { %v1428_v48 = vadd.f32 %v2700_v50, %v1283_v52  ;;  %v2623_v4 = vadd.f32 %v2622_v15, %v2621_v5  ;;  %v2702_v3 = vpop.f32.mrb[57].mxu1 }
 0x213   : > { %v2703_v1 = vadd.f32 %v2702_v3, %v2701_v38 }
 0x214   : > { %2158 = vst [vmem:[%s6076_s8 + $0x58] sm:$0xff] %v1428_v48  ;;  %v1288_v13 = vadd.f32 %v2623_v4, %v6064_v54  ;;  %v2624_v24 = vpop.f32.mrb[58].mxu0 }
 0x215   : > { %v2625_v10 = vpop.f32.mrb[59].mxu0  ;;  %v2704_v60 = vpop.f32.mrb[58].mxu1 }
 0x216   : > { %v1433_v32 = vadd.f32 %v2703_v1, %v1288_v13  ;;  %v2626_v20 = vadd.f32 %v2625_v10, %v2624_v24  ;;  %v2705_v16 = vpop.f32.mrb[59].mxu1 }
 0x217   : > { %v2706_v19 = vadd.f32 %v2705_v16, %v2704_v60 }
 0x218   : > { %2159 = vst [vmem:[%s6076_s8 + $0x60] sm:$0xff] %v1433_v32  ;;  %v1293_v18 = vadd.f32 %v2626_v20, %v6066_v55  ;;  %v2627_v42 = vpop.f32.mrb[60].mxu0 }
 0x219   : > { %v2628_v25 = vpop.f32.mrb[61].mxu0  ;;  %v2707_v39 = vpop.f32.mrb[60].mxu1 }
 0x21a   : > { %v1438_v33 = vadd.f32 %v2706_v19, %v1293_v18  ;;  %v2629_v30 = vadd.f32 %v2628_v25, %v2627_v42  ;;  %v2708_v53 = vpop.f32.mrb[61].mxu1 }
 0x21b   : > { %v2709_v29 = vadd.f32 %v2708_v53, %v2707_v39 }
 0x21c   : > { %2160 = vst [vmem:[%s6076_s8 + $0x68] sm:$0xff] %v1438_v33  ;;  %v1298_v54 = vadd.f32 %v2629_v30, %v6068_v37  ;;  %v2630_v44 = vpop.f32.mrb[62].mxu0 }
 0x21d   : > { %v2631_v45 = vpop.f32.mrb[63].mxu0  ;;  %v2710_v14 = vpop.f32.mrb[62].mxu1 }
 0x21e   : > { %v1443_v31 = vadd.f32 %v2709_v29, %v1298_v54  ;;  %v2632_v0 = vadd.f32 %v2631_v45, %v2630_v44  ;;  %v2711_v41 = vpop.f32.mrb[63].mxu1 }
 0x21f   : > { %v2712_v12 = vadd.f32 %v2711_v41, %v2710_v14 }
 0x220   : > { %2161 = vst [vmem:[%s6076_s8 + $0x70] sm:$0xff] %v1443_v31  ;;  %v1303_v55 = vadd.f32 %v2632_v0, %v6071_v51  ;;  %v2745_v61 = vpop.f32.mrb[64].mxu0 }
 0x221   : > { %v2825_v27 = vpop.f32.mrb[64].mxu1  ;;  %v2746_v21 = vpop.f32.mrb[65].mxu0 }
 0x222   : > { %v1448_v40 = vadd.f32 %v2712_v12, %v1303_v55  ;;  %v2747_v59 = vadd.f32 %v2746_v21, %v2745_v61  ;;  %v2826_v28 = vpop.f32.mrb[65].mxu1 }
 0x223   : > { %v2827_v2 = vadd.f32 %v2826_v28, %v2825_v27 }
 0x224   : > { %2162 = vst [vmem:[%s6076_s8 + $0x78] sm:$0xff] %v1448_v40  ;;  %v2748_v37 = vpop.f32.mrb[66].mxu0 }
 0x225   : > { %v6109_v46 = vadd.f32 %v2827_v2, %v2747_v59  ;;  %v2828_v8 = vpop.f32.mrb[66].mxu1  ;;  %v2749_v36 = vpop.f32.mrb[67].mxu0 }
 0x226   : > { %v2750_v47 = vadd.f32 %v2749_v36, %v2748_v37  ;;  %v2829_v57 = vpop.f32.mrb[67].mxu1 }
 0x227   : > { %v2830_v6 = vadd.f32 %v2829_v57, %v2828_v8 }
 0x228   : > { %v2751_v7 = vpop.f32.mrb[68].mxu0 }
 0x229   : > { %v6111_v62 = vadd.f32 %v2830_v6, %v2750_v47  ;;  %v2831_v51 = vpop.f32.mrb[68].mxu1  ;;  %v2752_v43 = vpop.f32.mrb[69].mxu0 }
 0x22a   : > { %v2753_v49 = vadd.f32 %v2752_v43, %v2751_v7  ;;  %v2832_v22 = vpop.f32.mrb[69].mxu1 }
 0x22b   : > { %v2833_v58 = vadd.f32 %v2832_v22, %v2831_v51 }
 0x22c   : > { %v2754_v9 = vpop.f32.mrb[70].mxu0 }
 0x22d   : > { %v6113_v17 = vadd.f32 %v2833_v58, %v2753_v49  ;;  %v2834_v11 = vpop.f32.mrb[70].mxu1  ;;  %v2755_v26 = vpop.f32.mrb[71].mxu0 }
 0x22e   : > { %v2756_v63 = vadd.f32 %v2755_v26, %v2754_v9  ;;  %v2835_v56 = vpop.f32.mrb[71].mxu1 }
 0x22f   : > { %v2836_v23 = vadd.f32 %v2835_v56, %v2834_v11 }
 0x230   : > { %v2757_v35 = vpop.f32.mrb[72].mxu0 }
 0x231   : > { %v6115_v34 = vadd.f32 %v2836_v23, %v2756_v63  ;;  %v2837_v50 = vpop.f32.mrb[72].mxu1  ;;  %v2758_v52 = vpop.f32.mrb[73].mxu0 }
 0x232   : > { %v2759_v5 = vadd.f32 %v2758_v52, %v2757_v35  ;;  %v2838_v15 = vpop.f32.mrb[73].mxu1 }
 0x233   : > { %v2839_v38 = vadd.f32 %v2838_v15, %v2837_v50 }
 0x234   : > { %v2760_v48 = vpop.f32.mrb[74].mxu0 }
 0x235   : > { %v6117_v4 = vadd.f32 %v2839_v38, %v2759_v5  ;;  %v2840_v3 = vpop.f32.mrb[74].mxu1  ;;  %v2761_v1 = vpop.f32.mrb[75].mxu0 }
 0x236   : > { %v2762_v13 = vadd.f32 %v2761_v1, %v2760_v48  ;;  %v2841_v24 = vpop.f32.mrb[75].mxu1 }
 0x237   : > { %v2842_v10 = vadd.f32 %v2841_v24, %v2840_v3 }
 0x238   : > { %v2763_v60 = vpop.f32.mrb[76].mxu0 }
 0x239   : > { %v6119_v32 = vadd.f32 %v2842_v10, %v2762_v13  ;;  %v2843_v20 = vpop.f32.mrb[76].mxu1  ;;  %v2764_v16 = vpop.f32.mrb[77].mxu0 }
 0x23a   : > { %v2765_v19 = vadd.f32 %v2764_v16, %v2763_v60  ;;  %v2844_v18 = vpop.f32.mrb[77].mxu1 }
 0x23b   : > { %v2845_v42 = vadd.f32 %v2844_v18, %v2843_v20 }
 0x23c   : > { %v2766_v25 = vpop.f32.mrb[78].mxu0 }
 0x23d   : > { %v6121_v39 = vadd.f32 %v2845_v42, %v2765_v19  ;;  %v2846_v33 = vpop.f32.mrb[78].mxu1  ;;  %v2767_v30 = vpop.f32.mrb[79].mxu0 }
 0x23e   : > { %v2768_v53 = vadd.f32 %v2767_v30, %v2766_v25  ;;  %v2847_v29 = vpop.f32.mrb[79].mxu1 }
 0x23f   : > { %v2848_v54 = vadd.f32 %v2847_v29, %v2846_v33 }
 0x240   : > { %v2769_v44 = vpop.f32.mrb[80].mxu0 }
 0x241   : > { %v6123_v45 = vadd.f32 %v2848_v54, %v2768_v53  ;;  %v2849_v14 = vpop.f32.mrb[80].mxu1  ;;  %v2770_v31 = vpop.f32.mrb[81].mxu0 }
 0x242   : > { %v2771_v0 = vadd.f32 %v2770_v31, %v2769_v44  ;;  %v2850_v41 = vpop.f32.mrb[81].mxu1 }
 0x243   : > { %v2851_v12 = vadd.f32 %v2850_v41, %v2849_v14 }
 0x244   : > { %v2772_v55 = vpop.f32.mrb[82].mxu0 }
 0x245   : > { %v6125_v61 = vadd.f32 %v2851_v12, %v2771_v0  ;;  %v2852_v27 = vpop.f32.mrb[82].mxu1  ;;  %v2773_v21 = vpop.f32.mrb[83].mxu0 }
 0x246   : > { %v2774_v40 = vadd.f32 %v2773_v21, %v2772_v55  ;;  %v2853_v59 = vpop.f32.mrb[83].mxu1 }
 0x247   : > { %v2854_v28 = vadd.f32 %v2853_v59, %v2852_v27 }
 0x248   : > { %v2775_v2 = vpop.f32.mrb[84].mxu0 }
 0x249   : > { %v6127_v37 = vadd.f32 %v2854_v28, %v2774_v40  ;;  %v2855_v8 = vpop.f32.mrb[84].mxu1  ;;  %v2776_v36 = vpop.f32.mrb[85].mxu0 }
 0x24a   : > { %v2777_v47 = vadd.f32 %v2776_v36, %v2775_v2  ;;  %v2856_v57 = vpop.f32.mrb[85].mxu1 }
 0x24b   : > { %v2857_v6 = vadd.f32 %v2856_v57, %v2855_v8 }
 0x24c   : > { %v2778_v7 = vpop.f32.mrb[86].mxu0 }
 0x24d   : > { %v6129_v51 = vadd.f32 %v2857_v6, %v2777_v47  ;;  %v2858_v43 = vpop.f32.mrb[86].mxu1  ;;  %v2779_v49 = vpop.f32.mrb[87].mxu0 }
 0x24e   : > { %v2780_v22 = vadd.f32 %v2779_v49, %v2778_v7  ;;  %v2859_v58 = vpop.f32.mrb[87].mxu1 }
 0x24f   : > { %v2860_v9 = vadd.f32 %v2859_v58, %v2858_v43 }
 0x250   : > { %v2781_v11 = vpop.f32.mrb[88].mxu0 }
 0x251   : > { %v6131_v26 = vadd.f32 %v2860_v9, %v2780_v22  ;;  %v2861_v63 = vpop.f32.mrb[88].mxu1  ;;  %v2782_v56 = vpop.f32.mrb[89].mxu0 }
 0x252   : > { %v2783_v23 = vadd.f32 %v2782_v56, %v2781_v11  ;;  %v2862_v35 = vpop.f32.mrb[89].mxu1 }
 0x253   : > { %v2863_v50 = vadd.f32 %v2862_v35, %v2861_v63 }
 0x254   : > { %v2784_v52 = vpop.f32.mrb[90].mxu0 }
 0x255   : > { %v6133_v5 = vadd.f32 %v2863_v50, %v2783_v23  ;;  %v2864_v15 = vpop.f32.mrb[90].mxu1  ;;  %v2785_v38 = vpop.f32.mrb[91].mxu0 }
 0x256   : > { %v2786_v48 = vadd.f32 %v2785_v38, %v2784_v52  ;;  %v2865_v3 = vpop.f32.mrb[91].mxu1 }
 0x257   : > { %v2866_v1 = vadd.f32 %v2865_v3, %v2864_v15 }
 0x258   : > { %v2787_v13 = vpop.f32.mrb[92].mxu0 }
 0x259   : > { %v6135_v24 = vadd.f32 %v2866_v1, %v2786_v48  ;;  %v2867_v10 = vpop.f32.mrb[92].mxu1  ;;  %v2788_v60 = vpop.f32.mrb[93].mxu0 }
 0x25a   : > { %v2789_v20 = vadd.f32 %v2788_v60, %v2787_v13  ;;  %v2868_v16 = vpop.f32.mrb[93].mxu1 }
 0x25b   : > { %v2869_v19 = vadd.f32 %v2868_v16, %v2867_v10 }
 0x25c   : > { %v2790_v18 = vpop.f32.mrb[94].mxu0 }
 0x25d   : > { %v6137_v42 = vadd.f32 %v2869_v19, %v2789_v20  ;;  %v2870_v25 = vpop.f32.mrb[94].mxu1  ;;  %v2791_v33 = vpop.f32.mrb[95].mxu0 }
 0x25e   : > { %v2792_v30 = vadd.f32 %v2791_v33, %v2790_v18  ;;  %v2871_v53 = vpop.f32.mrb[95].mxu1 }
 0x25f   : > { %v2872_v29 = vadd.f32 %v2871_v53, %v2870_v25 }
 0x260   : > { %v2905_v54 = vpop.f32.mrb[96].mxu0 }
 0x261   : > { %v6139_v44 = vadd.f32 %v2872_v29, %v2792_v30  ;;  %v2906_v14 = vpop.f32.mrb[97].mxu0  ;;  %v2985_v31 = vpop.f32.mrb[96].mxu1 }
 0x262   : > { %v2907_v0 = vadd.f32 %v2906_v14, %v2905_v54  ;;  %v2986_v41 = vpop.f32.mrb[97].mxu1 }
 0x263   : > { %v2987_v12 = vadd.f32 %v2986_v41, %v2985_v31 }
 0x264   : > { %v1857_v55 = vadd.f32 %v2907_v0, %v6109_v46  ;;  %v2908_v27 = vpop.f32.mrb[98].mxu0 }
 0x265   : > { %v2909_v21 = vpop.f32.mrb[99].mxu0  ;;  %v2988_v40 = vpop.f32.mrb[98].mxu1 }
 0x266   : > { %v2002_v59 = vadd.f32 %v2987_v12, %v1857_v55  ;;  %v2910_v28 = vadd.f32 %v2909_v21, %v2908_v27  ;;  %v2989_v2 = vpop.f32.mrb[99].mxu1 }
 0x267   : > { %v2990_v8 = vadd.f32 %v2989_v2, %v2988_v40 }
 0x268   : > { %2163 = vst [vmem:[%s6076_s8 + $0x80] sm:$0xff] %v2002_v59  ;;  %v1862_v36 = vadd.f32 %v2910_v28, %v6111_v62  ;;  %v2911_v47 = vpop.f32.mrb[100].mxu0 }
 0x269   : > { %v2912_v57 = vpop.f32.mrb[101].mxu0  ;;  %v2991_v6 = vpop.f32.mrb[100].mxu1 }
 0x26a   : > { %v2007_v7 = vadd.f32 %v2990_v8, %v1862_v36  ;;  %v2913_v43 = vadd.f32 %v2912_v57, %v2911_v47  ;;  %v2992_v49 = vpop.f32.mrb[101].mxu1 }
 0x26b   : > { %v2993_v22 = vadd.f32 %v2992_v49, %v2991_v6 }
 0x26c   : > { %2164 = vst [vmem:[%s6076_s8 + $0x88] sm:$0xff] %v2007_v7  ;;  %v1867_v46 = vadd.f32 %v2913_v43, %v6113_v17  ;;  %v2914_v58 = vpop.f32.mrb[102].mxu0 }
 0x26d   : > { %v2915_v9 = vpop.f32.mrb[103].mxu0  ;;  %v2994_v11 = vpop.f32.mrb[102].mxu1 }
 0x26e   : > { %v2012_v63 = vadd.f32 %v2993_v22, %v1867_v46  ;;  %v2916_v56 = vadd.f32 %v2915_v9, %v2914_v58  ;;  %v2995_v23 = vpop.f32.mrb[103].mxu1 }
 0x26f   : > { %v2996_v35 = vadd.f32 %v2995_v23, %v2994_v11 }
 0x270   : > { %2165 = vst [vmem:[%s6076_s8 + $0x90] sm:$0xff] %v2012_v63  ;;  %v1872_v62 = vadd.f32 %v2916_v56, %v6115_v34  ;;  %v2917_v50 = vpop.f32.mrb[104].mxu0 }
 0x271   : > { %v2918_v52 = vpop.f32.mrb[105].mxu0  ;;  %v2997_v15 = vpop.f32.mrb[104].mxu1 }
 0x272   : > { %v2017_v38 = vadd.f32 %v2996_v35, %v1872_v62  ;;  %v2919_v48 = vadd.f32 %v2918_v52, %v2917_v50  ;;  %v2998_v3 = vpop.f32.mrb[105].mxu1 }
 0x273   : > { %v2999_v1 = vadd.f32 %v2998_v3, %v2997_v15 }
 0x274   : > { %2166 = vst [vmem:[%s6076_s8 + $0x98] sm:$0xff] %v2017_v38  ;;  %v1877_v17 = vadd.f32 %v2919_v48, %v6117_v4  ;;  %v2920_v13 = vpop.f32.mrb[106].mxu0 }
 0x275   : > { %v2921_v10 = vpop.f32.mrb[107].mxu0  ;;  %v3000_v60 = vpop.f32.mrb[106].mxu1 }
 0x276   : > { %v2022_v20 = vadd.f32 %v2999_v1, %v1877_v17  ;;  %v2922_v16 = vadd.f32 %v2921_v10, %v2920_v13  ;;  %v3001_v19 = vpop.f32.mrb[107].mxu1 }
 0x277   : > { %v3002_v18 = vadd.f32 %v3001_v19, %v3000_v60 }
 0x278   : > { %2167 = vst [vmem:[%s6076_s8 + $0xa0] sm:$0xff] %v2022_v20  ;;  %v1882_v34 = vadd.f32 %v2922_v16, %v6119_v32  ;;  %v2923_v25 = vpop.f32.mrb[108].mxu0 }
 0x279   : > { %v2924_v33 = vpop.f32.mrb[109].mxu0  ;;  %v3003_v30 = vpop.f32.mrb[108].mxu1 }
 0x27a   : > { %v2027_v53 = vadd.f32 %v3002_v18, %v1882_v34  ;;  %v2925_v29 = vadd.f32 %v2924_v33, %v2923_v25  ;;  %v3004_v54 = vpop.f32.mrb[109].mxu1 }
 0x27b   : > { %v3005_v14 = vadd.f32 %v3004_v54, %v3003_v30 }
 0x27c   : > { %2168 = vst [vmem:[%s6076_s8 + $0xa8] sm:$0xff] %v2027_v53  ;;  %v1887_v4 = vadd.f32 %v2925_v29, %v6121_v39  ;;  %v2926_v31 = vpop.f32.mrb[110].mxu0 }
 0x27d   : > { %v2927_v0 = vpop.f32.mrb[111].mxu0  ;;  %v3006_v41 = vpop.f32.mrb[110].mxu1 }
 0x27e   : > { %v2032_v12 = vadd.f32 %v3005_v14, %v1887_v4  ;;  %v2928_v55 = vadd.f32 %v2927_v0, %v2926_v31  ;;  %v3007_v27 = vpop.f32.mrb[111].mxu1 }
 0x27f   : > { %v3008_v21 = vadd.f32 %v3007_v27, %v3006_v41 }
 0x280   : > { %2169 = vst [vmem:[%s6076_s8 + $0xb0] sm:$0xff] %v2032_v12  ;;  %v1892_v32 = vadd.f32 %v2928_v55, %v6123_v45  ;;  %v2929_v40 = vpop.f32.mrb[112].mxu0 }
 0x281   : > { %v2930_v59 = vpop.f32.mrb[113].mxu0  ;;  %v3009_v28 = vpop.f32.mrb[112].mxu1 }
 0x282   : > { %v2037_v2 = vadd.f32 %v3008_v21, %v1892_v32  ;;  %v2931_v8 = vadd.f32 %v2930_v59, %v2929_v40  ;;  %v3010_v36 = vpop.f32.mrb[113].mxu1 }
 0x283   : > { %v3011_v47 = vadd.f32 %v3010_v36, %v3009_v28 }
 0x284   : > { %2170 = vst [vmem:[%s6076_s8 + $0xb8] sm:$0xff] %v2037_v2  ;;  %v1897_v39 = vadd.f32 %v2931_v8, %v6125_v61  ;;  %v2932_v57 = vpop.f32.mrb[114].mxu0 }
 0x285   : > { %v2933_v6 = vpop.f32.mrb[115].mxu0  ;;  %v3012_v7 = vpop.f32.mrb[114].mxu1 }
 0x286   : > { %v2042_v43 = vadd.f32 %v3011_v47, %v1897_v39  ;;  %v2934_v49 = vadd.f32 %v2933_v6, %v2932_v57  ;;  %v3013_v22 = vpop.f32.mrb[115].mxu1 }
 0x287   : > { %v3014_v46 = vadd.f32 %v3013_v22, %v3012_v7 }
 0x288   : > { %2171 = vst [vmem:[%s6076_s8 + $0xc0] sm:$0xff] %v2042_v43  ;;  %v1902_v45 = vadd.f32 %v2934_v49, %v6127_v37  ;;  %v2935_v58 = vpop.f32.mrb[116].mxu0 }
 0x289   : > { %v2936_v9 = vpop.f32.mrb[117].mxu0  ;;  %v3015_v11 = vpop.f32.mrb[116].mxu1 }
 0x28a   : > { %v2047_v63 = vadd.f32 %v3014_v46, %v1902_v45  ;;  %v2937_v56 = vadd.f32 %v2936_v9, %v2935_v58  ;;  %v3016_v23 = vpop.f32.mrb[117].mxu1 }
 0x28b   : > { %v3017_v35 = vadd.f32 %v3016_v23, %v3015_v11 }
 0x28c   : > { %2172 = vst [vmem:[%s6076_s8 + $0xc8] sm:$0xff] %v2047_v63  ;;  %v1907_v61 = vadd.f32 %v2937_v56, %v6129_v51  ;;  %v2938_v62 = vpop.f32.mrb[118].mxu0 }
 0x28d   : > { %v2939_v50 = vpop.f32.mrb[119].mxu0  ;;  %v3018_v52 = vpop.f32.mrb[118].mxu1 }
 0x28e   : > { %v2052_v15 = vadd.f32 %v3017_v35, %v1907_v61  ;;  %v2940_v38 = vadd.f32 %v2939_v50, %v2938_v62  ;;  %v3019_v48 = vpop.f32.mrb[119].mxu1 }
 0x28f   : > { %v3020_v3 = vadd.f32 %v3019_v48, %v3018_v52 }
 0x290   : > { %2173 = vst [vmem:[%s6076_s8 + $0xd0] sm:$0xff] %v2052_v15  ;;  %v1912_v37 = vadd.f32 %v2940_v38, %v6131_v26  ;;  %v2941_v1 = vpop.f32.mrb[120].mxu0 }
 0x291   : > { %v2942_v17 = vpop.f32.mrb[121].mxu0  ;;  %v3021_v13 = vpop.f32.mrb[120].mxu1 }
 0x292   : > { %v2057_v10 = vadd.f32 %v3020_v3, %v1912_v37  ;;  %v2943_v60 = vadd.f32 %v2942_v17, %v2941_v1  ;;  %v3022_v20 = vpop.f32.mrb[121].mxu1 }
 0x293   : > { %v3023_v16 = vadd.f32 %v3022_v20, %v3021_v13 }
 0x294   : > { %2174 = vst [vmem:[%s6076_s8 + $0xd8] sm:$0xff] %v2057_v10  ;;  %v1917_v51 = vadd.f32 %v2943_v60, %v6133_v5  ;;  %v2944_v19 = vpop.f32.mrb[122].mxu0 }
 0x295   : > { %v2945_v18 = vpop.f32.mrb[123].mxu0  ;;  %v3024_v34 = vpop.f32.mrb[122].mxu1 }
 0x296   : > { %v2062_v25 = vadd.f32 %v3023_v16, %v1917_v51  ;;  %v2946_v33 = vadd.f32 %v2945_v18, %v2944_v19  ;;  %v3025_v30 = vpop.f32.mrb[123].mxu1 }
 0x297   : > { %v3026_v53 = vadd.f32 %v3025_v30, %v3024_v34 }
 0x298   : > { %2175 = vst [vmem:[%s6076_s8 + $0xe0] sm:$0xff] %v2062_v25  ;;  %v1922_v26 = vadd.f32 %v2946_v33, %v6135_v24  ;;  %v2947_v29 = vpop.f32.mrb[124].mxu0 }
 0x299   : > { %v2948_v54 = vpop.f32.mrb[125].mxu0  ;;  %v3027_v14 = vpop.f32.mrb[124].mxu1 }
 0x29a   : > { %v2067_v4 = vadd.f32 %v3026_v53, %v1922_v26  ;;  %v2949_v31 = vadd.f32 %v2948_v54, %v2947_v29  ;;  %v3028_v5 = vpop.f32.mrb[125].mxu1 }
 0x29b   : > { %v3029_v0 = vadd.f32 %v3028_v5, %v3027_v14 }
 0x29c   : > { %2176 = vst [vmem:[%s6076_s8 + $0xe8] sm:$0xff] %v2067_v4  ;;  %v1927_v41 = vadd.f32 %v2949_v31, %v6137_v42  ;;  %v2950_v12 = vpop.f32.mrb[126].mxu0 }
 0x29d   : > { %v2951_v55 = vpop.f32.mrb[127].mxu0  ;;  %v3030_v27 = vpop.f32.mrb[126].mxu1 }
 0x29e   : > { %v2072_v21 = vadd.f32 %v3029_v0, %v1927_v41  ;;  %v2952_v32 = vadd.f32 %v2951_v55, %v2950_v12  ;;  %v3031_v40 = vpop.f32.mrb[127].mxu1 }
 0x29f   : > { %v3032_v24 = vadd.f32 %v3031_v40, %v3030_v27 }
 0x2a0   : > { %2177 = vst [vmem:[%s6076_s8 + $0xf0] sm:$0xff] %v2072_v21  ;;  %v1932_v59 = vadd.f32 %v2952_v32, %v6139_v44 }
 0x2a2   : > { %v2077_v28 = vadd.f32 %v3032_v24, %v1932_v59 }
 0x2a4   : > { %2178 = vst [vmem:[%s6076_s8 + $0xf8] sm:$0xff] %v2077_v28 }
 0x2a5   : > { %s3289_s5 = smul.u32 48, %s3675_s22  ;;  %s2211_s4 = sshll.u32 %s6076_s8, 4  ;;  %s2212_s4 = int_to_ptr.vmem [resolvable:$true] %s2211_s4 }
 0x2a6   : > { %s3697_s28 = smov 2048   ;;  %p7022_p5 = scmp.ne.s32.totalorder %s6498_s18, 0 }
 0x2a7   : > { %s2192_s12 = sadd.s32 %s3671_s21, %s3289_s5  ;;  %s7023_s3 = sld [smem:[#allocation138_spill]] }
 0x2a8   : > { %3296 = sst [smem:[#allocation11]] (%p7022_p5), %s3697_s28  ;;  %s2386_s6 = sshll.u32 %s2192_s12, 7 }
 0x2a9   : > { %s3698_s15 = smov 18432   ;;  %s3699_s14 = smov 16  }
 0x2aa   : > { %3297 = sst [smem:[#allocation11 + $0x1]] (%p7022_p5), %s3698_s15  ;;  %s3700_s22 = smov 128  }
 0x2ab   : > { %3298 = sst [smem:[#allocation11 + $0x2]] (%p7022_p5), %s3699_s14  ;;  %s3701_s30 = smov 384  }
 0x2ac   : > { %3299 = sst [smem:[#allocation11 + $0x3]] (%p7022_p5), %s3700_s22  ;;  %s3702_s21 = smov 8  }
 0x2ad   : > { %s2194_s11 = scalar_lea.hbm %s7023_s3, %s2386_s6  ;;  %3300 = sst [smem:[#allocation11 + $0x4]] (%p7022_p5), %s3701_s30 }
 0x2ae   : > { %3301 = sst [smem:[#allocation11 + $0x5]] (%p7022_p5), %s3702_s21  ;;  %s3703_s1 = smov [#allocation10]  }
 0x2af   : > { %s3704_s10 = smov 0  }
 0x2b0   : > { %3302 = dma.general (%p7022_p5), %s2212_s4, 4096, %s2194_s11, %s2180_s24, %s3703_s1, [#allocation11], %s3704_s10, 0  }
 0x2b1 PF: > { %s7024_s26 = sld [smem:[#allocation16_spill]]  ;;  %s7025_s7 = sld [smem:[#allocation23_spill]] }
 0x2b2   : > { %p3319_p9 = scmp.ge.s32.totalorder %s3687_s25, 2 }
 0x2b7   : > { %s2239_s8 = sand.u32 1, %s7024_s26   ;;  %p7026_p4 = scmp.ne.s32.totalorder %s7025_s7, 0 }
 0x2b8   : > { %s2240_s5 = scalar_lea.sflag [#allocation5], %s2239_s8 }
 0x2b9   : > { %p3315_p1 = pnand %p3319_p9, %p7026_p4 }
 0x2bb   : > { %3630 = dma.done.wait (!%p3315_p1), %s2240_s5, 4096  }
 0x2bc   : > { %3632 = vsyncadd (!%p3315_p1), %s2240_s5, 4294963200  ;;  %s22_s25 = sadd.s32 1, %s3687_s25   ;;  %s7028_s18 = sld [smem:[#allocation17_spill]] }
 0x2bd   : > { %p6200_p2 = scmp.ge.s32.totalorder %s22_s25, 11   ;;  %s7029_s14 = sld [smem:[#allocation22_spill]] }
 0x2be   : > { %s7030_s24 = sld [smem:[#allocation21_spill]]  ;;  %s7031_s22 = sld [smem:[#allocation18_spill]] }
 0x2bf   : > { %s7032_s4 = sld [smem:[#allocation19_spill]]  ;;  %s7033_s28 = sld [smem:[#allocation20_spill]] }
 0x2c0   : > { %s7035_s12 = smov %s3639_s13  ;;  %s7037_s15 = smov %s3651_s16 }
 0x2c1   : > { %s7038_s16 = smov %s3655_s17  ;;  %s7039_s17 = smov %s3960_s29 }
 0x2c2   : > { %s7036_s13 = smov %s7028_s18  ;;  %s7040_s18 = smov %s3663_s19 }
 0x2c3   : > { %s7041_s19 = smov %s3667_s20  ;;  %s7043_s21 = smov %s3679_s23 }
 0x2c4   : > { %s7042_s20 = smov %s7030_s24  ;;  %21 = sbr.rel (!%p6200_p2) target bundleno = 15 (0xf), region = 115 }
 0x2c5   : > { %s7044_s23 = smov %s7032_s4  ;;  %s7045_s24 = smov %s7033_s28 }
 0x2cb   :  { %2245 = vsyncpa [#allocation4], 1 }
 0x2cc   :  { %2247 = vsyncpa [#allocation4 + $0x1], 1 }
 0x2cd   :  { %2248 = vsyncpa [#allocation7], 1 }
 0x2ce   :  { %2250 = vsyncpa [#allocation7 + $0x1], 1 }
 0x2cf   :  { %2251 = vsyncpa [#allocation5], 1 }
 0x2d0   :  { %2253 = vsyncpa [#allocation5 + $0x1], 1 }

</bundles_post_ra>
